<compile_context>
chip_gen: v6e
topology: v6e:2x2x1
jax: 0.10.0
libtpu: 0.0.40
codegen_flags: <defaults>
</compile_context>

<pallas_src>
import jax
import jax.numpy as jnp
from jax.experimental import pallas as pl
from jax.experimental.pallas import tpu as pltpu

IN_FEATURES = 10   # fixed by Linear(10, 1)
LANES = 128        # samples packed per reshaped row


def net_kernel(x_ref, w_ref, b_ref, o_ref):
    # x_ref: (tr, 1280) f32 -- 128 samples per row, 10 features each
    # w_ref: (1280, 128) f32 -- block-diagonal fused weight (fc2 folded in)
    # b_ref: (1, 1)      f32 in SMEM -- fused bias scalar
    # o_ref: (tr, 128)   f32 -- lane-dense output tile
    acc = jnp.dot(x_ref[...], w_ref[...],
                  preferred_element_type=jnp.float32,
                  precision=jax.lax.Precision.HIGHEST)
    o_ref[...] = acc + b_ref[0, 0]


def net_forward(x, w1, b1, w2, b2, *, min_pallas_batch=16384):
    """Fused fc2(fc1(x)) forward pass.

    x : (B, 10) float
    w1: (10, 1) float32   (transposed torch weight of fc1)
    b1: (1, 1)  float32
    w2: (1, 1)  float32   (transposed torch weight of fc2)
    b2: (1, 1)  float32
    returns: (B, 1), same dtype as x
    """
    B, in_f = x.shape
    assert in_f == IN_FEATURES, in_f
    out_dtype = x.dtype

    # Fold fc2 (scalar scale + shift) into fc1 -- exact in f32 to one rounding.
    w_eff = (w1 * w2[0, 0]).astype(jnp.float32)                        # (10, 1)
    b_eff = (b1[0, 0] * w2[0, 0] + b2[0, 0]).astype(jnp.float32)       # scalar

    # Small / ragged batch: one fused XLA op beats kernel launch overhead.
    if B < min_pallas_batch or B % LANES != 0:
        out = x.astype(jnp.float32) @ w_eff + b_eff
        return out.astype(out_dtype)

    R = B // LANES
    # Contiguous reshape (metadata-only): sample 128*r + j lives in row r,
    # lanes 10*j .. 10*j + 9.
    xr = x.astype(jnp.float32).reshape(R, LANES * IN_FEATURES)          # (R, 1280)
    # Block-diagonal fused weight: W[10*j + k, j] = w_eff[k].
    w_bd = jnp.kron(jnp.eye(LANES, dtype=jnp.float32), w_eff)          # (1280, 128)
    b_arr = b_eff.reshape(1, 1)

    # Tile the row dimension: cap at 1024 rows (5 MiB input buffer) and aim
    # for >= 4 grid steps so both v7x TensorCores get work.
    target_steps = 4
    tr = -(-R // target_steps)          # ceil(R / target_steps)
    tr = -(-tr // 8) * 8                # round up to sublane multiple of 8
    tr = min(tr, 1024)
    if tr > R:
        tr = R                          # full-dim block is always legal
    grid = (pl.cdiv(R, tr),)            # ragged last block handled by Pallas

    out = pl.pallas_call(
        net_kernel,
        out_shape=jax.ShapeDtypeStruct((R, LANES), jnp.float32),
        grid=grid,
        in_specs=[
            pl.BlockSpec((tr, LANES * IN_FEATURES), lambda i: (i, 0)),   # x rows
            pl.BlockSpec((LANES * IN_FEATURES, LANES), lambda i: (0, 0)),  # weight
            pl.BlockSpec((1, 1), lambda i: (0, 0),
                         memory_space=pltpu.SMEM),                        # bias
        ],
        out_specs=pl.BlockSpec((tr, LANES), lambda i: (i, 0)),
        compiler_params=pltpu.CompilerParams(
            dimension_semantics=("parallel",),
            vmem_limit_bytes=32 * 1024 * 1024,   # safe on v5e/v6e/v7x
        ),
    )(xr, w_bd, b_arr)

    # Contiguous reshape back to (B, 1).
    return out.reshape(B, 1).astype(out_dtype)


def reference_forward(x, w1, b1, w2, b2):
    h = jnp.dot(x.astype(jnp.float32), w1,
                precision=jax.lax.Precision.HIGHEST) + b1
    return h * w2[0, 0] + b2[0, 0]


if __name__ == "__main__":
    key = jax.random.PRNGKey(0)
    kx, k1, k2, k3, k4 = jax.random.split(key, 5)

    # Deterministic parameter init (uniform like torch's default fan_in bound).
    bound1 = 1.0 / jnp.sqrt(float(IN_FEATURES))
    w1 = jax.random.uniform(k1, (IN_FEATURES, 1), jnp.float32, -bound1, bound1)
    b1 = jax.random.uniform(k2, (1, 1), jnp.float32, -bound1, bound1)
    w2 = jax.random.uniform(k3, (1, 1), jnp.float32, -1.0, 1.0)
    b2 = jax.random.uniform(k4, (1, 1), jnp.float32, -1.0, 1.0)

    # 1) Small batch: exercises the XLA fast path (below the Pallas threshold).
    x_small = jax.random.normal(kx, (8, IN_FEATURES), dtype=jnp.float32)
    out_small = jax.block_until_ready(net_forward(x_small, w1, b1, w2, b2))
    ref_small = reference_forward(x_small, w1, b1, w2, b2)
    assert out_small.shape == (8, 1), out_small.shape
    assert jnp.allclose(out_small, ref_small, atol=1e-5, rtol=1e-5)

    # 2) Moderate batch forced through the Pallas kernel (kept small for CI;
    #    the kernel really pays off at B >~ 100K).
    B = 1024
    x = jax.random.normal(kx, (B, IN_FEATURES), dtype=jnp.float32)
    out = jax.block_until_ready(
        net_forward(x, w1, b1, w2, b2, min_pallas_batch=256))
    ref = reference_forward(x, w1, b1, w2, b2)
    assert out.shape == (B, 1), out.shape
    assert jnp.allclose(out, ref, atol=1e-5, rtol=1e-5), (
        float(jnp.max(jnp.abs(out - ref))))

    print("KERNEL_OK")
</pallas_src>

<mosaic_0001>
module attributes {stable_mosaic.version = 11 : i64} {
  func.func @net_kernel(%arg0: i32, %arg1: memref<8x1280xf32, #tpu.memory_space<vmem>>, %arg2: memref<1280x128xf32, #tpu.memory_space<vmem>>, %arg3: memref<1x1xf32, #tpu.memory_space<smem>>, %arg4: memref<8x128xf32, #tpu.memory_space<vmem>>) attributes {dimension_semantics = [#tpu.dimension_semantics<parallel>], iteration_bounds = array<i64: 1>, scalar_prefetch = 0 : i64, scratch_operands = 0 : i64, tpu.core_type = #tpu.core_type<tc>, window_params = [{transform_indices = @transform_0, window_bounds = array<i64: 8, 1280>}, {pipeline_mode = #tpu.pipeline_mode<synchronous>, transform_indices = @transform_1, window_bounds = array<i64: 1280, 128>}, {transform_indices = @transform_2, window_bounds = array<i64: 1, 1>}, {transform_indices = @transform_3, window_bounds = array<i64: 8, 128>}]} {
    %c0 = arith.constant 0 : index
    %c0_0 = arith.constant 0 : index
    %0 = vector.load %arg1[%c0, %c0_0] : memref<8x1280xf32, #tpu.memory_space<vmem>>, vector<8x1280xf32>
    %c0_1 = arith.constant 0 : index
    %c0_2 = arith.constant 0 : index
    %1 = vector.load %arg2[%c0_1, %c0_2] : memref<1280x128xf32, #tpu.memory_space<vmem>>, vector<1280x128xf32>
    %cst = arith.constant dense<0.000000e+00> : vector<8x128xf32>
    %2 = tpu.matmul %0, %1, %cst {dimension_numbers = #tpu.dot_dimension_numbers<[1], [0], [0], [1], [0, 0, 1, 1], [], []>, precision = #tpu.contract_precision<fp32>} : vector<8x1280xf32>, vector<1280x128xf32>, vector<8x128xf32> -> vector<8x128xf32>
    %c0_3 = arith.constant 0 : index
    %c0_4 = arith.constant 0 : index
    %3 = memref.load %arg3[%c0_3, %c0_4] : memref<1x1xf32, #tpu.memory_space<smem>>
    %4 = vector.broadcast %3 : f32 to vector<8x128xf32>
    %5 = arith.addf %2, %4 : vector<8x128xf32>
    %c0_5 = arith.constant 0 : index
    %c0_6 = arith.constant 0 : index
    %6 = vector.load %arg4[%c0_5, %c0_6] : memref<8x128xf32, #tpu.memory_space<vmem>>, vector<8x128xf32>
    tpu.vector_store %arg4[%c0_5, %c0_6], %5 {strides = array<i32>} : memref<8x128xf32, #tpu.memory_space<vmem>>, vector<8x128xf32>,
    return
  }
  func.func @transform_0(%arg0: i32) -> (i32, i32) {
    %c0_i32 = arith.constant 0 : i32
    %c0_i32_0 = arith.constant 0 : i32
    return %arg0, %c0_i32 : i32, i32
  }
  func.func @transform_1(%arg0: i32) -> (i32, i32) {
    %c0_i32 = arith.constant 0 : i32
    %c0_i32_0 = arith.constant 0 : i32
    %c0_i32_1 = arith.constant 0 : i32
    return %c0_i32, %c0_i32_0 : i32, i32
  }
  func.func @transform_2(%arg0: i32) -> (i32, i32) {
    %c0_i32 = arith.constant 0 : i32
    %c0_i32_0 = arith.constant 0 : i32
    %c0_i32_1 = arith.constant 0 : i32
    return %c0_i32, %c0_i32_0 : i32, i32
  }
  func.func @transform_3(%arg0: i32) -> (i32, i32) {
    %c0_i32 = arith.constant 0 : i32
    %c0_i32_0 = arith.constant 0 : i32
    return %arg0, %c0_i32 : i32, i32
  }
}

</mosaic_0001>

<bundles_post_ra>
// kernel: tpu_custom_call.1
= control target key start
LH: loop header
LB: loop body
LE: loop exit
PB: predicated region body
PF: predicated region fallthrough
CT: control target
= control target key end

     0   :  { %9 = vsyncpa [#allocation4], 0  ;;  %s8604_s0 = inlined_call_operand.hbm [shape: f32[8,1280], index: 0, kind: input, shape index: {}]   ;;  %s8605_s1 = inlined_call_operand.hbm [shape: f32[1280,128], index: 1, kind: input, shape index: {}]   ;;  %s8606_s2 = inlined_call_operand.<no memory space> [shape: f32[1,1], index: 2, kind: input, shape index: {}]   ;;  %s8607_s3 = inlined_call_operand.hbm [shape: f32[8,128], index: 3, kind: output, shape index: {}]  }
   0x1   :  { %10 = vsyncpa [#allocation7], 0 }
   0x2   :  { %11 = vsyncpa [#allocation5], 0  ;;  %s5662_s12 = smov [#allocation3]   ;;  %s5663_s14 = smov [#allocation6]  }
   0x3   :  { %s18_s13 = sshll.u32 %s5662_s12, 4  ;;  %s27_s15 = sshll.u32 %s5663_s14, 4  ;;  %s19_s13 = int_to_ptr.vmem [resolvable:$true] %s18_s13  ;;  %s28_s15 = int_to_ptr.vmem [resolvable:$true] %s27_s15 }
   0x4   :  { %s5604_s16 = scalar_lea.vmem %s19_s13, 1280  ;;  %p5609_p1 = scmp.lt.s32.totalorder %s19_s13, %s19_s13 }
   0x5   :  { %p5605_p0 = scmp.ne.s32.totalorder %s19_s13, %s5604_s16  ;;  %p5610_p2 = scmp.lt.s32.totalorder %s5604_s16, %s5604_s16 }
   0x7   :  { %p5611_p3 = por %p5610_p2, %p5609_p1 }
   0x9   :  { %p5612_p4 = pnand %p5611_p3, %p5605_p0 }
   0xb   :  { %5615 = shalt.err (!%p5612_p4)
}
   0xc   :  { %21 = dma.hbm_to_vmem [thread:$0]  %s8604_s0, 1280, %s19_s13, [#allocation4]  }
   0xd   :  { %s5624_s19 = scalar_lea.vmem %s28_s15, 20480  ;;  %p5629_p6 = scmp.lt.s32.totalorder %s28_s15, %s28_s15 }
   0xe   :  { %p5625_p5 = scmp.ne.s32.totalorder %s28_s15, %s5624_s19  ;;  %p5630_p7 = scmp.lt.s32.totalorder %s5624_s19, %s5624_s19 }
  0x10   :  { %p5631_p8 = por %p5630_p7, %p5629_p6 }
  0x12   :  { %p5632_p9 = pnand %p5631_p8, %p5625_p5 }
  0x14   :  { %5635 = shalt.err (!%p5632_p9)
}
  0x15   :  { %s5664_s20 = smov 128   ;;  %s5665_s21 = smov 8  }
  0x16   :  { %33 = dma.hbm_to_vmem [thread:$0]  %s8605_s1, 20480, %s28_s15, [#allocation7], %s5664_s20, %s5664_s20, %s5665_s21  }
  0x17   :  { %5656 = dma.done.wait [#allocation4], 1280  }
  0x18   :  { %5657 = vsyncadd [#allocation4], 4294966016 }
  0x19   :  { %5658 = dma.done.wait [#allocation7], 20480  }
  0x1a   :  { %5659 = vsyncadd [#allocation7], 4294946816  ;;  %v83_v0 = vld [vmem:[#allocation6 + $0xf8] sm:$0xff]  ;;  %v82_v2 = vld [vmem:[#allocation6 + $0xf0] sm:$0xff] }
  0x1b   :  { %v67_v1 = vld [vmem:[#allocation6 + $0x78] sm:$0xff]  ;;  %v5693_v3 = vand.u32 4294901760, %v83_v0  ;;  %v5697_v5 = vand.u32 4294901760, %v82_v2  ;;  %v66_v6 = vld [vmem:[#allocation6 + $0x70] sm:$0xff]  ;;  %v81_v7 = vld [vmem:[#allocation6 + $0xe8] sm:$0xff] }
  0x1c   :  { %v5695_v4 = vand.u32 4294901760, %v67_v1  ;;  %v65_v8 = vld [vmem:[#allocation6 + $0x68] sm:$0xff]  ;;  %v5699_v9 = vand.u32 4294901760, %v66_v6  ;;  %v5701_v10 = vand.u32 4294901760, %v81_v7  ;;  %v80_v12 = vld [vmem:[#allocation6 + $0xe0] sm:$0xff]  ;;  %v79_v14 = vld [vmem:[#allocation6 + $0xd8] sm:$0xff] }
  0x1d   :  { %v5703_v11 = vand.u32 4294901760, %v65_v8  ;;  %v64_v13 = vld [vmem:[#allocation6 + $0x60] sm:$0xff]  ;;  %4541 = vmatprep.subr.mxu0 %v5693_v3  ;;  %v5706_v15 = vand.u32 4294901760, %v80_v12  ;;  %v5710_v17 = vand.u32 4294901760, %v79_v14  ;;  %v5713_v18 = vsub.f32 %v83_v0, %v5693_v3  ;;  %v5715_v19 = vld [vmem:[#allocation6 + $0x58] sm:$0xff]  ;;  %v5717_v20 = vld [vmem:[#allocation6 + $0xd0] sm:$0xff] }
  0x1e   :  { %v5708_v16 = vand.u32 4294901760, %v64_v13  ;;  %v5719_v21 = vld [vmem:[#allocation6 + $0x50] sm:$0xff]  ;;  %4542 = vmatpush3.msra.mxu0 %v5695_v4  ;;  %v5723_v22 = vand.u32 4294901760, %v5715_v19  ;;  %v5726_v23 = vsub.f32 %v67_v1, %v5695_v4  ;;  %v5729_v24 = vand.u32 4294901760, %v5717_v20  ;;  %v5734_v26 = vld [vmem:[#allocation6 + $0xc8] sm:$0xff]  ;;  %v5738_v28 = vld [vmem:[#allocation6 + $0xc0] sm:$0xff] }
  0x1f   :  { %v5732_v25 = vsub.f32 %v82_v2, %v5697_v5  ;;  %v5736_v27 = vld [vmem:[#allocation6 + $0x48] sm:$0xff]  ;;  %4543 = vmatprep.subr.mxu0 %v5697_v5  ;;  %v8621_v29 = vand.u32 4294901760, %v5713_v18  ;;  %v5743_v30 = vand.u32 4294901760, %v5719_v21  ;;  %v5746_v31 = vsub.f32 %v66_v6, %v5699_v9  ;;  %v5760_v37 = vld [vmem:[#allocation6 + $0x40] sm:$0xff]  ;;  %v5784_v46 = vld [vmem:[#allocation6 + $0xb8] sm:$0xff] }
  0x20   :  { %8944 = vst [vmem:[#allocation12_spill] sm:$0xff] %v5729_v24  ;;  %v5749_v32 = vand.u32 4294901760, %v5734_v26  ;;  %4544 = vmatpush3.msra.mxu0 %v5699_v9  ;;  %v8619_v33 = vand.u32 4294901760, %v5726_v23  ;;  %v5755_v35 = vsub.f32 %v81_v7, %v5701_v10  ;;  %v5758_v36 = vand.u32 4294901760, %v5736_v27  ;;  %v5794_v51 = vld [vmem:[#allocation6 + $0x38] sm:$0xff]  ;;  %v5801_v56 = vld [vmem:[#allocation6 + $0xb0] sm:$0xff] }
  0x21   :  { %8945 = vst [vmem:[#allocation13_spill] sm:$0xff] %v5743_v30  ;;  %v8618_v34 = vand.u32 4294901760, %v5732_v25  ;;  %4545 = vmatprep.subr.mxu0 %v5701_v10  ;;  %v442_v38 = vsub.f32 %v5713_v18, %v8621_v29  ;;  %v8616_v39 = vand.u32 4294901760, %v5746_v31  ;;  %v5768_v40 = vsub.f32 %v65_v8, %v5703_v11  ;;  %v5813_v61 = vld [vmem:[#allocation6 + $0x30] sm:$0xff]  ;;  %v5825_v2 = vld [vmem:[#allocation6 + $0xa8] sm:$0xff] }
  0x22   :  { %8946 = vst [vmem:[#allocation14_spill] sm:$0xff] %v5749_v32  ;;  %8947 = vst [vmem:[#allocation15_spill] sm:$0xff] %v5758_v36  ;;  %v5771_v41 = vand.u32 4294901760, %v5738_v28  ;;  %4546 = vmatpush3.msra.mxu0 %v5703_v11  ;;  %v330_v42 = vsub.f32 %v5726_v23, %v8619_v33  ;;  %v8614_v44 = vand.u32 4294901760, %v5755_v35  ;;  %v5782_v45 = vsub.f32 %v80_v12, %v5706_v15 }
  0x23   :  { %v449_v43 = vsub.f32 %v5732_v25, %v8618_v34  ;;  %4547 = vmatprep.subr.mxu0 %v5706_v15  ;;  %v443_v47 = vand.u32 4294901760, %v442_v38  ;;  %v337_v48 = vsub.f32 %v5746_v31, %v8616_v39  ;;  %v8613_v49 = vand.u32 4294901760, %v5768_v40  ;;  %v5916_v39 = vld [vmem:[#allocation6 + $0x90] sm:$0xff] }
  0x24   :  { %8948 = vst [vmem:[#allocation16_spill] sm:$0xff] %v5771_v41  ;;  %v5792_v50 = vand.u32 4294901760, %v5760_v37  ;;  %4548 = vmatpush3.msra.mxu0 %v5708_v16  ;;  %v331_v52 = vand.u32 4294901760, %v330_v42  ;;  %v456_v54 = vsub.f32 %v5755_v35, %v8614_v44  ;;  %v8611_v55 = vand.u32 4294901760, %v5782_v45  ;;  %v5926_v34 = vld [vmem:[#allocation6 + $0x10] sm:$0xff] }
  0x25   :  { %v450_v53 = vand.u32 4294901760, %v449_v43  ;;  %4549 = vmatprep.subr.mxu0 %v5710_v17  ;;  %4576 = vmatprep.subr.mxu1 %v443_v47  ;;  %v338_v57 = vand.u32 4294901760, %v337_v48  ;;  %v344_v58 = vsub.f32 %v5768_v40, %v8613_v49  ;;  %v5808_v59 = vsub.f32 %v64_v13, %v5708_v16  ;;  %v5836_v13 = vld [vmem:[#allocation6 + $0x28] sm:$0xff]  ;;  %v5903_v49 = vld [vmem:[#allocation6 + $0x18] sm:$0xff] }
  0x26   :  { %8949 = vst [vmem:[#allocation17_spill] sm:$0xff] %v5792_v50  ;;  %v5811_v60 = vand.u32 4294901760, %v5784_v46  ;;  %4550 = vmatpush3.msra.mxu0 %v5723_v22  ;;  %4577 = vmatpush3.msra.mxu1 %v331_v52  ;;  %v457_v62 = vand.u32 4294901760, %v456_v54  ;;  %v463_v63 = vsub.f32 %v5782_v45, %v8611_v55  ;;  %v5820_v0 = vsub.f32 %v79_v14, %v5710_v17 }
  0x27   :  { %v5823_v1 = vand.u32 4294901760, %v5794_v51  ;;  %4551 = vmatprep.subr.mxu0 %v5729_v24  ;;  %4578 = vmatprep.subr.mxu1 %v450_v53  ;;  %v345_v6 = vand.u32 4294901760, %v344_v58  ;;  %v8609_v7 = vand.u32 4294901760, %v5808_v59  ;;  %v5831_v8 = vsub.f32 %v5715_v19, %v5723_v22 }
  0x28   :  { %8950 = vst [vmem:[#allocation18_spill] sm:$0xff] %v5811_v60  ;;  %v5834_v12 = vand.u32 4294901760, %v5801_v56  ;;  %4552 = vmatpush3.msra.mxu0 %v5743_v30  ;;  %4579 = vmatpush3.msra.mxu1 %v338_v57  ;;  %v464_v14 = vand.u32 4294901760, %v463_v63  ;;  %v8608_v38 = vand.u32 4294901760, %v5820_v0  ;;  %v5842_v42 = vsub.f32 %v5717_v20, %v5729_v24  ;;  %v5859_v20 = vld [vmem:[#allocation6 + $0xa0] sm:$0xff] }
  0x29   :  { %8951 = vst [vmem:[#allocation19_spill] sm:$0xff] %v5823_v1  ;;  %v5845_v43 = vand.u32 4294901760, %v5813_v61  ;;  %4553 = vmatprep.subr.mxu0 %v5749_v32  ;;  %4580 = vmatprep.subr.mxu1 %v457_v62  ;;  %v351_v19 = vsub.f32 %v5808_v59, %v8609_v7  ;;  %v8610_v47 = vand.u32 4294901760, %v5831_v8  ;;  %v5854_v48 = vsub.f32 %v5719_v21, %v5743_v30 }
  0x2a   :  { %8952 = vst [vmem:[#allocation20_spill] sm:$0xff] %v5834_v12  ;;  %v5857_v52 = vand.u32 4294901760, %v5825_v2  ;;  %4554 = vmatpush3.msra.mxu0 %v5758_v36  ;;  %4581 = vmatpush3.msra.mxu1 %v345_v6  ;;  %v470_v53 = vsub.f32 %v5820_v0, %v8608_v38  ;;  %v8612_v54 = vand.u32 4294901760, %v5842_v42  ;;  %v5868_v57 = vsub.f32 %v5734_v26, %v5749_v32  ;;  %v5882_v38 = vld [vmem:[#allocation6 + $0x20] sm:$0xff] }
  0x2b   :  { %8953 = vst [vmem:[#allocation21_spill] sm:$0xff] %v5845_v43  ;;  %v5871_v21 = vand.u32 4294901760, %v5836_v13  ;;  %4555 = vmatprep.subr.mxu0 %v5771_v41  ;;  %4582 = vmatprep.subr.mxu1 %v464_v14  ;;  %v352_v58 = vand.u32 4294901760, %v351_v19  ;;  %v358_v62 = vsub.f32 %v5831_v8, %v8610_v47  ;;  %v8615_v63 = vand.u32 4294901760, %v5854_v48  ;;  %v5892_v47 = vld [vmem:[#allocation6 + $0x98] sm:$0xff] }
  0x2c   :  { %8954 = vst [vmem:[#allocation22_spill] sm:$0xff] %v5857_v52  ;;  %v5880_v6 = vsub.f32 %v5736_v27, %v5758_v36  ;;  %4556 = vmatpush3.msra.mxu0 %v5792_v50  ;;  %v471_v26 = vand.u32 4294901760, %v470_v53  ;;  %v477_v14 = vsub.f32 %v5842_v42, %v8612_v54  ;;  %v8617_v19 = vand.u32 4294901760, %v5868_v57  ;;  %v43_v36 = vld [vmem:[#allocation3 + $0x8] sm:$0xff] }
  0x2d   :  { %8955 = vst [vmem:[#allocation23_spill] sm:$0xff] %v5871_v21  ;;  %v5890_v7 = vand.u32 4294901760, %v5859_v20  ;;  %4583 = vmatpush3.msra.mxu1 %v352_v58  ;;  %4557 = vmatprep.subr.mxu0 %v5811_v60  ;;  %v359_v27 = vand.u32 4294901760, %v358_v62  ;;  %v365_v55 = vsub.f32 %v5854_v48, %v8615_v63  ;;  %v5901_v54 = vsub.f32 %v5738_v28, %v5771_v41 }
  0x2e   :  { %v8620_v53 = vand.u32 4294901760, %v5880_v6  ;;  %4584 = vmatprep.subr.mxu1 %v471_v26  ;;  %4558 = vmatpush3.msra.mxu0 %v5823_v1  ;;  %v478_v44 = vand.u32 4294901760, %v477_v14  ;;  %v484_v58 = vsub.f32 %v5868_v57, %v8617_v19  ;;  %v5910_v62 = vand.u32 4294901760, %v5882_v38 }
  0x2f   :  { %8956 = vst [vmem:[#allocation24_spill] sm:$0xff] %v5890_v7  ;;  %v5914_v63 = vsub.f32 %v5760_v37, %v5792_v50  ;;  %4585 = vmatpush3.msra.mxu1 %v359_v27  ;;  %4559 = vmatprep.subr.mxu0 %v5834_v12  ;;  %v366_v28 = vand.u32 4294901760, %v365_v55  ;;  %v8624_v14 = vand.u32 4294901760, %v5901_v54  ;;  %v5924_v19 = vand.u32 4294901760, %v5892_v47 }
  0x30   :  { %8957 = vst [vmem:[#allocation25_spill] sm:$0xff] %v5910_v62  ;;  %v372_v26 = vsub.f32 %v5880_v6, %v8620_v53  ;;  %4586 = vmatprep.subr.mxu1 %v478_v44  ;;  %4560 = vmatpush3.msra.mxu0 %v5845_v43  ;;  %v485_v37 = vand.u32 4294901760, %v484_v58  ;;  %v5932_v55 = vsub.f32 %v5784_v46, %v5811_v60  ;;  %v5935_v33 = vand.u32 4294901760, %v5903_v49  ;;  %v5937_v53 = vld [vmem:[#allocation6 + $0x88] sm:$0xff] }
  0x31   :  { %v8627_v27 = vand.u32 4294901760, %v5914_v63  ;;  %4587 = vmatpush3.msra.mxu1 %v366_v28  ;;  %4561 = vmatprep.subr.mxu0 %v5857_v52  ;;  %v491_v44 = vsub.f32 %v5901_v54, %v8624_v14  ;;  %v5945_v58 = vsub.f32 %v5794_v51, %v5823_v1  ;;  %v5948_v46 = vand.u32 4294901760, %v5916_v39  ;;  %v5962_v51 = vld [vmem:[#allocation6 + $0x8] sm:$0xff] }
  0x32   :  { %8958 = vst [vmem:[#allocation26_spill] sm:$0xff] %v5935_v33  ;;  %v373_v29 = vand.u32 4294901760, %v372_v26  ;;  %4588 = vmatprep.subr.mxu1 %v485_v37  ;;  %4562 = vmatpush3.msra.mxu0 %v5871_v21  ;;  %v5957_v60 = vsub.f32 %v5801_v56, %v5834_v12  ;;  %v5960_v14 = vand.u32 4294901760, %v5926_v34  ;;  %v5971_v26 = vand.u32 4294901760, %v5937_v53  ;;  %v5973_v56 = vld [vmem:[#allocation6 + $0x80] sm:$0xff] }
  0x33   :  { %8959 = vst [vmem:[#allocation27_spill] sm:$0xff] %v5948_v46  ;;  %v379_v28 = vsub.f32 %v5914_v63, %v8627_v27  ;;  %4563 = vmatprep.subr.mxu0 %v5890_v7  ;;  %v492_v37 = vand.u32 4294901760, %v491_v44  ;;  %v5968_v27 = vsub.f32 %v5813_v61, %v5845_v43  ;;  %v8962_v50 = vand.u32 4294901760, %v5932_v55  ;;  %v5996_v44 = vld [vmem:[#allocation6] sm:$0xff] }
  0x34   :  { %8960 = vst [vmem:[#allocation28_spill] sm:$0xff] %v5960_v14  ;;  %4589 = vmatpush3.msra.mxu1 %v373_v29  ;;  %8961 = vst [vmem:[#allocation29_spill] sm:$0xff] %v5971_v26  ;;  %4564 = vmatpush3.msra.mxu0 %v5910_v62  ;;  %v5982_v1 = vsub.f32 %v5825_v2, %v5857_v52  ;;  %v8964_v61 = vand.u32 4294901760, %v5945_v58  ;;  %v6004_v41 = vand.u32 4294901760, %v5973_v56  ;;  %v6020_v24 = vand.u32 4294901760, %v5996_v44 }
  0x35   :  { %v380_v12 = vand.u32 4294901760, %v379_v28  ;;  %v498_v29 = vsub.f32 %v5932_v55, %v8962_v50  ;;  %4590 = vmatprep.subr.mxu1 %v492_v37  ;;  %4565 = vmatprep.subr.mxu0 %v5924_v19  ;;  %v5990_v28 = vand.u32 4294901760, %v5962_v51  ;;  %v5994_v50 = vsub.f32 %v5836_v13, %v5871_v21 }
  0x36   :  { %8963 = vst [vmem:[#allocation30_spill] sm:$0xff] %v5982_v1  ;;  %v386_v43 = vsub.f32 %v5945_v58, %v8964_v61  ;;  %4566 = vmatpush3.msra.mxu0 %v5935_v33  ;;  %v8965_v37 = vand.u32 4294901760, %v5957_v60  ;;  %v8966_v13 = vand.u32 4294901760, %v5968_v27  ;;  %v6013_v21 = vsub.f32 %v5859_v20, %v5890_v7 }
  0x37   :  { %4591 = vmatpush3.msra.mxu1 %v380_v12  ;;  %v499_v2 = vand.u32 4294901760, %v498_v29  ;;  %4567 = vmatprep.subr.mxu0 %v5948_v46  ;;  %v8967_v30 = vand.u32 4294901760, %v5982_v1  ;;  %v8968_v20 = vand.u32 4294901760, %v5994_v50  ;;  %v6031_v7 = vand.u32 4294901760, %v43_v36 }
  0x38   :  { %v505_v52 = vsub.f32 %v5957_v60, %v8965_v37  ;;  %v387_v32 = vand.u32 4294901760, %v386_v43  ;;  %v393_v12 = vsub.f32 %v5968_v27, %v8966_v13  ;;  %v42_v37 = vld [vmem:[#allocation3] sm:$0xff]  ;;  %4568 = vmatpush3.msra.mxu0 %v5960_v14  ;;  %v6024_v13 = vsub.f32 %v5882_v38, %v5910_v62 }
  0x39   :  { %4592 = vmatprep.subr.mxu1 %v499_v2  ;;  %v512_v43 = vsub.f32 %v5982_v1, %v8967_v30  ;;  %4569 = vmatprep.subr.mxu0 %v5971_v26  ;;  %v8652_v2 = vand.u32 4294901760, %v6013_v21  ;;  %8969 = vst [vmem:[#allocation31_spill] sm:$0xff] %v6031_v7  ;;  %v6039_v38 = vand.u32 4294901760, %v42_v37 }
  0x3a   :  { %v506_v61 = vand.u32 4294901760, %v505_v52  ;;  %4593 = vmatpush3.msra.mxu1 %v387_v32  ;;  %v394_v29 = vand.u32 4294901760, %v393_v12  ;;  %v400_v52 = vsub.f32 %v5994_v50, %v8968_v20  ;;  %4570 = vmatpush3.msra.mxu0 %v5990_v28  ;;  %v8653_v1 = vand.u32 4294901760, %v6024_v13 }
  0x3b   :  { %v513_v30 = vand.u32 4294901760, %v512_v43  ;;  %v6037_v32 = vsub.f32 %v5892_v47, %v5924_v19  ;;  %8970 = vst [vmem:[#allocation32_spill] sm:$0xff] %v6039_v38  ;;  %4571 = vmatprep.subr.mxu0 %v6004_v41  ;;  %v519_v20 = vsub.f32 %v6013_v21, %v8652_v2  ;;  %v6050_v43 = vsub.f32 %v5903_v49, %v5935_v33 }
  0x3c   :  { %4594 = vmatprep.subr.mxu1 %v506_v61  ;;  %v401_v12 = vand.u32 4294901760, %v400_v52  ;;  %v6046_v61 = vsub.f32 %v43_v36, %v6031_v7  ;;  %4572 = vmatpush3.msra.mxu0 %v6020_v24  ;;  %v407_v47 = vsub.f32 %v6024_v13, %v8653_v1  ;;  %v6058_v52 = vsub.f32 %v42_v37, %v6039_v38 }
  0x3d   :  { %4595 = vmatpush3.msra.mxu1 %v394_v29  ;;  %v6062_v36 = vsub.f32 %v5916_v39, %v5948_v46  ;;  %v520_v2 = vand.u32 4294901760, %v519_v20  ;;  %4611 = vmatprep.subr.mxu0 %v5713_v18  ;;  %v6069_v1 = vsub.f32 %v5926_v34, %v5960_v14  ;;  %v8971_v37 = vand.u32 4294901760, %v6037_v32 }
  0x3e   :  { %4596 = vmatprep.subr.mxu1 %v513_v30  ;;  %v8658_v49 = vand.u32 4294901760, %v6046_v61  ;;  %v8661_v30 = vand.u32 4294901760, %v6050_v43  ;;  %v408_v29 = vand.u32 4294901760, %v407_v47  ;;  %551 = vmatprep.mubr.f32.mxu1 %v6031_v7  ;;  %v6096_v14 = vsub.f32 %v5962_v51, %v5990_v28 }
  0x3f   :  { %4597 = vmatpush3.msra.mxu1 %v401_v12  ;;  %v526_v33 = vsub.f32 %v6037_v32, %v8971_v37  ;;  %v6086_v37 = vsub.f32 %v5937_v53, %v5971_v26  ;;  %v8972_v12 = vand.u32 4294901760, %v6058_v52  ;;  %v8973_v7 = vand.u32 4294901760, %v6062_v36 }
  0x40   :  { %4598 = vmatprep.subr.mxu1 %v520_v2  ;;  %v313_v20 = vsub.f32 %v6046_v61, %v8658_v49  ;;  %v414_v34 = vsub.f32 %v6050_v43, %v8661_v30  ;;  %8974 = vst [vmem:[#allocation33_spill] sm:$0xff] %v6096_v14  ;;  %v8975_v46 = vand.u32 4294901760, %v6069_v1 }
  0x41   :  { %4599 = vmatpush3.msra.mxu1 %v408_v29  ;;  %v527_v39 = vand.u32 4294901760, %v526_v33  ;;  %v319_v2 = vsub.f32 %v6058_v52, %v8972_v12  ;;  %v533_v49 = vsub.f32 %v6062_v36, %v8973_v7  ;;  %v8669_v33 = vand.u32 4294901760, %v6086_v37 }
  0x42   :  { %v314_v30 = vand.u32 4294901760, %v313_v20  ;;  %v415_v47 = vand.u32 4294901760, %v414_v34  ;;  %v421_v53 = vsub.f32 %v6069_v1, %v8975_v46  ;;  %v8668_v12 = vand.u32 4294901760, %v6096_v14 }
  0x43   :  { %4600 = vmatprep.subr.mxu1 %v527_v39  ;;  %v320_v29 = vand.u32 4294901760, %v319_v2  ;;  %v534_v26 = vand.u32 4294901760, %v533_v49  ;;  %v6105_v7 = vsub.f32 %v5973_v56, %v6004_v41  ;;  %v540_v20 = vsub.f32 %v6086_v37, %v8669_v33 }
  0x44   :  { %315 = vmatprep.mubr.f32.mxu0 %v314_v30  ;;  %4601 = vmatpush3.msra.mxu1 %v415_v47  ;;  %v422_v51 = vand.u32 4294901760, %v421_v53  ;;  %v6112_v46 = vsub.f32 %v5996_v44, %v6020_v24  ;;  %v428_v49 = vsub.f32 %v6096_v14, %v8668_v12  ;;  %v8978_v53 = vld [vmem:[#allocation12_spill] sm:$0xff]  ;;  %v8992_v33 = vand.u32 4294901760, %v5713_v18 }
  0x45   :  { %8976 = vst [vmem:[#allocation34_spill] sm:$0xff] %v6105_v7  ;;  %321 = vmatmul.mubr.f32.vlgmr.msra.gmra.mxu0 %v320_v29  ;;  %4602 = vmatprep.subr.mxu1 %v534_v26  ;;  %v8667_v56 = vand.u32 4294901760, %v6105_v7  ;;  %v541_v30 = vand.u32 4294901760, %v540_v20  ;;  %v8979_v29 = vld [vmem:[#allocation13_spill] sm:$0xff]  ;;  %v8981_v20 = vld [vmem:[#allocation14_spill] sm:$0xff]  ;;  %v8991_v12 = vld [vmem:[#allocation24_spill] sm:$0xff] }
  0x46   :  { %8977 = vst [vmem:[#allocation35_spill] sm:$0xff] %v6112_v46  ;;  %4612 = vmatpush3.msra.mxu0 %v5726_v23  ;;  %4603 = vmatpush3.msra.mxu1 %v422_v51  ;;  %v8666_v39 = vand.u32 4294901760, %v6112_v46  ;;  %v429_v34 = vand.u32 4294901760, %v428_v49  ;;  %v8980_v51 = vld [vmem:[#allocation30_spill] sm:$0xff]  ;;  %v8982_v49 = vld [vmem:[#allocation15_spill] sm:$0xff]  ;;  %v9000_v18 = vand.u32 4294901760, %v5755_v35 }
  0x47   :  { %4613 = vmatprep.subr.mxu0 %v5732_v25  ;;  %v547_v44 = vsub.f32 %v6105_v7, %v8667_v56  ;;  %688 = vmatprep.mubr.f32.mxu0 %v6046_v61  ;;  %v8990_v56 = vld [vmem:[#allocation23_spill] sm:$0xff] }
  0x48   :  { %4614 = vmatpush3.msra.mxu0 %v5746_v31  ;;  %4604 = vmatprep.subr.mxu1 %v541_v30  ;;  %v435_v26 = vsub.f32 %v6112_v46, %v8666_v39  ;;  %v8983_v30 = vld [vmem:[#allocation16_spill] sm:$0xff]  ;;  %v8989_v39 = vld [vmem:[#allocation22_spill] sm:$0xff] }
  0x49   :  { %4615 = vmatprep.subr.mxu0 %v5755_v35  ;;  %4605 = vmatpush3.msra.mxu1 %v429_v34  ;;  %v548_v47 = vand.u32 4294901760, %v547_v44  ;;  %v8984_v34 = vld [vmem:[#allocation17_spill] sm:$0xff]  ;;  %v8985_v44 = vld [vmem:[#allocation18_spill] sm:$0xff]  ;;  %v9005_v35 = vand.u32 4294901760, %v6058_v52 }
  0x4a   :  { %4616 = vmatpush3.msra.mxu0 %v5768_v40  ;;  %v436_v2 = vand.u32 4294901760, %v435_v26  ;;  %v8986_v26 = vld [vmem:[#allocation19_spill] sm:$0xff] }
  0x4b   :  { %4606 = vmatprep.subr.mxu1 %v548_v47  ;;  %4617 = vmatprep.subr.mxu0 %v5782_v45  ;;  %v8987_v47 = vld [vmem:[#allocation20_spill] sm:$0xff] }
  0x4c   :  { %4607 = vmatpush3.msra.mxu1 %v436_v2  ;;  %4618 = vmatpush3.msra.mxu0 %v5808_v59  ;;  %v8988_v2 = vld [vmem:[#allocation21_spill] sm:$0xff] }
  0x4d   :  { %553 = vmatmul.mubr.f32.vlgmr.msra.gmra.mxu1 %v6039_v38  ;;  %4619 = vmatprep.subr.mxu0 %v5820_v0  ;;  %v8993_v38 = vld [vmem:[#allocation26_spill] sm:$0xff] }
  0x4e   :  { %4646 = vmatprep.subr.mxu1 %v5693_v3  ;;  %4620 = vmatpush3.msra.mxu0 %v5831_v8 }
  0x4f   :  { %4647 = vmatpush3.msra.mxu1 %v5695_v4  ;;  %4621 = vmatprep.subr.mxu0 %v5842_v42 }
  0x50   :  { %4648 = vmatprep.subr.mxu1 %v5697_v5  ;;  %4622 = vmatpush3.msra.mxu0 %v5854_v48 }
  0x51   :  { %4649 = vmatpush3.msra.mxu1 %v5699_v9  ;;  %4623 = vmatprep.subr.mxu0 %v5868_v57 }
  0x52   :  { %4650 = vmatprep.subr.mxu1 %v5701_v10  ;;  %4624 = vmatpush3.msra.mxu0 %v5880_v6 }
  0x53   :  { %4651 = vmatpush3.msra.mxu1 %v5703_v11  ;;  %4625 = vmatprep.subr.mxu0 %v5901_v54 }
  0x54   :  { %4652 = vmatprep.subr.mxu1 %v5706_v15  ;;  %4626 = vmatpush3.msra.mxu0 %v5914_v63 }
  0x55   :  { %4653 = vmatpush3.msra.mxu1 %v5708_v16  ;;  %4627 = vmatprep.subr.mxu0 %v5932_v55 }
  0x56   :  { %4654 = vmatprep.subr.mxu1 %v5710_v17  ;;  %4628 = vmatpush3.msra.mxu0 %v5945_v58 }
  0x57   :  { %4655 = vmatpush3.msra.mxu1 %v5723_v22  ;;  %4629 = vmatprep.subr.mxu0 %v5957_v60 }
  0x58   :  { %4656 = vmatprep.subr.mxu1 %v8978_v53  ;;  %4630 = vmatpush3.msra.mxu0 %v5968_v27 }
  0x59   :  { %4657 = vmatpush3.msra.mxu1 %v8979_v29  ;;  %4631 = vmatprep.subr.mxu0 %v8980_v51 }
  0x5a   :  { %4658 = vmatprep.subr.mxu1 %v8981_v20  ;;  %4632 = vmatpush3.msra.mxu0 %v5994_v50 }
  0x5b   :  { %4659 = vmatpush3.msra.mxu1 %v8982_v49  ;;  %4633 = vmatprep.subr.mxu0 %v6013_v21 }
  0x5c   :  { %4660 = vmatprep.subr.mxu1 %v8983_v30  ;;  %4634 = vmatpush3.msra.mxu0 %v6024_v13 }
  0x5d   :  { %4661 = vmatpush3.msra.mxu1 %v8984_v34  ;;  %4635 = vmatprep.subr.mxu0 %v6037_v32 }
  0x5e   :  { %4662 = vmatprep.subr.mxu1 %v8985_v44  ;;  %4636 = vmatpush3.msra.mxu0 %v6050_v43 }
  0x5f   :  { %4663 = vmatpush3.msra.mxu1 %v8986_v26  ;;  %4637 = vmatprep.subr.mxu0 %v6062_v36 }
  0x60   :  { %4664 = vmatprep.subr.mxu1 %v8987_v47  ;;  %4638 = vmatpush3.msra.mxu0 %v6069_v1 }
  0x61   :  { %4665 = vmatpush3.msra.mxu1 %v8988_v2  ;;  %4639 = vmatprep.subr.mxu0 %v6086_v37 }
  0x62   :  { %4666 = vmatprep.subr.mxu1 %v8989_v39  ;;  %4640 = vmatpush3.msra.mxu0 %v6096_v14  ;;  %v8994_v14 = vand.u32 4294901760, %v5726_v23  ;;  %v9001_v23 = vand.u32 4294901760, %v5768_v40  ;;  %v9007_v40 = vand.u32 4294901760, %v5831_v8  ;;  %v99_v8 = vld [vmem:[#allocation6 + $0x178] sm:$0xff] }
  0x63   :  { %4667 = vmatpush3.msra.mxu1 %v8990_v56  ;;  %4641 = vmatprep.subr.mxu0 %v6105_v7  ;;  %v8995_v56 = vld [vmem:[#allocation27_spill] sm:$0xff]  ;;  %v8999_v7 = vld [vmem:[#allocation29_spill] sm:$0xff] }
  0x64   :  { %4668 = vmatprep.subr.mxu1 %v8991_v12  ;;  %4642 = vmatpush3.msra.mxu0 %v6112_v46  ;;  %v8996_v12 = vand.u32 4294901760, %v5732_v25  ;;  %v8997_v46 = vld [vmem:[#allocation28_spill] sm:$0xff]  ;;  %v9002_v25 = vand.u32 4294901760, %v5782_v45  ;;  %v9008_v45 = vand.u32 4294901760, %v5842_v42  ;;  %v9012_v42 = vand.u32 4294901760, %v5901_v54 }
  0x65   :  { %4669 = vmatpush3.msra.mxu1 %v5910_v62  ;;  %691 = vmatmul.mubr.f32.vlgmr.msra.gmra.mxu0 %v6058_v52  ;;  %v8998_v62 = vand.u32 4294901760, %v5746_v31  ;;  %v9003_v31 = vand.u32 4294901760, %v6046_v61  ;;  %v97_v54 = vld [vmem:[#allocation6 + $0x168] sm:$0xff] }
  0x66   :  { %4670 = vmatprep.subr.mxu1 %v5924_v19  ;;  %4681 = vmatprep.subr.mxu0 %v8992_v33  ;;  %v6255_v61 = vand.u32 4294901760, %v97_v54  ;;  %v9021_v33 = vand.u32 4294901760, %v5994_v50 }
  0x67   :  { %4671 = vmatpush3.msra.mxu1 %v8993_v38  ;;  %4682 = vmatpush3.msra.mxu0 %v8994_v14  ;;  %v9006_v14 = vand.u32 4294901760, %v5820_v0  ;;  %v9010_v0 = vand.u32 4294901760, %v5868_v57  ;;  %v114_v57 = vld [vmem:[#allocation6 + $0x1f0] sm:$0xff] }
  0x68   :  { %4672 = vmatprep.subr.mxu1 %v8995_v56  ;;  %4683 = vmatprep.subr.mxu0 %v8996_v12  ;;  %9018 = vst [vmem:[#allocation12_spill] sm:$0xff] %v6255_v61  ;;  %v6283_v50 = vsub.f32 %v97_v54, %v6255_v61  ;;  %v9040_v54 = vld [vmem:[#allocation24_spill] sm:$0xff] }
  0x69   :  { %4673 = vmatpush3.msra.mxu1 %v8997_v46  ;;  %4684 = vmatpush3.msra.mxu0 %v8998_v62  ;;  %v9004_v62 = vand.u32 4294901760, %v5808_v59  ;;  %v9009_v59 = vand.u32 4294901760, %v5854_v48 }
  0x6a   :  { %4674 = vmatprep.subr.mxu1 %v8999_v7  ;;  %4685 = vmatprep.subr.mxu0 %v9000_v18  ;;  %v95_v18 = vld [vmem:[#allocation6 + $0x158] sm:$0xff] }
  0x6b   :  { %4675 = vmatpush3.msra.mxu1 %v5990_v28  ;;  %4686 = vmatpush3.msra.mxu0 %v9001_v23 }
  0x6c   :  { %4676 = vmatprep.subr.mxu1 %v6004_v41  ;;  %4687 = vmatprep.subr.mxu0 %v9002_v25  ;;  %v94_v25 = vld [vmem:[#allocation6 + $0x150] sm:$0xff] }
  0x6d   :  { %4677 = vmatpush3.msra.mxu1 %v6020_v24  ;;  %795 = vmatprep.mubr.f32.mxu1 %v9003_v31  ;;  %v9026_v31 = vand.u32 4294901760, %v6050_v43  ;;  %v9031_v43 = vand.u32 4294901760, %v6069_v1 }
  0x6e   :  { %4688 = vmatpush3.msra.mxu0 %v9004_v62  ;;  %799 = vmatmul.mubr.f32.vlgmr.msra.gmra.mxu1 %v9005_v35  ;;  %v110_v35 = vld [vmem:[#allocation6 + $0x1d0] sm:$0xff] }
  0x6f   :  { %4689 = vmatprep.subr.mxu0 %v9006_v14  ;;  %4716 = vmatprep.subr.mxu1 %v5693_v3  ;;  %v9011_v3 = vand.u32 4294901760, %v5880_v6  ;;  %v9015_v6 = vand.u32 4294901760, %v5945_v58  ;;  %v96_v58 = vld [vmem:[#allocation6 + $0x160] sm:$0xff] }
  0x70   :  { %4690 = vmatpush3.msra.mxu0 %v9007_v40  ;;  %4717 = vmatpush3.msra.mxu1 %v5695_v4  ;;  %v115_v4 = vld [vmem:[#allocation6 + $0x1f8] sm:$0xff] }
  0x71   :  { %4691 = vmatprep.subr.mxu0 %v9008_v45  ;;  %4718 = vmatprep.subr.mxu1 %v5697_v5  ;;  %v98_v5 = vld [vmem:[#allocation6 + $0x170] sm:$0xff]  ;;  %v6238_v48 = vand.u32 4294901760, %v115_v4  ;;  %v6310_v45 = vand.u32 4294901760, %v95_v18 }
  0x72   :  { %4692 = vmatpush3.msra.mxu0 %v9009_v59  ;;  %4719 = vmatpush3.msra.mxu1 %v5699_v9  ;;  %v9013_v9 = vand.u32 4294901760, %v5914_v63  ;;  %v113_v63 = vld [vmem:[#allocation6 + $0x1e8] sm:$0xff]  ;;  %v6316_v59 = vand.u32 4294901760, %v94_v25 }
  0x73   :  { %4693 = vmatprep.subr.mxu0 %v9010_v0  ;;  %4720 = vmatprep.subr.mxu1 %v5701_v10  ;;  %v9014_v10 = vand.u32 4294901760, %v5932_v55  ;;  %v6253_v55 = vand.u32 4294901760, %v114_v57  ;;  %v6263_v52 = vand.u32 4294901760, %v113_v63  ;;  %9030 = vst [vmem:[#allocation16_spill] sm:$0xff] %v6310_v45  ;;  %v8676_v0 = vand.u32 4294901760, %v6283_v50 }
  0x74   :  { %4694 = vmatpush3.msra.mxu0 %v9011_v3  ;;  %4721 = vmatpush3.msra.mxu1 %v5703_v11  ;;  %v6240_v11 = vand.u32 4294901760, %v99_v8  ;;  %9032 = vst [vmem:[#allocation17_spill] sm:$0xff] %v6316_v59 }
  0x75   :  { %4695 = vmatprep.subr.mxu0 %v9012_v42  ;;  %4722 = vmatprep.subr.mxu1 %v5706_v15  ;;  %v6245_v15 = vand.u32 4294901760, %v98_v5  ;;  %9020 = vst [vmem:[#allocation13_spill] sm:$0xff] %v6263_v52  ;;  %v6286_v23 = vsub.f32 %v114_v57, %v6253_v55  ;;  %v9035_v42 = vld [vmem:[#allocation33_spill] sm:$0xff] }
  0x76   :  { %4696 = vmatpush3.msra.mxu0 %v9013_v9  ;;  %4723 = vmatpush3.msra.mxu1 %v5708_v16  ;;  %v9016_v16 = vand.u32 4294901760, %v5957_v60  ;;  %v6261_v60 = vsub.f32 %v99_v8, %v6240_v11 }
  0x77   :  { %4697 = vmatprep.subr.mxu0 %v9014_v10  ;;  %4724 = vmatprep.subr.mxu1 %v5710_v17  ;;  %v9017_v17 = vand.u32 4294901760, %v5968_v27  ;;  %v6266_v27 = vsub.f32 %v115_v4, %v6238_v48  ;;  %v6272_v12 = vsub.f32 %v98_v5, %v6245_v15  ;;  %v109_v4 = vld [vmem:[#allocation6 + $0x1c8] sm:$0xff]  ;;  %v9037_v5 = vld [vmem:[#allocation23_spill] sm:$0xff]  ;;  %v9038_v10 = vld [vmem:[#allocation34_spill] sm:$0xff] }
  0x78   :  { %4698 = vmatpush3.msra.mxu0 %v9015_v6  ;;  %4725 = vmatpush3.msra.mxu1 %v5723_v22  ;;  %v9019_v22 = vand.u32 4294901760, %v8980_v51  ;;  %v6277_v51 = vand.u32 4294901760, %v96_v58  ;;  %v9039_v57 = vand.u32 4294901760, %v9038_v10  ;;  %v6350_v6 = vsub.f32 %v95_v18, %v6310_v45 }
  0x79   :  { %4699 = vmatprep.subr.mxu0 %v9016_v16  ;;  %4726 = vmatprep.subr.mxu1 %v8978_v53  ;;  %v9022_v53 = vand.u32 4294901760, %v6013_v21  ;;  %v9025_v21 = vand.u32 4294901760, %v6037_v32  ;;  %v8678_v32 = vand.u32 4294901760, %v6272_v12  ;;  %v108_v16 = vld [vmem:[#allocation6 + $0x1c0] sm:$0xff]  ;;  %v6367_v18 = vsub.f32 %v94_v25, %v6316_v59 }
  0x7a   :  { %4700 = vmatpush3.msra.mxu0 %v9017_v17  ;;  %4727 = vmatpush3.msra.mxu1 %v8979_v29  ;;  %v112_v29 = vld [vmem:[#allocation6 + $0x1e0] sm:$0xff]  ;;  %9023 = vst [vmem:[#allocation30_spill] sm:$0xff] %v6277_v51  ;;  %v6306_v14 = vsub.f32 %v96_v58, %v6277_v51 }
  0x7b   :  { %4701 = vmatprep.subr.mxu0 %v9019_v22  ;;  %4728 = vmatprep.subr.mxu1 %v8981_v20  ;;  %v9024_v20 = vand.u32 4294901760, %v6024_v13  ;;  %v8681_v13 = vand.u32 4294901760, %v6261_v60  ;;  %v6299_v62 = vand.u32 4294901760, %v112_v29  ;;  %v92_v17 = vld [vmem:[#allocation6 + $0x140] sm:$0xff] }
  0x7c   :  { %4702 = vmatpush3.msra.mxu0 %v9021_v33  ;;  %4729 = vmatpush3.msra.mxu1 %v8982_v49  ;;  %v111_v49 = vld [vmem:[#allocation6 + $0x1d8] sm:$0xff]  ;;  %v8679_v58 = vand.u32 4294901760, %v6306_v14  ;;  %v9042_v33 = vld [vmem:[#allocation35_spill] sm:$0xff] }
  0x7d   :  { %4703 = vmatprep.subr.mxu0 %v9022_v53  ;;  %4730 = vmatprep.subr.mxu1 %v8983_v30  ;;  %v8682_v30 = vand.u32 4294901760, %v6266_v27  ;;  %9027 = vst [vmem:[#allocation14_spill] sm:$0xff] %v6299_v62  ;;  %v6308_v40 = vand.u32 4294901760, %v111_v49  ;;  %v6330_v1 = vsub.f32 %v6261_v60, %v8681_v13  ;;  %v6344_v9 = vsub.f32 %v112_v29, %v6299_v62  ;;  %v9044_v29 = vld [vmem:[#allocation31_spill] sm:$0xff] }
  0x7e   :  { %4704 = vmatpush3.msra.mxu0 %v9024_v20  ;;  %4731 = vmatpush3.msra.mxu1 %v8984_v34  ;;  %v6294_v34 = vsub.f32 %v113_v63, %v6263_v52  ;;  %v9043_v53 = vand.u32 4294901760, %v9042_v33  ;;  %v91_v33 = vld [vmem:[#allocation6 + $0x138] sm:$0xff] }
  0x7f   :  { %4705 = vmatprep.subr.mxu0 %v9025_v21  ;;  %4732 = vmatprep.subr.mxu1 %v8985_v44  ;;  %v9028_v44 = vand.u32 4294901760, %v6062_v36  ;;  %9029 = vst [vmem:[#allocation15_spill] sm:$0xff] %v6308_v40  ;;  %v93_v36 = vld [vmem:[#allocation6 + $0x148] sm:$0xff]  ;;  %v6325_v3 = vsub.f32 %v6266_v27, %v8682_v30  ;;  %v6356_v22 = vsub.f32 %v111_v49, %v6308_v40  ;;  %v6369_v21 = vand.u32 4294901760, %v109_v4 }
  0x80   :  { %4706 = vmatpush3.msra.mxu0 %v9026_v31  ;;  %4733 = vmatpush3.msra.mxu1 %v8986_v26  ;;  %v8680_v26 = vand.u32 4294901760, %v6286_v23  ;;  %v8677_v8 = vand.u32 4294901760, %v6294_v34  ;;  %v6352_v63 = vand.u32 4294901760, %v93_v36  ;;  %v6374_v49 = vsub.f32 %v6283_v50, %v8676_v0  ;;  %v9046_v31 = vld [vmem:[#allocation25_spill] sm:$0xff]  ;;  %v89_v30 = vld [vmem:[#allocation6 + $0x128] sm:$0xff] }
  0x81   :  { %4707 = vmatprep.subr.mxu0 %v9028_v44  ;;  %4734 = vmatprep.subr.mxu1 %v8987_v47  ;;  %v9033_v47 = vand.u32 4294901760, %v6086_v37  ;;  %v9036_v37 = vand.u32 4294901760, %v9035_v42  ;;  %9045 = vst [vmem:[#allocation20_spill] sm:$0xff] %v6369_v21  ;;  %v9047_v44 = vld [vmem:[#allocation32_spill] sm:$0xff]  ;;  %v8683_v10 = vand.u32 4294901760, %v6344_v9  ;;  %v90_v0 = vld [vmem:[#allocation6 + $0x130] sm:$0xff] }
  0x82   :  { %4708 = vmatpush3.msra.mxu0 %v9031_v43  ;;  %4735 = vmatpush3.msra.mxu1 %v8988_v2  ;;  %v6332_v2 = vand.u32 4294901760, %v110_v35  ;;  %9041 = vst [vmem:[#allocation19_spill] sm:$0xff] %v6352_v63  ;;  %v6364_v20 = vsub.f32 %v6286_v23, %v8680_v26  ;;  %v6383_v25 = vsub.f32 %v6294_v34, %v8677_v8  ;;  %v6423_v13 = vand.u32 4294901760, %v91_v33  ;;  %v104_v43 = vld [vmem:[#allocation6 + $0x1a0] sm:$0xff] }
  0x83   :  { %4709 = vmatprep.subr.mxu0 %v9033_v47  ;;  %4736 = vmatprep.subr.mxu1 %v8989_v39  ;;  %v6341_v39 = vsub.f32 %v6272_v12, %v8678_v32  ;;  %v8686_v32 = vand.u32 4294901760, %v6367_v18  ;;  %v6436_v8 = vand.u32 4294901760, %v90_v0  ;;  %v6465_v47 = vand.u32 4294901760, %v89_v30 }
  0x84   :  { %9034 = vst [vmem:[#allocation18_spill] sm:$0xff] %v6332_v2  ;;  %4710 = vmatpush3.msra.mxu0 %v9036_v37  ;;  %4737 = vmatpush3.msra.mxu1 %v9037_v5  ;;  %v6386_v42 = vsub.f32 %v110_v35, %v6332_v2  ;;  %v6391_v5 = vand.u32 4294901760, %v108_v16  ;;  %v6399_v35 = vsub.f32 %v93_v36, %v6352_v63  ;;  %v6412_v36 = vld [vmem:[#allocation6 + $0x1b0] sm:$0xff]  ;;  %9052 = vst [vmem:[#allocation28_spill] sm:$0xff] %v6423_v13  ;;  %v88_v37 = vld [vmem:[#allocation6 + $0x120] sm:$0xff] }
  0x85   :  { %4711 = vmatprep.subr.mxu0 %v9039_v57  ;;  %4738 = vmatprep.subr.mxu1 %v9040_v54  ;;  %v6394_v57 = vand.u32 4294901760, %v92_v17  ;;  %v107_v54 = vld [vmem:[#allocation6 + $0x1b8] sm:$0xff]  ;;  %9054 = vst [vmem:[#allocation33_spill] sm:$0xff] %v6436_v8  ;;  %9057 = vst [vmem:[#allocation24_spill] sm:$0xff] %v6465_v47 }
  0x86   :  { %4712 = vmatpush3.msra.mxu0 %v9043_v53  ;;  %965 = vmatprep.mubr.f32.mxu0 %v9044_v29  ;;  %9048 = vst [vmem:[#allocation21_spill] sm:$0xff] %v6391_v5  ;;  %9050 = vst [vmem:[#allocation26_spill] sm:$0xff] %v6399_v35  ;;  %v8684_v53 = vand.u32 4294901760, %v6356_v22  ;;  %v6439_v26 = vsub.f32 %v108_v16, %v6391_v5  ;;  %v6455_v16 = vand.u32 4294901760, %v6412_v36 }
  0x87   :  { %4739 = vmatpush3.msra.mxu1 %v9046_v31  ;;  %967 = vmatmul.mubr.f32.vlgmr.msra.gmra.mxu0 %v9047_v44  ;;  %9049 = vst [vmem:[#allocation22_spill] sm:$0xff] %v6394_v57  ;;  %v8685_v31 = vand.u32 4294901760, %v6350_v6 }
  0x88   :  { %4740 = vmatprep.subr.mxu1 %v5924_v19  ;;  %4751 = vmatprep.subr.mxu0 %v6238_v48  ;;  %v6404_v19 = vsub.f32 %v6306_v14, %v8679_v58  ;;  %v6416_v58 = vsub.f32 %v109_v4, %v6369_v21  ;;  %v6431_v4 = vsub.f32 %v6344_v9, %v8683_v10 }
  0x89   :  { %4741 = vmatpush3.msra.mxu1 %v8993_v38  ;;  %4752 = vmatpush3.msra.mxu0 %v6240_v11  ;;  %v1312_v38 = vand.u32 4294901760, %v6364_v20  ;;  %v8689_v20 = vand.u32 4294901760, %v6386_v42  ;;  %9055 = vst [vmem:[#allocation23_spill] sm:$0xff] %v6439_v26  ;;  %v6447_v10 = vsub.f32 %v6356_v22, %v8684_v53  ;;  %9056 = vst [vmem:[#allocation34_spill] sm:$0xff] %v6455_v16 }
  0x8a   :  { %4742 = vmatprep.subr.mxu1 %v8995_v56  ;;  %4753 = vmatprep.subr.mxu0 %v6253_v55  ;;  %v6421_v56 = vand.u32 4294901760, %v107_v54 }
  0x8b   :  { %4743 = vmatpush3.msra.mxu1 %v8997_v46  ;;  %4754 = vmatpush3.msra.mxu0 %v6245_v15  ;;  %v6434_v46 = vsub.f32 %v92_v17, %v6394_v57  ;;  %v6452_v17 = vsub.f32 %v6350_v6, %v8685_v31 }
  0x8c   :  { %9051 = vst [vmem:[#allocation27_spill] sm:$0xff] %v6421_v56  ;;  %4744 = vmatprep.subr.mxu1 %v8999_v7  ;;  %4755 = vmatprep.subr.mxu0 %v6263_v52  ;;  %v105_v7 = vld [vmem:[#allocation6 + $0x1a8] sm:$0xff]  ;;  %v6481_v53 = vsub.f32 %v107_v54, %v6421_v56  ;;  %v1333_v54 = vand.u32 4294901760, %v6447_v10  ;;  %v6510_v10 = vsub.f32 %v89_v30, %v6465_v47  ;;  %v86_v52 = vld [vmem:[#allocation6 + $0x110] sm:$0xff] }
  0x8d   :  { %9053 = vst [vmem:[#allocation29_spill] sm:$0xff] %v6434_v46  ;;  %4745 = vmatpush3.msra.mxu1 %v5990_v28  ;;  %4756 = vmatpush3.msra.mxu0 %v6255_v61  ;;  %v6462_v28 = vsub.f32 %v6367_v18, %v8686_v32  ;;  %v6476_v32 = vsub.f32 %v6386_v42, %v8689_v20  ;;  %v9060_v20 = vand.u32 4294901760, %v6325_v3  ;;  %v6496_v61 = vand.u32 4294901760, %v105_v7 }
  0x8e   :  { %4746 = vmatprep.subr.mxu1 %v6004_v41  ;;  %4757 = vmatprep.subr.mxu0 %v6299_v62  ;;  %v6471_v41 = vsub.f32 %v91_v33, %v6423_v13  ;;  %v6478_v62 = vand.u32 4294901760, %v88_v37  ;;  %9059 = vst [vmem:[#allocation31_spill] sm:$0xff] %v6481_v53  ;;  %v9062_v33 = vand.u32 4294901760, %v6330_v1  ;;  %v9063_v3 = vand.u32 4294901760, %v6416_v58 }
  0x8f   :  { %4747 = vmatpush3.msra.mxu1 %v6020_v24  ;;  %1069 = vmatprep.mubr.f32.mxu1 %v9044_v29  ;;  %v1326_v24 = vand.u32 4294901760, %v6431_v4  ;;  %v6487_v29 = vsub.f32 %v90_v0, %v6436_v8  ;;  %9061 = vst [vmem:[#allocation25_spill] sm:$0xff] %v6496_v61  ;;  %v87_v4 = vld [vmem:[#allocation6 + $0x118] sm:$0xff]  ;;  %v45_v0 = vld [vmem:[#allocation3 + $0x18] sm:$0xff]  ;;  %v1340_v1 = vand.u32 4294901760, %v6476_v32  ;;  %v6525_v30 = vsub.f32 %v6412_v36, %v6455_v16 }
  0x90   :  { %9058 = vst [vmem:[#allocation35_spill] sm:$0xff] %v6478_v62  ;;  %4758 = vmatpush3.msra.mxu0 %v6277_v51  ;;  %1071 = vmatmul.mubr.f32.vlgmr.msra.gmra.mxu1 %v9047_v44  ;;  %v1221_v51 = vand.u32 4294901760, %v6452_v17  ;;  %v6498_v44 = vand.u32 4294901760, %v104_v43  ;;  %v9064_v17 = vand.u32 4294901760, %v6399_v35  ;;  %v9068_v32 = vand.u32 4294901760, %v6434_v46 }
  0x91   :  { %4759 = vmatprep.subr.mxu0 %v6308_v40  ;;  %4786 = vmatprep.subr.mxu1 %v9060_v20  ;;  %v6507_v20 = vsub.f32 %v6416_v58, %v9063_v3  ;;  %v103_v3 = vld [vmem:[#allocation6 + $0x198] sm:$0xff]  ;;  %v6540_v31 = vand.u32 4294901760, %v87_v4  ;;  %v6542_v36 = vand.u32 4294901760, %v45_v0 }
  0x92   :  { %4760 = vmatpush3.msra.mxu0 %v6310_v45  ;;  %4787 = vmatpush3.msra.mxu1 %v9062_v33  ;;  %v6515_v40 = vsub.f32 %v6399_v35, %v9064_v17  ;;  %v44_v45 = vld [vmem:[#allocation3 + $0x10] sm:$0xff]  ;;  %v6520_v33 = vsub.f32 %v88_v37, %v6478_v62  ;;  %v9066_v17 = vand.u32 4294901760, %v6341_v39  ;;  %v6538_v37 = vsub.f32 %v6434_v46, %v9068_v32  ;;  %v102_v35 = vld [vmem:[#allocation6 + $0x190] sm:$0xff] }
  0x93   :  { %4761 = vmatprep.subr.mxu0 %v6332_v2  ;;  %4788 = vmatprep.subr.mxu1 %v1312_v38  ;;  %v9067_v2 = vand.u32 4294901760, %v6439_v26  ;;  %9069 = vst [vmem:[#allocation36_spill] sm:$0xff] %v6542_v36  ;;  %v9070_v39 = vand.u32 4294901760, %v6383_v25  ;;  %v9072_v32 = vand.u32 4294901760, %v6374_v49  ;;  %v1347_v46 = vand.u32 4294901760, %v6507_v20 }
  0x94   :  { %9065 = vst [vmem:[#allocation32_spill] sm:$0xff] %v6520_v33  ;;  %4762 = vmatpush3.msra.mxu0 %v6316_v59  ;;  %4789 = vmatpush3.msra.mxu1 %v9066_v17  ;;  %v6548_v59 = vand.u32 4294901760, %v86_v52  ;;  %v6560_v25 = vand.u32 4294901760, %v103_v3  ;;  %v6573_v20 = vsub.f32 %v104_v43, %v6498_v44  ;;  %v9076_v43 = vand.u32 4294901760, %v6471_v41 }
  0x95   :  { %v6533_v38 = vsub.f32 %v6439_v26, %v9067_v2  ;;  %4763 = vmatprep.subr.mxu0 %v6369_v21  ;;  %4790 = vmatprep.subr.mxu1 %v9070_v39  ;;  %v6551_v2 = vsub.f32 %v105_v7, %v6496_v61  ;;  %v6553_v26 = vand.u32 4294901760, %v44_v45  ;;  %v1235_v21 = vand.u32 4294901760, %v6515_v40 }
  0x96   :  { %4764 = vmatpush3.msra.mxu0 %v6352_v63  ;;  %4791 = vmatpush3.msra.mxu1 %v9072_v32  ;;  %v9073_v7 = vand.u32 4294901760, %v6481_v53  ;;  %v6569_v63 = vand.u32 4294901760, %v102_v35  ;;  %v101_v32 = vld [vmem:[#allocation6 + $0x188] sm:$0xff]  ;;  %v9075_v40 = vand.u32 4294901760, %v6404_v19  ;;  %v1242_v39 = vand.u32 4294901760, %v6538_v37  ;;  %v100_v37 = vld [vmem:[#allocation6 + $0x180] sm:$0xff] }
  0x97   :  { %9071 = vst [vmem:[#allocation37_spill] sm:$0xff] %v6553_v26  ;;  %4765 = vmatprep.subr.mxu0 %v6391_v5  ;;  %4792 = vmatprep.subr.mxu1 %v1326_v24  ;;  %v1354_v24 = vand.u32 4294901760, %v6533_v38  ;;  %v85_v5 = vld [vmem:[#allocation6 + $0x108] sm:$0xff]  ;;  %v1248_v49 = vsub.f32 %v6471_v41, %v9076_v43  ;;  %v6591_v19 = vsub.f32 %v86_v52, %v6548_v59  ;;  %v9078_v38 = vand.u32 4294901760, %v6525_v30 }
  0x98   :  { %v6567_v17 = vsub.f32 %v6481_v53, %v9073_v7  ;;  %9074 = vst [vmem:[#allocation38_spill] sm:$0xff] %v6569_v63  ;;  %4766 = vmatpush3.msra.mxu0 %v6394_v57  ;;  %4793 = vmatpush3.msra.mxu1 %v9075_v40  ;;  %v6581_v7 = vsub.f32 %v87_v4, %v6540_v31  ;;  %v84_v40 = vld [vmem:[#allocation6 + $0x100] sm:$0xff]  ;;  %v9079_v43 = vand.u32 4294901760, %v6462_v28  ;;  %v8730_v28 = vand.u32 4294901760, %v6520_v33 }
  0x99   :  { %v6584_v53 = vsub.f32 %v45_v0, %v6542_v36  ;;  %4767 = vmatprep.subr.mxu0 %v6421_v56  ;;  %4794 = vmatprep.subr.mxu1 %v1333_v54  ;;  %v6595_v4 = vsub.f32 %v44_v45, %v6553_v26  ;;  %v9077_v0 = vand.u32 4294901760, %v6487_v29  ;;  %v6601_v56 = vand.u32 4294901760, %v101_v32 }
  0x9a   :  { %4768 = vmatpush3.msra.mxu0 %v6423_v13  ;;  %4795 = vmatpush3.msra.mxu1 %v1221_v51  ;;  %v6605_v52 = vsub.f32 %v103_v3, %v6560_v25  ;;  %v1361_v45 = vand.u32 4294901760, %v6567_v17  ;;  %v1367_v51 = vsub.f32 %v6525_v30, %v9078_v38  ;;  %v6612_v13 = vand.u32 4294901760, %v85_v5 }
  0x9b   :  { %v1255_v54 = vsub.f32 %v6487_v29, %v9077_v0  ;;  %4769 = vmatprep.subr.mxu0 %v6455_v16  ;;  %4796 = vmatprep.subr.mxu1 %v1340_v1  ;;  %v6618_v3 = vand.u32 4294901760, %v100_v37  ;;  %v6620_v57 = vand.u32 4294901760, %v84_v40  ;;  %v6624_v17 = vsub.f32 %v102_v35, %v6569_v63 }
  0x9c   :  { %4770 = vmatpush3.msra.mxu0 %v6436_v8  ;;  %4797 = vmatpush3.msra.mxu1 %v9079_v43  ;;  %v1249_v38 = vand.u32 4294901760, %v1248_v49  ;;  %v9080_v0 = vand.u32 4294901760, %v6551_v2  ;;  %v9081_v1 = vand.u32 4294901760, %v6510_v10  ;;  %v1368_v49 = vand.u32 4294901760, %v1367_v51 }
  0x9d   :  { %4771 = vmatprep.subr.mxu0 %v6496_v61  ;;  %4798 = vmatprep.subr.mxu1 %v1347_v46  ;;  %v1256_v16 = vand.u32 4294901760, %v1255_v54  ;;  %v6638_v46 = vsub.f32 %v101_v32, %v6601_v56  ;;  %v9082_v43 = vand.u32 4294901760, %v6573_v20  ;;  %v9084_v32 = vand.u32 4294901760, %v6584_v53 }
  0x9e   :  { %v1374_v8 = vsub.f32 %v6551_v2, %v9080_v0  ;;  %4772 = vmatpush3.msra.mxu0 %v6465_v47  ;;  %4799 = vmatpush3.msra.mxu1 %v1235_v21  ;;  %v1262_v35 = vsub.f32 %v6510_v10, %v9081_v1  ;;  %v6642_v0 = vsub.f32 %v85_v5, %v6612_v13 }
  0x9f   :  { %4773 = vmatprep.subr.mxu0 %v6498_v44  ;;  %4800 = vmatprep.subr.mxu1 %v1354_v24  ;;  %v1381_v21 = vsub.f32 %v6573_v20, %v9082_v43  ;;  %v6650_v1 = vsub.f32 %v84_v40, %v6620_v57  ;;  %v1175_v24 = vsub.f32 %v6584_v53, %v9084_v32  ;;  %v9086_v40 = vand.u32 4294901760, %v6595_v4 }
  0xa0   :  { %4774 = vmatpush3.msra.mxu0 %v6478_v62  ;;  %4801 = vmatpush3.msra.mxu1 %v1242_v39  ;;  %v6657_v5 = vsub.f32 %v100_v37, %v6618_v3  ;;  %v1375_v43 = vand.u32 4294901760, %v1374_v8  ;;  %v1269_v39 = vsub.f32 %v6520_v33, %v8730_v28  ;;  %v1263_v32 = vand.u32 4294901760, %v1262_v35 }
  0xa1   :  { %9083 = vst [vmem:[#allocation39_spill] sm:$0xff] %v6650_v1  ;;  %4775 = vmatprep.subr.mxu0 %v6560_v25  ;;  %4802 = vmatprep.subr.mxu1 %v1361_v45  ;;  %v1181_v54 = vsub.f32 %v6595_v4, %v9086_v40  ;;  %v9087_v37 = vand.u32 4294901760, %v6605_v52  ;;  %v1382_v45 = vand.u32 4294901760, %v1381_v21  ;;  %v9088_v28 = vand.u32 4294901760, %v6581_v7 }
  0xa2   :  { %9085 = vst [vmem:[#allocation40_spill] sm:$0xff] %v6657_v5  ;;  %4776 = vmatpush3.msra.mxu0 %v6540_v31  ;;  %4803 = vmatpush3.msra.mxu1 %v1249_v38  ;;  %v1176_v38 = vand.u32 4294901760, %v1175_v24  ;;  %v9089_v35 = vand.u32 4294901760, %v6624_v17  ;;  %v8734_v8 = vand.u32 4294901760, %v6657_v5  ;;  %v8733_v61 = vand.u32 4294901760, %v6650_v1 }
  0xa3   :  { %v1388_v51 = vsub.f32 %v6605_v52, %v9087_v37  ;;  %4777 = vmatprep.subr.mxu0 %v6569_v63  ;;  %4804 = vmatprep.subr.mxu1 %v1368_v49  ;;  %v1276_v40 = vsub.f32 %v6581_v7, %v9088_v28  ;;  %v1270_v49 = vand.u32 4294901760, %v1269_v39  ;;  %v1182_v21 = vand.u32 4294901760, %v1181_v54 }
  0xa4   :  { %4778 = vmatpush3.msra.mxu0 %v6548_v59  ;;  %4805 = vmatpush3.msra.mxu1 %v1256_v16  ;;  %v1395_v37 = vsub.f32 %v6624_v17, %v9089_v35  ;;  %v9090_v63 = vand.u32 4294901760, %v6591_v19  ;;  %v9091_v24 = vand.u32 4294901760, %v6638_v46  ;;  %v9092_v54 = vand.u32 4294901760, %v6642_v0 }
  0xa5   :  { %4779 = vmatprep.subr.mxu0 %v6601_v56  ;;  %4806 = vmatprep.subr.mxu1 %v1375_v43  ;;  %v1389_v16 = vand.u32 4294901760, %v1388_v51  ;;  %v1277_v43 = vand.u32 4294901760, %v1276_v40  ;;  %v1409_v51 = vsub.f32 %v6657_v5, %v8734_v8  ;;  %v9110_v8 = vld [vmem:[#allocation28_spill] sm:$0xff] }
  0xa6   :  { %v1283_v28 = vsub.f32 %v6591_v19, %v9090_v63  ;;  %4780 = vmatpush3.msra.mxu0 %v6612_v13  ;;  %4807 = vmatpush3.msra.mxu1 %v1263_v32  ;;  %v1402_v35 = vsub.f32 %v6638_v46, %v9091_v24  ;;  %v1290_v39 = vsub.f32 %v6642_v0, %v9092_v54  ;;  %v1396_v63 = vand.u32 4294901760, %v1395_v37  ;;  %v9096_v24 = vld [vmem:[#allocation23_spill] sm:$0xff]  ;;  %v9099_v54 = vld [vmem:[#allocation30_spill] sm:$0xff] }
  0xa7   :  { %4781 = vmatprep.subr.mxu0 %v6618_v3  ;;  %4808 = vmatprep.subr.mxu1 %v1382_v45  ;;  %v1297_v45 = vsub.f32 %v6650_v1, %v8733_v61  ;;  %v1410_v37 = vand.u32 4294901760, %v1409_v51  ;;  %v9102_v51 = vld [vmem:[#allocation16_spill] sm:$0xff]  ;;  %v9109_v61 = vld [vmem:[#allocation27_spill] sm:$0xff] }
  0xa8   :  { %4782 = vmatpush3.msra.mxu0 %v6620_v57  ;;  %1177 = vmatprep.mubr.f32.mxu0 %v1176_v38  ;;  %v1284_v32 = vand.u32 4294901760, %v1283_v28  ;;  %v1403_v40 = vand.u32 4294901760, %v1402_v35  ;;  %v1291_v38 = vand.u32 4294901760, %v1290_v39  ;;  %v9094_v28 = vld [vmem:[#allocation26_spill] sm:$0xff]  ;;  %v9100_v39 = vld [vmem:[#allocation31_spill] sm:$0xff] }
  0xa9   :  { %4809 = vmatpush3.msra.mxu1 %v1270_v49  ;;  %1183 = vmatmul.mubr.f32.vlgmr.msra.gmra.mxu0 %v1182_v21  ;;  %v1298_v49 = vand.u32 4294901760, %v1297_v45  ;;  %v9093_v21 = vld [vmem:[#allocation13_spill] sm:$0xff]  ;;  %v9097_v35 = vld [vmem:[#allocation14_spill] sm:$0xff] }
  0xaa   :  { %4810 = vmatprep.subr.mxu1 %v1389_v16  ;;  %4821 = vmatprep.subr.mxu0 %v6266_v27  ;;  %v9095_v16 = vld [vmem:[#allocation12_spill] sm:$0xff]  ;;  %v9104_v45 = vld [vmem:[#allocation17_spill] sm:$0xff] }
  0xab   :  { %4811 = vmatpush3.msra.mxu1 %v1277_v43  ;;  %4822 = vmatpush3.msra.mxu0 %v6261_v60  ;;  %v9098_v43 = vld [vmem:[#allocation29_spill] sm:$0xff] }
  0xac   :  { %4812 = vmatprep.subr.mxu1 %v1396_v63  ;;  %4823 = vmatprep.subr.mxu0 %v6286_v23  ;;  %v9101_v63 = vld [vmem:[#allocation15_spill] sm:$0xff] }
  0xad   :  { %4813 = vmatpush3.msra.mxu1 %v1284_v32  ;;  %4824 = vmatpush3.msra.mxu0 %v6272_v12  ;;  %v9103_v32 = vld [vmem:[#allocation18_spill] sm:$0xff] }
  0xae   :  { %4814 = vmatprep.subr.mxu1 %v1403_v40  ;;  %4825 = vmatprep.subr.mxu0 %v6294_v34  ;;  %v9105_v40 = vld [vmem:[#allocation20_spill] sm:$0xff] }
  0xaf   :  { %4815 = vmatpush3.msra.mxu1 %v1291_v38  ;;  %4826 = vmatpush3.msra.mxu0 %v6283_v50  ;;  %v9106_v38 = vld [vmem:[#allocation19_spill] sm:$0xff] }
  0xb0   :  { %4816 = vmatprep.subr.mxu1 %v1410_v37  ;;  %4827 = vmatprep.subr.mxu0 %v6344_v9  ;;  %v9107_v37 = vld [vmem:[#allocation21_spill] sm:$0xff] }
  0xb1   :  { %4817 = vmatpush3.msra.mxu1 %v1298_v49  ;;  %1413 = vmatprep.mubr.f32.mxu1 %v6542_v36  ;;  %v9108_v49 = vld [vmem:[#allocation22_spill] sm:$0xff]  ;;  %v9112_v36 = vld [vmem:[#allocation33_spill] sm:$0xff] }
  0xb2   :  { %4828 = vmatpush3.msra.mxu0 %v6306_v14  ;;  %1415 = vmatmul.mubr.f32.vlgmr.msra.gmra.mxu1 %v6553_v26  ;;  %v9111_v26 = vld [vmem:[#allocation34_spill] sm:$0xff] }
  0xb3   :  { %4829 = vmatprep.subr.mxu0 %v6356_v22  ;;  %4856 = vmatprep.subr.mxu1 %v6238_v48 }
  0xb4   :  { %4830 = vmatpush3.msra.mxu0 %v6350_v6  ;;  %4857 = vmatpush3.msra.mxu1 %v6240_v11 }
  0xb5   :  { %4831 = vmatprep.subr.mxu0 %v6386_v42  ;;  %4858 = vmatprep.subr.mxu1 %v6253_v55 }
  0xb6   :  { %4832 = vmatpush3.msra.mxu0 %v6367_v18  ;;  %4859 = vmatpush3.msra.mxu1 %v6245_v15 }
  0xb7   :  { %4833 = vmatprep.subr.mxu0 %v6416_v58  ;;  %4860 = vmatprep.subr.mxu1 %v9093_v21 }
  0xb8   :  { %4834 = vmatpush3.msra.mxu0 %v9094_v28  ;;  %4861 = vmatpush3.msra.mxu1 %v9095_v16 }
  0xb9   :  { %4835 = vmatprep.subr.mxu0 %v9096_v24  ;;  %4862 = vmatprep.subr.mxu1 %v9097_v35 }
  0xba   :  { %4836 = vmatpush3.msra.mxu0 %v9098_v43  ;;  %4863 = vmatpush3.msra.mxu1 %v9099_v54 }
  0xbb   :  { %4837 = vmatprep.subr.mxu0 %v9100_v39  ;;  %4864 = vmatprep.subr.mxu1 %v9101_v63 }
  0xbc   :  { %4838 = vmatpush3.msra.mxu0 %v6471_v41  ;;  %4865 = vmatpush3.msra.mxu1 %v9102_v51 }
  0xbd   :  { %4839 = vmatprep.subr.mxu0 %v6525_v30  ;;  %4866 = vmatprep.subr.mxu1 %v9103_v32 }
  0xbe   :  { %4840 = vmatpush3.msra.mxu0 %v6487_v29  ;;  %4867 = vmatpush3.msra.mxu1 %v9104_v45 }
  0xbf   :  { %4841 = vmatprep.subr.mxu0 %v6551_v2  ;;  %4868 = vmatprep.subr.mxu1 %v9105_v40 }
  0xc0   :  { %4842 = vmatpush3.msra.mxu0 %v6510_v10  ;;  %4869 = vmatpush3.msra.mxu1 %v9106_v38 }
  0xc1   :  { %4843 = vmatprep.subr.mxu0 %v6573_v20  ;;  %4870 = vmatprep.subr.mxu1 %v9107_v37 }
  0xc2   :  { %4844 = vmatpush3.msra.mxu0 %v6520_v33  ;;  %4871 = vmatpush3.msra.mxu1 %v9108_v49  ;;  %v9113_v33 = vld [vmem:[#allocation25_spill] sm:$0xff] }
  0xc3   :  { %4845 = vmatprep.subr.mxu0 %v6605_v52  ;;  %4872 = vmatprep.subr.mxu1 %v9109_v61 }
  0xc4   :  { %4846 = vmatpush3.msra.mxu0 %v6581_v7  ;;  %4873 = vmatpush3.msra.mxu1 %v9110_v8 }
  0xc5   :  { %4847 = vmatprep.subr.mxu0 %v6624_v17  ;;  %4874 = vmatprep.subr.mxu1 %v9111_v26 }
  0xc6   :  { %4848 = vmatpush3.msra.mxu0 %v6591_v19  ;;  %4875 = vmatpush3.msra.mxu1 %v9112_v36 }
  0xc7   :  { %4849 = vmatprep.subr.mxu0 %v6638_v46  ;;  %4876 = vmatprep.subr.mxu1 %v9113_v33  ;;  %v9114_v33 = vand.u32 4294901760, %v6266_v27  ;;  %v9119_v27 = vand.u32 4294901760, %v6294_v34  ;;  %v9124_v34 = vand.u32 4294901760, %v6595_v4 }
  0xc8   :  { %4850 = vmatpush3.msra.mxu0 %v6642_v0  ;;  %4877 = vmatpush3.msra.mxu1 %v6465_v47  ;;  %v9115_v47 = vand.u32 4294901760, %v6261_v60  ;;  %v9120_v60 = vand.u32 4294901760, %v6283_v50  ;;  %v9126_v50 = vand.u32 4294901760, %v6350_v6  ;;  %v9130_v6 = vand.u32 4294901760, %v9094_v28 }
  0xc9   :  { %4851 = vmatprep.subr.mxu0 %v6657_v5  ;;  %4878 = vmatprep.subr.mxu1 %v6498_v44  ;;  %v9116_v5 = vld [vmem:[#allocation38_spill] sm:$0xff] }
  0xca   :  { %4852 = vmatpush3.msra.mxu0 %v6650_v1  ;;  %1550 = vmatprep.mubr.f32.mxu0 %v6584_v53  ;;  %v9117_v1 = vand.u32 4294901760, %v6286_v23  ;;  %v9121_v23 = vand.u32 4294901760, %v6344_v9  ;;  %v9127_v9 = vand.u32 4294901760, %v6386_v42  ;;  %v9133_v42 = vand.u32 4294901760, %v9100_v39 }
  0xcb   :  { %4879 = vmatpush3.msra.mxu1 %v6478_v62  ;;  %1553 = vmatmul.mubr.f32.vlgmr.msra.gmra.mxu0 %v6595_v4  ;;  %v9118_v62 = vand.u32 4294901760, %v6272_v12  ;;  %v9122_v12 = vand.u32 4294901760, %v6584_v53  ;;  %v146_v53 = vld [vmem:[#allocation6 + $0x2f0] sm:$0xff]  ;;  %v9139_v39 = vand.u32 4294901760, %v6510_v10  ;;  %v127_v10 = vld [vmem:[#allocation6 + $0x258] sm:$0xff] }
  0xcc   :  { %4880 = vmatprep.subr.mxu1 %v6560_v25  ;;  %4891 = vmatprep.subr.mxu0 %v9114_v33  ;;  %v9134_v33 = vand.u32 4294901760, %v6471_v41 }
  0xcd   :  { %4881 = vmatpush3.msra.mxu1 %v6540_v31  ;;  %4892 = vmatpush3.msra.mxu0 %v9115_v47  ;;  %v9125_v47 = vand.u32 4294901760, %v6356_v22  ;;  %v9129_v22 = vand.u32 4294901760, %v6416_v58  ;;  %v130_v58 = vld [vmem:[#allocation6 + $0x270] sm:$0xff] }
  0xce   :  { %4882 = vmatprep.subr.mxu1 %v9116_v5  ;;  %4893 = vmatprep.subr.mxu0 %v9117_v1  ;;  %v145_v1 = vld [vmem:[#allocation6 + $0x2e8] sm:$0xff]  ;;  %v6827_v28 = vand.u32 4294901760, %v130_v58 }
  0xcf   :  { %4883 = vmatpush3.msra.mxu1 %v6548_v59  ;;  %4894 = vmatpush3.msra.mxu0 %v9118_v62  ;;  %v9123_v62 = vand.u32 4294901760, %v6306_v14  ;;  %v9128_v14 = vand.u32 4294901760, %v6367_v18  ;;  %v9132_v18 = vand.u32 4294901760, %v9098_v43  ;;  %v128_v43 = vld [vmem:[#allocation6 + $0x260] sm:$0xff] }
  0xd0   :  { %4884 = vmatprep.subr.mxu1 %v6601_v56  ;;  %4895 = vmatprep.subr.mxu0 %v9119_v27 }
  0xd1   :  { %4885 = vmatpush3.msra.mxu1 %v6612_v13  ;;  %4896 = vmatpush3.msra.mxu0 %v9120_v60 }
  0xd2   :  { %4886 = vmatprep.subr.mxu1 %v6618_v3  ;;  %4897 = vmatprep.subr.mxu0 %v9121_v23 }
  0xd3   :  { %4887 = vmatpush3.msra.mxu1 %v6620_v57  ;;  %1657 = vmatprep.mubr.f32.mxu1 %v9122_v12 }
  0xd4   :  { %4898 = vmatpush3.msra.mxu0 %v9123_v62  ;;  %1661 = vmatmul.mubr.f32.vlgmr.msra.gmra.mxu1 %v9124_v34  ;;  %v9147_v62 = vand.u32 4294901760, %v6581_v7 }
  0xd5   :  { %4899 = vmatprep.subr.mxu0 %v9125_v47  ;;  %4926 = vmatprep.subr.mxu1 %v6238_v48  ;;  %v131_v48 = vld [vmem:[#allocation6 + $0x278] sm:$0xff]  ;;  %v6880_v47 = vand.u32 4294901760, %v127_v10 }
  0xd6   :  { %4900 = vmatpush3.msra.mxu0 %v9126_v50  ;;  %4927 = vmatpush3.msra.mxu1 %v6240_v11  ;;  %v9131_v11 = vand.u32 4294901760, %v9096_v24  ;;  %v9136_v24 = vand.u32 4294901760, %v6487_v29  ;;  %v126_v50 = vld [vmem:[#allocation6 + $0x250] sm:$0xff] }
  0xd7   :  { %4901 = vmatprep.subr.mxu0 %v9127_v9  ;;  %4928 = vmatprep.subr.mxu1 %v6253_v55  ;;  %v147_v55 = vld [vmem:[#allocation6 + $0x2f8] sm:$0xff]  ;;  %9148 = vst [vmem:[#allocation14_spill] sm:$0xff] %v6880_v47 }
  0xd8   :  { %4902 = vmatpush3.msra.mxu0 %v9128_v14  ;;  %4929 = vmatpush3.msra.mxu1 %v6245_v15  ;;  %v6814_v15 = vand.u32 4294901760, %v131_v48  ;;  %v6822_v4 = vand.u32 4294901760, %v147_v55  ;;  %v9151_v14 = vand.u32 4294901760, %v6591_v19  ;;  %v141_v19 = vld [vmem:[#allocation6 + $0x2c8] sm:$0xff] }
  0xd9   :  { %4903 = vmatprep.subr.mxu0 %v9129_v22  ;;  %4930 = vmatprep.subr.mxu1 %v9093_v21  ;;  %v9135_v21 = vand.u32 4294901760, %v6525_v30  ;;  %v6840_v30 = vand.u32 4294901760, %v145_v1 }
  0xda   :  { %4904 = vmatpush3.msra.mxu0 %v9130_v6  ;;  %4931 = vmatpush3.msra.mxu1 %v9095_v16  ;;  %v129_v16 = vld [vmem:[#allocation6 + $0x268] sm:$0xff]  ;;  %v6833_v41 = vsub.f32 %v131_v48, %v6814_v15  ;;  %v9152_v48 = vand.u32 4294901760, %v6638_v46  ;;  %v9153_v6 = vld [vmem:[#allocation25_spill] sm:$0xff] }
  0xdb   :  { %4905 = vmatprep.subr.mxu0 %v9131_v11  ;;  %4932 = vmatprep.subr.mxu1 %v9097_v35  ;;  %v6835_v35 = vand.u32 4294901760, %v146_v53  ;;  %9138 = vst [vmem:[#allocation13_spill] sm:$0xff] %v6840_v30  ;;  %v6845_v29 = vand.u32 4294901760, %v129_v16  ;;  %v6871_v12 = vsub.f32 %v145_v1, %v6840_v30 }
  0xdc   :  { %4906 = vmatpush3.msra.mxu0 %v9132_v18  ;;  %4933 = vmatpush3.msra.mxu1 %v9099_v54  ;;  %v9137_v54 = vand.u32 4294901760, %v6551_v2  ;;  %v6854_v2 = vsub.f32 %v130_v58, %v6827_v28  ;;  %v8750_v60 = vand.u32 4294901760, %v6833_v41  ;;  %v124_v58 = vld [vmem:[#allocation6 + $0x240] sm:$0xff] }
  0xdd   :  { %4907 = vmatprep.subr.mxu0 %v9133_v42  ;;  %4934 = vmatprep.subr.mxu1 %v9101_v63  ;;  %9140 = vst [vmem:[#allocation26_spill] sm:$0xff] %v6845_v29  ;;  %v144_v63 = vld [vmem:[#allocation6 + $0x2e0] sm:$0xff]  ;;  %v6863_v23 = vsub.f32 %v146_v53, %v6835_v35  ;;  %v9156_v42 = vand.u32 4294901760, %v6642_v0  ;;  %v9157_v53 = vld [vmem:[#allocation24_spill] sm:$0xff] }
  0xde   :  { %4908 = vmatpush3.msra.mxu0 %v9134_v33  ;;  %4935 = vmatpush3.msra.mxu1 %v9102_v51  ;;  %v6848_v51 = vsub.f32 %v147_v55, %v6822_v4  ;;  %v6897_v22 = vsub.f32 %v6833_v41, %v8750_v60  ;;  %v6905_v55 = vand.u32 4294901760, %v126_v50  ;;  %v6920_v33 = vsub.f32 %v127_v10, %v6880_v47  ;;  %v9163_v10 = vld [vmem:[#allocation36_spill] sm:$0xff] }
  0xdf   :  { %4909 = vmatprep.subr.mxu0 %v9135_v21  ;;  %4936 = vmatprep.subr.mxu1 %v9103_v32  ;;  %v9141_v32 = vand.u32 4294901760, %v6573_v20  ;;  %v9145_v20 = vand.u32 4294901760, %v6605_v52  ;;  %v142_v52 = vld [vmem:[#allocation6 + $0x2d0] sm:$0xff]  ;;  %v9158_v21 = vld [vmem:[#allocation40_spill] sm:$0xff] }
  0xe0   :  { %4910 = vmatpush3.msra.mxu0 %v9136_v24  ;;  %4937 = vmatpush3.msra.mxu1 %v9104_v45  ;;  %v6856_v45 = vand.u32 4294901760, %v128_v43  ;;  %v8751_v34 = vand.u32 4294901760, %v6848_v51  ;;  %v6903_v11 = vand.u32 4294901760, %v142_v52  ;;  %9155 = vst [vmem:[#allocation31_spill] sm:$0xff] %v6905_v55 }
  0xe1   :  { %4911 = vmatprep.subr.mxu0 %v9137_v54  ;;  %4938 = vmatprep.subr.mxu1 %v9105_v40  ;;  %v9143_v40 = vld [vmem:[#allocation32_spill] sm:$0xff] }
  0xe2   :  { %4912 = vmatpush3.msra.mxu0 %v9139_v39  ;;  %4939 = vmatpush3.msra.mxu1 %v9106_v38  ;;  %9142 = vst [vmem:[#allocation12_spill] sm:$0xff] %v6856_v45  ;;  %v9144_v27 = vand.u32 4294901760, %v9143_v40  ;;  %v143_v38 = vld [vmem:[#allocation6 + $0x2d8] sm:$0xff]  ;;  %v6886_v9 = vsub.f32 %v128_v43, %v6856_v45  ;;  %9154 = vst [vmem:[#allocation30_spill] sm:$0xff] %v6903_v11  ;;  %v6917_v46 = vsub.f32 %v6848_v51, %v8751_v34  ;;  %v140_v43 = vld [vmem:[#allocation6 + $0x2c0] sm:$0xff] }
  0xe3   :  { %4913 = vmatprep.subr.mxu0 %v9141_v32  ;;  %4940 = vmatprep.subr.mxu1 %v9107_v37  ;;  %v6868_v37 = vand.u32 4294901760, %v144_v63  ;;  %v6888_v7 = vand.u32 4294901760, %v143_v38 }
  0xe4   :  { %4914 = vmatpush3.msra.mxu0 %v9144_v27  ;;  %4941 = vmatpush3.msra.mxu1 %v9108_v49  ;;  %v6877_v49 = vsub.f32 %v129_v16, %v6845_v29  ;;  %v9159_v16 = vand.u32 4294901760, %v9158_v21  ;;  %v8746_v54 = vand.u32 4294901760, %v6886_v9  ;;  %v6946_v27 = vand.u32 4294901760, %v141_v19 }
  0xe5   :  { %4915 = vmatprep.subr.mxu0 %v9145_v20  ;;  %4942 = vmatprep.subr.mxu1 %v9109_v61  ;;  %9146 = vst [vmem:[#allocation23_spill] sm:$0xff] %v6868_v37  ;;  %v9149_v61 = vand.u32 4294901760, %v6624_v17  ;;  %9150 = vst [vmem:[#allocation29_spill] sm:$0xff] %v6888_v7  ;;  %v8748_v17 = vand.u32 4294901760, %v6863_v23  ;;  %v6909_v18 = vsub.f32 %v144_v63, %v6868_v37  ;;  %v9161_v63 = vld [vmem:[#allocation39_spill] sm:$0xff]  ;;  %v6948_v20 = vand.u32 4294901760, %v124_v58 }
  0xe6   :  { %4916 = vmatpush3.msra.mxu0 %v9147_v62  ;;  %4943 = vmatpush3.msra.mxu1 %v9110_v8  ;;  %v8747_v8 = vand.u32 4294901760, %v6854_v2  ;;  %v8744_v1 = vand.u32 4294901760, %v6877_v49  ;;  %v6935_v39 = vsub.f32 %v143_v38, %v6888_v7  ;;  %v9162_v32 = vand.u32 4294901760, %v9161_v63  ;;  %9164 = vst [vmem:[#allocation16_spill] sm:$0xff] %v6946_v27  ;;  %v9166_v62 = vld [vmem:[#allocation35_spill] sm:$0xff]  ;;  %v9167_v38 = vld [vmem:[#allocation37_spill] sm:$0xff] }
  0xe7   :  { %4917 = vmatprep.subr.mxu0 %v9149_v61  ;;  %4944 = vmatprep.subr.mxu1 %v9111_v26  ;;  %v125_v26 = vld [vmem:[#allocation6 + $0x248] sm:$0xff]  ;;  %v6944_v40 = vsub.f32 %v6863_v23, %v8748_v17  ;;  %9165 = vst [vmem:[#allocation18_spill] sm:$0xff] %v6948_v20  ;;  %v6953_v61 = vsub.f32 %v126_v50, %v6905_v55  ;;  %v6972_v21 = vand.u32 4294901760, %v140_v43  ;;  %v139_v63 = vld [vmem:[#allocation6 + $0x2b8] sm:$0xff] }
  0xe8   :  { %4918 = vmatpush3.msra.mxu0 %v9151_v14  ;;  %4945 = vmatpush3.msra.mxu1 %v9112_v36  ;;  %v8745_v36 = vand.u32 4294901760, %v6871_v12  ;;  %v6929_v0 = vsub.f32 %v6854_v2, %v8747_v8  ;;  %v6931_v24 = vand.u32 4294901760, %v125_v26  ;;  %v6970_v50 = vsub.f32 %v6877_v49, %v8744_v1 }
  0xe9   :  { %4919 = vmatprep.subr.mxu0 %v9152_v48  ;;  %4946 = vmatprep.subr.mxu1 %v9153_v6  ;;  %v8749_v48 = vand.u32 4294901760, %v6909_v18  ;;  %v123_v6 = vld [vmem:[#allocation6 + $0x238] sm:$0xff]  ;;  %9168 = vst [vmem:[#allocation17_spill] sm:$0xff] %v6972_v21  ;;  %v8755_v8 = vand.u32 4294901760, %v6953_v61  ;;  %v7019_v60 = vsub.f32 %v140_v43, %v6972_v21 }
  0xea   :  { %4920 = vmatpush3.msra.mxu0 %v9156_v42  ;;  %4947 = vmatpush3.msra.mxu1 %v9157_v53  ;;  %9160 = vst [vmem:[#allocation15_spill] sm:$0xff] %v6931_v24  ;;  %v6958_v14 = vsub.f32 %v6871_v12, %v8745_v36  ;;  %v6962_v42 = vsub.f32 %v142_v52, %v6903_v11  ;;  %v2167_v53 = vand.u32 4294901760, %v6917_v46  ;;  %v6993_v1 = vand.u32 4294901760, %v123_v6  ;;  %v120_v52 = vld [vmem:[#allocation6 + $0x220] sm:$0xff] }
  0xeb   :  { %4921 = vmatprep.subr.mxu0 %v9159_v16  ;;  %4948 = vmatprep.subr.mxu1 %v6498_v44  ;;  %v8752_v16 = vand.u32 4294901760, %v6920_v33  ;;  %v6984_v46 = vsub.f32 %v6886_v9, %v8746_v54  ;;  %v6996_v36 = vsub.f32 %v141_v19, %v6946_v27  ;;  %v7011_v19 = vand.u32 4294901760, %v139_v63  ;;  %9173 = vst [vmem:[#allocation27_spill] sm:$0xff] %v7019_v60  ;;  %v137_v54 = vld [vmem:[#allocation6 + $0x2a8] sm:$0xff] }
  0xec   :  { %4922 = vmatpush3.msra.mxu0 %v9162_v32  ;;  %1827 = vmatprep.mubr.f32.mxu0 %v9163_v10  ;;  %v8753_v32 = vand.u32 4294901760, %v6935_v39  ;;  %9171 = vst [vmem:[#allocation21_spill] sm:$0xff] %v6993_v1 }
  0xed   :  { %4949 = vmatpush3.msra.mxu1 %v9166_v62  ;;  %1829 = vmatmul.mubr.f32.vlgmr.msra.gmra.mxu0 %v9167_v38  ;;  %v6991_v62 = vsub.f32 %v124_v58, %v6948_v20  ;;  %v8754_v58 = vand.u32 4294901760, %v6962_v42  ;;  %9172 = vst [vmem:[#allocation22_spill] sm:$0xff] %v7011_v19  ;;  %v7016_v17 = vsub.f32 %v6920_v33, %v8752_v16 }
  0xee   :  { %4950 = vmatprep.subr.mxu1 %v6560_v25  ;;  %4961 = vmatprep.subr.mxu0 %v6822_v4  ;;  %v6979_v25 = vsub.f32 %v125_v26, %v6931_v24  ;;  %v122_v26 = vld [vmem:[#allocation6 + $0x230] sm:$0xff]  ;;  %v7027_v34 = vsub.f32 %v6935_v39, %v8753_v32 }
  0xef   :  { %4951 = vmatpush3.msra.mxu1 %v6540_v31  ;;  %4962 = vmatpush3.msra.mxu0 %v6814_v15  ;;  %v2174_v31 = vand.u32 4294901760, %v6944_v40  ;;  %9170 = vst [vmem:[#allocation19_spill] sm:$0xff] %v6991_v62  ;;  %v138_v40 = vld [vmem:[#allocation6 + $0x2b0] sm:$0xff] }
  0xf0   :  { %9169 = vst [vmem:[#allocation20_spill] sm:$0xff] %v6979_v25  ;;  %4952 = vmatprep.subr.mxu1 %v9116_v5  ;;  %4963 = vmatprep.subr.mxu0 %v6835_v35  ;;  %v7004_v5 = vsub.f32 %v6909_v18, %v8749_v48  ;;  %v121_v48 = vld [vmem:[#allocation6 + $0x228] sm:$0xff]  ;;  %v7037_v43 = vand.u32 4294901760, %v138_v40 }
  0xf1   :  { %4953 = vmatpush3.msra.mxu1 %v6548_v59  ;;  %4964 = vmatpush3.msra.mxu0 %v6827_v28  ;;  %v7029_v59 = vand.u32 4294901760, %v122_v26  ;;  %v7054_v16 = vand.u32 4294901760, %v121_v48 }
  0xf2   :  { %4954 = vmatprep.subr.mxu1 %v6601_v56  ;;  %4965 = vmatprep.subr.mxu0 %v6840_v30  ;;  %9176 = vst [vmem:[#allocation33_spill] sm:$0xff] %v7037_v43  ;;  %v2188_v44 = vand.u32 4294901760, %v7004_v5  ;;  %v136_v56 = vld [vmem:[#allocation6 + $0x2a0] sm:$0xff]  ;;  %v47_v5 = vld [vmem:[#allocation3 + $0x28] sm:$0xff]  ;;  %v7100_v30 = vsub.f32 %v138_v40, %v7037_v43  ;;  %v9187_v40 = vand.u32 4294901760, %v6958_v14 }
  0xf3   :  { %4955 = vmatpush3.msra.mxu1 %v6612_v13  ;;  %4966 = vmatpush3.msra.mxu0 %v6845_v29  ;;  %9174 = vst [vmem:[#allocation28_spill] sm:$0xff] %v7029_v59  ;;  %v7035_v13 = vsub.f32 %v123_v6, %v6993_v1  ;;  %v7052_v6 = vsub.f32 %v6953_v61, %v8755_v8  ;;  %9177 = vst [vmem:[#allocation38_spill] sm:$0xff] %v7054_v16  ;;  %v2195_v8 = vand.u32 4294901760, %v7027_v34 }
  0xf4   :  { %4956 = vmatprep.subr.mxu1 %v6618_v3  ;;  %4967 = vmatprep.subr.mxu0 %v6868_v37  ;;  %v7047_v3 = vsub.f32 %v6962_v42, %v8754_v58  ;;  %v7062_v58 = vand.u32 4294901760, %v120_v52  ;;  %v7067_v32 = vsub.f32 %v122_v26, %v7029_v59  ;;  %v119_v37 = vld [vmem:[#allocation6 + $0x218] sm:$0xff]  ;;  %v9182_v34 = vand.u32 4294901760, %v6996_v36 }
  0xf5   :  { %9175 = vst [vmem:[#allocation34_spill] sm:$0xff] %v7035_v13  ;;  %4957 = vmatpush3.msra.mxu1 %v6620_v57  ;;  %1931 = vmatprep.mubr.f32.mxu1 %v9163_v10  ;;  %v7059_v10 = vand.u32 4294901760, %v137_v54  ;;  %v7075_v57 = vsub.f32 %v139_v63, %v7011_v19  ;;  %v7085_v26 = vand.u32 4294901760, %v136_v56  ;;  %v9185_v63 = vand.u32 4294901760, %v7019_v60 }
  0xf6   :  { %4968 = vmatpush3.msra.mxu0 %v6856_v45  ;;  %1933 = vmatmul.mubr.f32.vlgmr.msra.gmra.mxu1 %v9167_v38  ;;  %9179 = vst [vmem:[#allocation25_spill] sm:$0xff] %v7062_v58  ;;  %v9180_v45 = vand.u32 4294901760, %v6979_v25 }
  0xf7   :  { %9178 = vst [vmem:[#allocation32_spill] sm:$0xff] %v7059_v10  ;;  %4969 = vmatprep.subr.mxu0 %v6888_v7  ;;  %4996 = vmatprep.subr.mxu1 %v2167_v53  ;;  %v9181_v7 = vand.u32 4294901760, %v6897_v22  ;;  %v7083_v53 = vsub.f32 %v6996_v36, %v9182_v34  ;;  %v2090_v22 = vand.u32 4294901760, %v7052_v6  ;;  %v7097_v34 = vsub.f32 %v121_v48, %v7054_v16  ;;  %v118_v48 = vld [vmem:[#allocation6 + $0x210] sm:$0xff] }
  0xf8   :  { %v7072_v38 = vsub.f32 %v6979_v25, %v9180_v45  ;;  %4970 = vmatpush3.msra.mxu0 %v6880_v47  ;;  %v9183_v45 = vand.u32 4294901760, %v6991_v62  ;;  %v46_v25 = vld [vmem:[#allocation3 + $0x20] sm:$0xff]  ;;  %v135_v47 = vld [vmem:[#allocation6 + $0x298] sm:$0xff]  ;;  %v7113_v6 = vand.u32 4294901760, %v119_v37 }
  0xf9   :  { %4997 = vmatpush3.msra.mxu1 %v9181_v7  ;;  %4971 = vmatprep.subr.mxu0 %v6903_v11  ;;  %v2202_v7 = vand.u32 4294901760, %v7047_v3  ;;  %v7111_v3 = vsub.f32 %v120_v52, %v7062_v58  ;;  %v7115_v11 = vand.u32 4294901760, %v47_v5  ;;  %v7125_v52 = vand.u32 4294901760, %v46_v25 }
  0xfa   :  { %v7090_v29 = vsub.f32 %v6991_v62, %v9183_v45  ;;  %4998 = vmatprep.subr.mxu1 %v2174_v31  ;;  %4972 = vmatpush3.msra.mxu0 %v6905_v55  ;;  %v9184_v45 = vand.u32 4294901760, %v6929_v0  ;;  %v7108_v31 = vsub.f32 %v7019_v60, %v9185_v63  ;;  %v2097_v0 = vand.u32 4294901760, %v7072_v38  ;;  %v134_v55 = vld [vmem:[#allocation6 + $0x290] sm:$0xff] }
  0xfb   :  { %9186 = vst [vmem:[#allocation24_spill] sm:$0xff] %v7115_v11  ;;  %4973 = vmatprep.subr.mxu0 %v6946_v27  ;;  %v7123_v63 = vsub.f32 %v137_v54, %v7059_v10  ;;  %9188 = vst [vmem:[#allocation40_spill] sm:$0xff] %v7125_v52  ;;  %v9189_v62 = vand.u32 4294901760, %v6970_v50  ;;  %v2209_v27 = vand.u32 4294901760, %v7083_v53  ;;  %v9190_v38 = vand.u32 4294901760, %v7035_v13  ;;  %v133_v54 = vld [vmem:[#allocation6 + $0x288] sm:$0xff]  ;;  %2275 = vmatprep.mubr.f32.mxu1 %v7115_v11 }
  0xfc   :  { %4999 = vmatpush3.msra.mxu1 %v9184_v45  ;;  %4974 = vmatpush3.msra.mxu0 %v6931_v24  ;;  %v2104_v14 = vand.u32 4294901760, %v7090_v29  ;;  %v7141_v60 = vand.u32 4294901760, %v118_v48  ;;  %v7145_v29 = vsub.f32 %v136_v56, %v7085_v26  ;;  %v9191_v53 = vand.u32 4294901760, %v6984_v46 }
  0xfd   :  { %5000 = vmatprep.subr.mxu1 %v9187_v40  ;;  %v7132_v40 = vand.u32 4294901760, %v135_v47  ;;  %v7137_v45 = vsub.f32 %v7035_v13, %v9190_v38  ;;  %4975 = vmatprep.subr.mxu0 %v6972_v21  ;;  %v2216_v38 = vand.u32 4294901760, %v7108_v31  ;;  %v7152_v21 = vsub.f32 %v119_v37, %v7113_v6  ;;  %v132_v31 = vld [vmem:[#allocation6 + $0x280] sm:$0xff] }
  0xfe   :  { %5001 = vmatpush3.msra.mxu1 %v9189_v62  ;;  %v117_v62 = vld [vmem:[#allocation6 + $0x208] sm:$0xff]  ;;  %4976 = vmatpush3.msra.mxu0 %v6948_v20  ;;  %v7157_v24 = vsub.f32 %v47_v5, %v7115_v11  ;;  %v9193_v56 = vand.u32 4294901760, %v7075_v57  ;;  %v7163_v20 = vand.u32 4294901760, %v133_v54  ;;  %v7167_v37 = vsub.f32 %v46_v25, %v7125_v52 }
  0xff   :  { %5002 = vmatprep.subr.mxu1 %v2188_v44  ;;  %v7154_v44 = vand.u32 4294901760, %v134_v55  ;;  %4977 = vmatprep.subr.mxu0 %v7011_v19  ;;  %v9194_v5 = vand.u32 4294901760, %v7016_v17  ;;  %v7173_v19 = vand.u32 4294901760, %v117_v62  ;;  %v7177_v13 = vsub.f32 %v135_v47, %v7132_v40  ;;  %v9230_v11 = vld [vmem:[#allocation32_spill] sm:$0xff] }
 0x100   :  { %5003 = vmatpush3.msra.mxu1 %v9191_v53  ;;  %v2222_v50 = vsub.f32 %v7075_v57, %v9193_v56  ;;  %v116_v53 = vld [vmem:[#allocation6 + $0x200] sm:$0xff]  ;;  %4978 = vmatpush3.msra.mxu0 %v6993_v1  ;;  %v9195_v25 = vand.u32 4294901760, %v7100_v30  ;;  %v7184_v1 = vsub.f32 %v118_v48, %v7141_v60  ;;  %v9196_v17 = vand.u32 4294901760, %v7067_v32 }
 0x101   :  { %9192 = vst [vmem:[#allocation39_spill] sm:$0xff] %v7154_v44  ;;  %5004 = vmatprep.subr.mxu1 %v2195_v8  ;;  %v2111_v8 = vand.u32 4294901760, %v7137_v45  ;;  %4979 = vmatprep.subr.mxu0 %v7037_v43  ;;  %v7191_v47 = vand.u32 4294901760, %v132_v31  ;;  %v7193_v56 = vand.u32 4294901760, %v116_v53 }
 0x102   :  { %5005 = vmatpush3.msra.mxu1 %v9194_v5  ;;  %v2229_v46 = vsub.f32 %v7100_v30, %v9195_v25  ;;  %v2117_v45 = vsub.f32 %v7067_v32, %v9196_v17  ;;  %4980 = vmatpush3.msra.mxu0 %v7029_v59  ;;  %v7197_v25 = vsub.f32 %v134_v55, %v7154_v44  ;;  %v2223_v48 = vand.u32 4294901760, %v2222_v50 }
 0x103   :  { %5006 = vmatprep.subr.mxu1 %v2202_v7  ;;  %4981 = vmatprep.subr.mxu0 %v7059_v10  ;;  %v9197_v17 = vand.u32 4294901760, %v7123_v63  ;;  %v7207_v7 = vsub.f32 %v117_v62, %v7173_v19  ;;  %v9198_v55 = vand.u32 4294901760, %v7097_v34  ;;  %v7214_v50 = vsub.f32 %v133_v54, %v7163_v20 }
 0x104   :  { %5007 = vmatpush3.msra.mxu1 %v2090_v22  ;;  %4982 = vmatpush3.msra.mxu0 %v7054_v16  ;;  %v2118_v22 = vand.u32 4294901760, %v2117_v45  ;;  %v9199_v59 = vand.u32 4294901760, %v7145_v29  ;;  %v9201_v54 = vand.u32 4294901760, %v7157_v24  ;;  %v9203_v45 = vand.u32 4294901760, %v7111_v3 }
 0x105   :  { %5008 = vmatprep.subr.mxu1 %v2209_v27  ;;  %v2236_v5 = vsub.f32 %v7123_v63, %v9197_v17  ;;  %v2124_v10 = vsub.f32 %v7097_v34, %v9198_v55  ;;  %4983 = vmatprep.subr.mxu0 %v7085_v26  ;;  %v2230_v17 = vand.u32 4294901760, %v2229_v46  ;;  %v7223_v55 = vsub.f32 %v116_v53, %v7193_v56 }
 0x106   :  { %5009 = vmatpush3.msra.mxu1 %v2097_v0  ;;  %v2243_v0 = vsub.f32 %v7145_v29, %v9199_v59  ;;  %4984 = vmatpush3.msra.mxu0 %v7062_v58  ;;  %v2037_v27 = vsub.f32 %v7157_v24, %v9201_v54  ;;  %v7230_v46 = vsub.f32 %v132_v31, %v7191_v47  ;;  %v9204_v53 = vand.u32 4294901760, %v7167_v37 }
 0x107   :  { %5010 = vmatprep.subr.mxu1 %v2216_v38  ;;  %9200 = vst [vmem:[#allocation36_spill] sm:$0xff] %v7223_v55  ;;  %4985 = vmatprep.subr.mxu0 %v7132_v40  ;;  %v2237_v59 = vand.u32 4294901760, %v2236_v5  ;;  %v2125_v54 = vand.u32 4294901760, %v2124_v10  ;;  %v9205_v31 = vand.u32 4294901760, %v7177_v13  ;;  %v8800_v58 = vand.u32 4294901760, %v7223_v55 }
 0x108   :  { %5011 = vmatpush3.msra.mxu1 %v2104_v14  ;;  %9202 = vst [vmem:[#allocation35_spill] sm:$0xff] %v7230_v46  ;;  %v2131_v14 = vsub.f32 %v7111_v3, %v9203_v45  ;;  %v2043_v62 = vsub.f32 %v7167_v37, %v9204_v53  ;;  %4986 = vmatpush3.msra.mxu0 %v7113_v6  ;;  %v9206_v45 = vand.u32 4294901760, %v7152_v21  ;;  %v2038_v10 = vand.u32 4294901760, %v2037_v27 }
 0x109   :  { %5012 = vmatprep.subr.mxu1 %v2223_v48  ;;  %v2250_v38 = vsub.f32 %v7177_v13, %v9205_v31  ;;  %4987 = vmatprep.subr.mxu0 %v7154_v44  ;;  %v2244_v48 = vand.u32 4294901760, %v2243_v0  ;;  %v8801_v5 = vand.u32 4294901760, %v7230_v46  ;;  %v9208_v44 = vand.u32 4294901760, %v7184_v1 }
 0x10a   :  { %5013 = vmatpush3.msra.mxu1 %v2111_v8  ;;  %v2138_v53 = vsub.f32 %v7152_v21, %v9206_v45  ;;  %4988 = vmatpush3.msra.mxu0 %v7141_v60  ;;  %v9207_v8 = vand.u32 4294901760, %v7197_v25  ;;  %v2044_v0 = vand.u32 4294901760, %v2043_v62  ;;  %v9209_v27 = vand.u32 4294901760, %v7214_v50 }
 0x10b   :  { %5014 = vmatprep.subr.mxu1 %v2230_v17  ;;  %4989 = vmatprep.subr.mxu0 %v7163_v20  ;;  %v2132_v17 = vand.u32 4294901760, %v2131_v14  ;;  %v2145_v45 = vsub.f32 %v7184_v1, %v9208_v44  ;;  %v9210_v62 = vand.u32 4294901760, %v7207_v7 }
 0x10c   :  { %5015 = vmatpush3.msra.mxu1 %v2118_v22  ;;  %v2257_v31 = vsub.f32 %v7197_v25, %v9207_v8  ;;  %4990 = vmatpush3.msra.mxu0 %v7173_v19  ;;  %v2251_v22 = vand.u32 4294901760, %v2250_v38  ;;  %v2264_v8 = vsub.f32 %v7214_v50, %v9209_v27  ;;  %v2271_v38 = vsub.f32 %v7230_v46, %v8801_v5  ;;  %v9214_v27 = vld [vmem:[#allocation27_spill] sm:$0xff]  ;;  %v9228_v5 = vld [vmem:[#allocation21_spill] sm:$0xff] }
 0x10d   :  { %5016 = vmatprep.subr.mxu1 %v2237_v59  ;;  %4991 = vmatprep.subr.mxu0 %v7191_v47  ;;  %v2139_v59 = vand.u32 4294901760, %v2138_v53  ;;  %v2152_v14 = vsub.f32 %v7207_v7, %v9210_v62  ;;  %v9217_v62 = vld [vmem:[#allocation12_spill] sm:$0xff] }
 0x10e   :  { %5017 = vmatpush3.msra.mxu1 %v2125_v54  ;;  %4992 = vmatpush3.msra.mxu0 %v7193_v56  ;;  %v2258_v44 = vand.u32 4294901760, %v2257_v31  ;;  %v2146_v54 = vand.u32 4294901760, %v2145_v45  ;;  %v2265_v53 = vand.u32 4294901760, %v2264_v8  ;;  %v2272_v31 = vand.u32 4294901760, %v2271_v38  ;;  %v9212_v45 = vld [vmem:[#allocation20_spill] sm:$0xff]  ;;  %v9215_v8 = vld [vmem:[#allocation23_spill] sm:$0xff] }
 0x10f   :  { %5018 = vmatprep.subr.mxu1 %v2244_v48  ;;  %2039 = vmatprep.mubr.f32.mxu0 %v2038_v10  ;;  %v2159_v48 = vsub.f32 %v7223_v55, %v8800_v58  ;;  %v2153_v10 = vand.u32 4294901760, %v2152_v14  ;;  %v9218_v14 = vld [vmem:[#allocation29_spill] sm:$0xff]  ;;  %v9220_v38 = vld [vmem:[#allocation14_spill] sm:$0xff] }
 0x110   :  { %5019 = vmatpush3.msra.mxu1 %v2132_v17  ;;  %2045 = vmatmul.mubr.f32.vlgmr.msra.gmra.mxu0 %v2044_v0  ;;  %v9211_v0 = vld [vmem:[#allocation13_spill] sm:$0xff]  ;;  %v9227_v58 = vld [vmem:[#allocation22_spill] sm:$0xff] }
 0x111   :  { %5020 = vmatprep.subr.mxu1 %v2251_v22  ;;  %5031 = vmatprep.subr.mxu0 %v6848_v51  ;;  %v2160_v17 = vand.u32 4294901760, %v2159_v48  ;;  %v9213_v22 = vld [vmem:[#allocation26_spill] sm:$0xff]  ;;  %v9222_v48 = vld [vmem:[#allocation31_spill] sm:$0xff] }
 0x112   :  { %5021 = vmatpush3.msra.mxu1 %v2139_v59  ;;  %5032 = vmatpush3.msra.mxu0 %v6833_v41  ;;  %v9216_v59 = vld [vmem:[#allocation19_spill] sm:$0xff] }
 0x113   :  { %5022 = vmatprep.subr.mxu1 %v2258_v44  ;;  %5033 = vmatprep.subr.mxu0 %v6863_v23  ;;  %v9219_v44 = vld [vmem:[#allocation34_spill] sm:$0xff] }
 0x114   :  { %5023 = vmatpush3.msra.mxu1 %v2146_v54  ;;  %5034 = vmatpush3.msra.mxu0 %v6854_v2  ;;  %v9221_v54 = vld [vmem:[#allocation30_spill] sm:$0xff] }
 0x115   :  { %5024 = vmatprep.subr.mxu1 %v2265_v53  ;;  %5035 = vmatprep.subr.mxu0 %v6871_v12  ;;  %v9223_v53 = vld [vmem:[#allocation16_spill] sm:$0xff] }
 0x116   :  { %5025 = vmatpush3.msra.mxu1 %v2153_v10  ;;  %5036 = vmatpush3.msra.mxu0 %v6877_v49  ;;  %v9224_v10 = vld [vmem:[#allocation15_spill] sm:$0xff] }
 0x117   :  { %5026 = vmatprep.subr.mxu1 %v2272_v31  ;;  %5037 = vmatprep.subr.mxu0 %v6909_v18  ;;  %v9225_v31 = vld [vmem:[#allocation17_spill] sm:$0xff] }
 0x118   :  { %5027 = vmatpush3.msra.mxu1 %v2160_v17  ;;  %5038 = vmatpush3.msra.mxu0 %v6886_v9  ;;  %v9226_v17 = vld [vmem:[#allocation18_spill] sm:$0xff] }
 0x119   :  { %2277 = vmatmul.mubr.f32.vlgmr.msra.gmra.mxu1 %v7125_v52  ;;  %5039 = vmatprep.subr.mxu0 %v6935_v39  ;;  %v9229_v52 = vld [vmem:[#allocation28_spill] sm:$0xff] }
 0x11a   :  { %5066 = vmatprep.subr.mxu1 %v6822_v4  ;;  %5040 = vmatpush3.msra.mxu0 %v6920_v33 }
 0x11b   :  { %5067 = vmatpush3.msra.mxu1 %v6814_v15  ;;  %5041 = vmatprep.subr.mxu0 %v6962_v42 }
 0x11c   :  { %5068 = vmatprep.subr.mxu1 %v6835_v35  ;;  %5042 = vmatpush3.msra.mxu0 %v6953_v61 }
 0x11d   :  { %5069 = vmatpush3.msra.mxu1 %v6827_v28  ;;  %5043 = vmatprep.subr.mxu0 %v6996_v36 }
 0x11e   :  { %5070 = vmatprep.subr.mxu1 %v9211_v0  ;;  %5044 = vmatpush3.msra.mxu0 %v9212_v45 }
 0x11f   :  { %5071 = vmatpush3.msra.mxu1 %v9213_v22  ;;  %5045 = vmatprep.subr.mxu0 %v9214_v27 }
 0x120   :  { %5072 = vmatprep.subr.mxu1 %v9215_v8  ;;  %5046 = vmatpush3.msra.mxu0 %v9216_v59 }
 0x121   :  { %5073 = vmatpush3.msra.mxu1 %v9217_v62  ;;  %5047 = vmatprep.subr.mxu0 %v7075_v57 }
 0x122   :  { %5074 = vmatprep.subr.mxu1 %v9218_v14  ;;  %5048 = vmatpush3.msra.mxu0 %v9219_v44 }
 0x123   :  { %5075 = vmatpush3.msra.mxu1 %v9220_v38  ;;  %5049 = vmatprep.subr.mxu0 %v7100_v30 }
 0x124   :  { %5076 = vmatprep.subr.mxu1 %v9221_v54  ;;  %5050 = vmatpush3.msra.mxu0 %v7067_v32 }
 0x125   :  { %5077 = vmatpush3.msra.mxu1 %v9222_v48  ;;  %5051 = vmatprep.subr.mxu0 %v7123_v63 }
 0x126   :  { %5078 = vmatprep.subr.mxu1 %v9223_v53  ;;  %5052 = vmatpush3.msra.mxu0 %v7097_v34 }
 0x127   :  { %5079 = vmatpush3.msra.mxu1 %v9224_v10  ;;  %5053 = vmatprep.subr.mxu0 %v7145_v29 }
 0x128   :  { %5080 = vmatprep.subr.mxu1 %v9225_v31  ;;  %5054 = vmatpush3.msra.mxu0 %v7111_v3 }
 0x129   :  { %5081 = vmatpush3.msra.mxu1 %v9226_v17  ;;  %5055 = vmatprep.subr.mxu0 %v7177_v13 }
 0x12a   :  { %5082 = vmatprep.subr.mxu1 %v9227_v58  ;;  %5056 = vmatpush3.msra.mxu0 %v7152_v21 }
 0x12b   :  { %5083 = vmatpush3.msra.mxu1 %v9228_v5  ;;  %5057 = vmatprep.subr.mxu0 %v7197_v25 }
 0x12c   :  { %5084 = vmatprep.subr.mxu1 %v7037_v43  ;;  %5058 = vmatpush3.msra.mxu0 %v7184_v1  ;;  %v9231_v43 = vld [vmem:[#allocation25_spill] sm:$0xff] }
 0x12d   :  { %5085 = vmatpush3.msra.mxu1 %v9229_v52  ;;  %5059 = vmatprep.subr.mxu0 %v7214_v50 }
 0x12e   :  { %5086 = vmatprep.subr.mxu1 %v9230_v11  ;;  %5060 = vmatpush3.msra.mxu0 %v7207_v7  ;;  %v9232_v11 = vand.u32 4294901760, %v6848_v51  ;;  %v9237_v51 = vand.u32 4294901760, %v6871_v12  ;;  %v9242_v12 = vand.u32 4294901760, %v7167_v37 }
 0x12f   :  { %5087 = vmatpush3.msra.mxu1 %v7054_v16  ;;  %5061 = vmatprep.subr.mxu0 %v7230_v46  ;;  %v9233_v16 = vand.u32 4294901760, %v6833_v41  ;;  %v9234_v46 = vld [vmem:[#allocation39_spill] sm:$0xff]  ;;  %v9238_v41 = vand.u32 4294901760, %v6877_v49  ;;  %v9244_v49 = vand.u32 4294901760, %v6920_v33  ;;  %v9249_v33 = vand.u32 4294901760, %v9214_v27 }
 0x130   :  { %5088 = vmatprep.subr.mxu1 %v7085_v26  ;;  %5062 = vmatpush3.msra.mxu0 %v7223_v55  ;;  %v9235_v55 = vand.u32 4294901760, %v6863_v23  ;;  %v9239_v23 = vand.u32 4294901760, %v6909_v18  ;;  %v9245_v18 = vand.u32 4294901760, %v6962_v42  ;;  %v9252_v42 = vand.u32 4294901760, %v9219_v44 }
 0x131   :  { %2412 = vmatprep.mubr.f32.mxu0 %v7157_v24  ;;  %5089 = vmatpush3.msra.mxu1 %v9231_v43  ;;  %v9236_v43 = vand.u32 4294901760, %v6854_v2  ;;  %v9240_v2 = vand.u32 4294901760, %v7157_v24  ;;  %v9247_v24 = vand.u32 4294901760, %v6996_v36  ;;  %v9251_v36 = vand.u32 4294901760, %v7075_v57 }
 0x132   :  { %2415 = vmatmul.mubr.f32.vlgmr.msra.gmra.mxu0 %v7167_v37  ;;  %5090 = vmatprep.subr.mxu1 %v7132_v40  ;;  %v162_v37 = vld [vmem:[#allocation6 + $0x370] sm:$0xff]  ;;  %v9255_v27 = vand.u32 4294901760, %v7123_v63  ;;  %v9258_v63 = vand.u32 4294901760, %v7145_v29 }
 0x133   :  { %5101 = vmatprep.subr.mxu0 %v9232_v11  ;;  %5091 = vmatpush3.msra.mxu1 %v7113_v6  ;;  %v9241_v11 = vand.u32 4294901760, %v6886_v9  ;;  %v9246_v9 = vand.u32 4294901760, %v6953_v61  ;;  %v158_v29 = vld [vmem:[#allocation6 + $0x350] sm:$0xff] }
 0x134   :  { %5102 = vmatpush3.msra.mxu0 %v9233_v16  ;;  %5092 = vmatprep.subr.mxu1 %v9234_v46  ;;  %v9243_v16 = vand.u32 4294901760, %v6935_v39  ;;  %v9250_v39 = vand.u32 4294901760, %v9216_v59 }
 0x135   :  { %5103 = vmatprep.subr.mxu0 %v9235_v55  ;;  %5093 = vmatpush3.msra.mxu1 %v7141_v60  ;;  %v177_v55 = vld [vmem:[#allocation6 + $0x3e8] sm:$0xff] }
 0x136   :  { %5104 = vmatpush3.msra.mxu0 %v9236_v43  ;;  %5094 = vmatprep.subr.mxu1 %v7163_v20  ;;  %v7410_v59 = vand.u32 4294901760, %v177_v55 }
 0x137   :  { %5105 = vmatprep.subr.mxu0 %v9237_v51  ;;  %5095 = vmatpush3.msra.mxu1 %v7173_v19  ;;  %v159_v51 = vld [vmem:[#allocation6 + $0x358] sm:$0xff] }
 0x138   :  { %5106 = vmatpush3.msra.mxu0 %v9238_v41  ;;  %5096 = vmatprep.subr.mxu1 %v7191_v47  ;;  %9256 = vst [vmem:[#allocation37_spill] sm:$0xff] %v7410_v59  ;;  %v9263_v41 = vand.u32 4294901760, %v7177_v13 }
 0x139   :  { %5107 = vmatprep.subr.mxu0 %v9239_v23  ;;  %5097 = vmatpush3.msra.mxu1 %v7193_v56 }
 0x13a   :  { %2519 = vmatprep.mubr.f32.mxu1 %v9240_v2  ;;  %5108 = vmatpush3.msra.mxu0 %v9241_v11  ;;  %v7444_v2 = vsub.f32 %v177_v55, %v7410_v59  ;;  %v9277_v55 = vld [vmem:[#allocation35_spill] sm:$0xff] }
 0x13b   :  { %2523 = vmatmul.mubr.f32.vlgmr.msra.gmra.mxu1 %v9242_v12  ;;  %5109 = vmatprep.subr.mxu0 %v9243_v16  ;;  %v173_v12 = vld [vmem:[#allocation6 + $0x3c8] sm:$0xff]  ;;  %v9267_v16 = vld [vmem:[#allocation33_spill] sm:$0xff] }
 0x13c   :  { %5136 = vmatprep.subr.mxu1 %v6822_v4  ;;  %5110 = vmatpush3.msra.mxu0 %v9244_v49  ;;  %v9248_v4 = vand.u32 4294901760, %v9212_v45  ;;  %v9254_v45 = vand.u32 4294901760, %v7067_v32  ;;  %v9257_v32 = vand.u32 4294901760, %v7097_v34 }
 0x13d   :  { %5137 = vmatpush3.msra.mxu1 %v6814_v15  ;;  %5111 = vmatprep.subr.mxu0 %v9245_v18  ;;  %v179_v15 = vld [vmem:[#allocation6 + $0x3f8] sm:$0xff]  ;;  %v7458_v18 = vand.u32 4294901760, %v159_v51 }
 0x13e   :  { %5138 = vmatprep.subr.mxu1 %v6835_v35  ;;  %5112 = vmatpush3.msra.mxu0 %v9246_v9  ;;  %v163_v35 = vld [vmem:[#allocation6 + $0x378] sm:$0xff]  ;;  %v7390_v61 = vand.u32 4294901760, %v179_v15  ;;  %v7461_v9 = vand.u32 4294901760, %v158_v29 }
 0x13f   :  { %5139 = vmatpush3.msra.mxu1 %v6827_v28  ;;  %5113 = vmatprep.subr.mxu0 %v9247_v24  ;;  %v178_v28 = vld [vmem:[#allocation6 + $0x3f0] sm:$0xff]  ;;  %v7395_v43 = vand.u32 4294901760, %v163_v35  ;;  %9268 = vst [vmem:[#allocation23_spill] sm:$0xff] %v7458_v18 }
 0x140   :  { %5140 = vmatprep.subr.mxu1 %v9211_v0  ;;  %5114 = vmatpush3.msra.mxu0 %v9248_v4  ;;  %v9253_v0 = vand.u32 4294901760, %v7100_v30  ;;  %v7400_v57 = vand.u32 4294901760, %v178_v28  ;;  %v176_v30 = vld [vmem:[#allocation6 + $0x3e0] sm:$0xff]  ;;  %9269 = vst [vmem:[#allocation19_spill] sm:$0xff] %v7461_v9 }
 0x141   :  { %5141 = vmatpush3.msra.mxu1 %v9213_v22  ;;  %5115 = vmatprep.subr.mxu0 %v9249_v33  ;;  %v161_v22 = vld [vmem:[#allocation6 + $0x368] sm:$0xff]  ;;  %v7419_v44 = vsub.f32 %v163_v35, %v7395_v43  ;;  %v7432_v34 = vand.u32 4294901760, %v176_v30  ;;  %v7483_v35 = vand.u32 4294901760, %v173_v12 }
 0x142   :  { %5142 = vmatprep.subr.mxu1 %v9215_v8  ;;  %5116 = vmatpush3.msra.mxu0 %v9250_v39  ;;  %v7408_v8 = vand.u32 4294901760, %v162_v37  ;;  %v9273_v33 = vld [vmem:[#allocation32_spill] sm:$0xff]  ;;  %v8811_v39 = vand.u32 4294901760, %v7444_v2 }
 0x143   :  { %5143 = vmatpush3.msra.mxu1 %v9217_v62  ;;  %5117 = vmatprep.subr.mxu0 %v9251_v36  ;;  %v160_v62 = vld [vmem:[#allocation6 + $0x360] sm:$0xff]  ;;  %9261 = vst [vmem:[#allocation20_spill] sm:$0xff] %v7432_v34  ;;  %v8816_v13 = vand.u32 4294901760, %v7419_v44  ;;  %v7472_v4 = vsub.f32 %v176_v30, %v7432_v34  ;;  %9274 = vst [vmem:[#allocation29_spill] sm:$0xff] %v7483_v35  ;;  %v9275_v36 = vand.u32 4294901760, %v7207_v7 }
 0x144   :  { %5144 = vmatprep.subr.mxu1 %v9218_v14  ;;  %5118 = vmatpush3.msra.mxu0 %v9252_v42  ;;  %v7413_v14 = vsub.f32 %v179_v15, %v7390_v61  ;;  %v9272_v15 = vand.u32 4294901760, %v7214_v50  ;;  %v9276_v42 = vld [vmem:[#allocation38_spill] sm:$0xff]  ;;  %v172_v30 = vld [vmem:[#allocation6 + $0x3c0] sm:$0xff] }
 0x145   :  { %5145 = vmatpush3.msra.mxu1 %v9220_v38  ;;  %5119 = vmatprep.subr.mxu0 %v9253_v0  ;;  %v7424_v38 = vand.u32 4294901760, %v161_v22  ;;  %v7492_v50 = vsub.f32 %v7419_v44, %v8816_v13  ;;  %v9278_v0 = vand.u32 4294901760, %v9277_v55 }
 0x146   :  { %5146 = vmatprep.subr.mxu1 %v9221_v54  ;;  %5120 = vmatpush3.msra.mxu0 %v9254_v45  ;;  %v175_v54 = vld [vmem:[#allocation6 + $0x3d8] sm:$0xff]  ;;  %v8817_v23 = vand.u32 4294901760, %v7413_v14  ;;  %v7501_v45 = vsub.f32 %v159_v51, %v7458_v18 }
 0x147   :  { %5147 = vmatpush3.msra.mxu1 %v9222_v48  ;;  %5121 = vmatprep.subr.mxu0 %v9255_v27  ;;  %9259 = vst [vmem:[#allocation13_spill] sm:$0xff] %v7424_v38  ;;  %v7427_v48 = vsub.f32 %v178_v28, %v7400_v57  ;;  %v7449_v11 = vand.u32 4294901760, %v175_v54  ;;  %v7456_v49 = vsub.f32 %v161_v22, %v7424_v38  ;;  %v157_v28 = vld [vmem:[#allocation6 + $0x348] sm:$0xff] }
 0x148   :  { %5148 = vmatprep.subr.mxu1 %v9223_v53  ;;  %5122 = vmatpush3.msra.mxu0 %v9257_v32  ;;  %v9260_v53 = vand.u32 4294901760, %v7111_v3  ;;  %v174_v3 = vld [vmem:[#allocation6 + $0x3d0] sm:$0xff]  ;;  %v7509_v22 = vsub.f32 %v158_v29, %v7461_v9  ;;  %v9279_v32 = vld [vmem:[#allocation36_spill] sm:$0xff] }
 0x149   :  { %5149 = vmatpush3.msra.mxu1 %v9224_v10  ;;  %5123 = vmatprep.subr.mxu0 %v9258_v63  ;;  %v7434_v10 = vand.u32 4294901760, %v160_v62  ;;  %9265 = vst [vmem:[#allocation27_spill] sm:$0xff] %v7449_v11  ;;  %v8810_v27 = vand.u32 4294901760, %v7456_v49  ;;  %v9280_v63 = vand.u32 4294901760, %v9279_v32  ;;  %v9283_v29 = vld [vmem:[#allocation25_spill] sm:$0xff]  ;;  %v8819_v32 = vand.u32 4294901760, %v7501_v45 }
 0x14a   :  { %5150 = vmatprep.subr.mxu1 %v9225_v31  ;;  %5124 = vmatpush3.msra.mxu0 %v9260_v53  ;;  %v7440_v31 = vsub.f32 %v162_v37, %v7408_v8  ;;  %v7495_v37 = vsub.f32 %v175_v54, %v7449_v11  ;;  %v9281_v54 = vld [vmem:[#allocation24_spill] sm:$0xff]  ;;  %v8814_v53 = vand.u32 4294901760, %v7472_v4 }
 0x14b   :  { %5151 = vmatpush3.msra.mxu1 %v9226_v17  ;;  %9262 = vst [vmem:[#allocation26_spill] sm:$0xff] %v7434_v10  ;;  %5125 = vmatprep.subr.mxu0 %v9263_v41  ;;  %v9264_v17 = vand.u32 4294901760, %v7152_v21  ;;  %v8813_v21 = vand.u32 4294901760, %v7427_v48  ;;  %v7467_v24 = vsub.f32 %v160_v62, %v7434_v10  ;;  %v156_v62 = vld [vmem:[#allocation6 + $0x340] sm:$0xff] }
 0x14c   :  { %5152 = vmatprep.subr.mxu1 %v9227_v58  ;;  %v9266_v58 = vand.u32 4294901760, %v7197_v25  ;;  %v7469_v25 = vand.u32 4294901760, %v174_v3  ;;  %2689 = vmatprep.mubr.f32.mxu0 %v9281_v54  ;;  %v8818_v55 = vand.u32 4294901760, %v7495_v37 }
 0x14d   :  { %5126 = vmatpush3.msra.mxu0 %v9264_v17  ;;  %5153 = vmatpush3.msra.mxu1 %v9228_v5  ;;  %v9270_v5 = vand.u32 4294901760, %v7184_v1  ;;  %v7480_v1 = vsub.f32 %v7413_v14, %v8817_v23  ;;  %v7506_v7 = vsub.f32 %v7427_v48, %v8813_v21  ;;  %v8815_v51 = vand.u32 4294901760, %v7467_v24  ;;  %v9284_v17 = vld [vmem:[#allocation40_spill] sm:$0xff] }
 0x14e   :  { %5127 = vmatprep.subr.mxu0 %v9266_v58  ;;  %5154 = vmatprep.subr.mxu1 %v9267_v16  ;;  %9271 = vst [vmem:[#allocation12_spill] sm:$0xff] %v7469_v25  ;;  %v7520_v41 = vsub.f32 %v174_v3, %v7469_v25  ;;  %v153_v23 = vld [vmem:[#allocation6 + $0x328] sm:$0xff]  ;;  %v152_v58 = vld [vmem:[#allocation6 + $0x320] sm:$0xff] }
 0x14f   :  { %5128 = vmatpush3.msra.mxu0 %v9270_v5  ;;  %5155 = vmatpush3.msra.mxu1 %v9229_v52  ;;  %v8812_v52 = vand.u32 4294901760, %v7440_v31  ;;  %v7533_v5 = vsub.f32 %v7444_v2, %v8811_v39 }
 0x150   :  { %5129 = vmatprep.subr.mxu0 %v9272_v15  ;;  %5156 = vmatprep.subr.mxu1 %v9273_v33  ;;  %v7536_v15 = vsub.f32 %v173_v12, %v7483_v35  ;;  %v7541_v33 = vand.u32 4294901760, %v172_v30  ;;  %v8821_v39 = vand.u32 4294901760, %v7520_v41 }
 0x151   :  { %5130 = vmatpush3.msra.mxu0 %v9275_v36  ;;  %5157 = vmatpush3.msra.mxu1 %v9276_v42  ;;  %v7528_v16 = vsub.f32 %v7440_v31, %v8812_v52  ;;  %v7543_v36 = vand.u32 4294901760, %v156_v62  ;;  %v171_v42 = vld [vmem:[#allocation6 + $0x3b8] sm:$0xff]  ;;  %v154_v52 = vld [vmem:[#allocation6 + $0x330] sm:$0xff] }
 0x152   :  { %5131 = vmatprep.subr.mxu0 %v9278_v0  ;;  %5158 = vmatprep.subr.mxu1 %v7085_v26  ;;  %v7515_v26 = vand.u32 4294901760, %v157_v28  ;;  %9285 = vst [vmem:[#allocation14_spill] sm:$0xff] %v7541_v33  ;;  %v155_v0 = vld [vmem:[#allocation6 + $0x338] sm:$0xff]  ;;  %v7576_v21 = vand.u32 4294901760, %v171_v42 }
 0x153   :  { %5132 = vmatpush3.msra.mxu0 %v9280_v63  ;;  %5159 = vmatpush3.msra.mxu1 %v9283_v29  ;;  %9286 = vst [vmem:[#allocation30_spill] sm:$0xff] %v7543_v36  ;;  %v8820_v63 = vand.u32 4294901760, %v7509_v22  ;;  %v7564_v29 = vsub.f32 %v7472_v4, %v8814_v53  ;;  %v8822_v53 = vand.u32 4294901760, %v7536_v15  ;;  %v7589_v13 = vand.u32 4294901760, %v155_v0 }
 0x154   :  { %9282 = vst [vmem:[#allocation34_spill] sm:$0xff] %v7515_v26  ;;  %2691 = vmatmul.mubr.f32.vlgmr.msra.gmra.mxu0 %v9284_v17  ;;  %5160 = vmatprep.subr.mxu1 %v7132_v40  ;;  %v7552_v40 = vsub.f32 %v7456_v49, %v8810_v27  ;;  %v7569_v27 = vsub.f32 %v7467_v24, %v8815_v51  ;;  %9288 = vst [vmem:[#allocation16_spill] sm:$0xff] %v7576_v21 }
 0x155   :  { %5171 = vmatprep.subr.mxu0 %v7390_v61  ;;  %5161 = vmatpush3.msra.mxu1 %v7113_v6  ;;  %v7559_v6 = vsub.f32 %v157_v28, %v7515_v26  ;;  %v7582_v51 = vsub.f32 %v156_v62, %v7543_v36  ;;  %9290 = vst [vmem:[#allocation17_spill] sm:$0xff] %v7589_v13 }
 0x156   :  { %5172 = vmatpush3.msra.mxu0 %v7395_v43  ;;  %5162 = vmatprep.subr.mxu1 %v9234_v46  ;;  %v2924_v46 = vand.u32 4294901760, %v7528_v16  ;;  %v170_v16 = vld [vmem:[#allocation6 + $0x3b0] sm:$0xff]  ;;  %v7592_v28 = vsub.f32 %v172_v30, %v7541_v33  ;;  %v7600_v62 = vsub.f32 %v7501_v45, %v8819_v32  ;;  %v7607_v12 = vsub.f32 %v7509_v22, %v8820_v63  ;;  %v169_v32 = vld [vmem:[#allocation6 + $0x3a8] sm:$0xff]  ;;  %v168_v30 = vld [vmem:[#allocation6 + $0x3a0] sm:$0xff] }
 0x157   :  { %5173 = vmatprep.subr.mxu0 %v7400_v57  ;;  %9287 = vst [vmem:[#allocation31_spill] sm:$0xff] %v7559_v6  ;;  %5163 = vmatpush3.msra.mxu1 %v7141_v60  ;;  %9289 = vst [vmem:[#allocation15_spill] sm:$0xff] %v7582_v51  ;;  %v7587_v60 = vsub.f32 %v7495_v37, %v8818_v55  ;;  %v7602_v55 = vand.u32 4294901760, %v154_v52  ;;  %v7621_v63 = vand.u32 4294901760, %v170_v16 }
 0x158   :  { %5174 = vmatpush3.msra.mxu0 %v7408_v8  ;;  %5164 = vmatprep.subr.mxu1 %v7163_v20  ;;  %9291 = vst [vmem:[#allocation18_spill] sm:$0xff] %v7592_v28  ;;  %v2931_v20 = vand.u32 4294901760, %v7552_v40  ;;  %v7616_v40 = vsub.f32 %v7520_v41, %v8821_v39  ;;  %v7631_v39 = vsub.f32 %v171_v42, %v7576_v21  ;;  %v2945_v42 = vand.u32 4294901760, %v7600_v62 }
 0x159   :  { %5175 = vmatprep.subr.mxu0 %v7410_v59  ;;  %5165 = vmatpush3.msra.mxu1 %v7173_v19  ;;  %9292 = vst [vmem:[#allocation22_spill] sm:$0xff] %v7602_v55  ;;  %v3050_v19 = vand.u32 4294901760, %v7564_v29  ;;  %9293 = vst [vmem:[#allocation21_spill] sm:$0xff] %v7621_v63  ;;  %v7628_v29 = vand.u32 4294901760, %v153_v23  ;;  %v7662_v62 = vand.u32 4294901760, %v152_v58  ;;  %v9302_v59 = vand.u32 4294901760, %v7592_v28 }
 0x15a   :  { %5176 = vmatpush3.msra.mxu0 %v7424_v38  ;;  %5166 = vmatprep.subr.mxu1 %v7191_v47  ;;  %v7626_v47 = vsub.f32 %v7536_v15, %v8822_v53  ;;  %9295 = vst [vmem:[#allocation39_spill] sm:$0xff] %v7631_v39  ;;  %v49_v38 = vld [vmem:[#allocation3 + $0x38] sm:$0xff]  ;;  %v9298_v53 = vand.u32 4294901760, %v7492_v50  ;;  %v3064_v3 = vand.u32 4294901760, %v7616_v40  ;;  %v167_v40 = vld [vmem:[#allocation6 + $0x398] sm:$0xff]  ;;  %v166_v50 = vld [vmem:[#allocation6 + $0x390] sm:$0xff] }
 0x15b   :  { %5177 = vmatprep.subr.mxu0 %v7432_v34  ;;  %5167 = vmatpush3.msra.mxu1 %v7193_v56  ;;  %9294 = vst [vmem:[#allocation28_spill] sm:$0xff] %v7628_v29  ;;  %v3057_v56 = vand.u32 4294901760, %v7587_v60  ;;  %v9296_v34 = vand.u32 4294901760, %v7480_v1  ;;  %v7649_v60 = vand.u32 4294901760, %v169_v32  ;;  %9300 = vst [vmem:[#allocation32_spill] sm:$0xff] %v7662_v62 }
 0x15c   :  { %2793 = vmatprep.mubr.f32.mxu1 %v9281_v54  ;;  %5178 = vmatpush3.msra.mxu0 %v7434_v10  ;;  %v7637_v54 = vsub.f32 %v155_v0, %v7589_v13  ;;  %v7646_v10 = vsub.f32 %v154_v52, %v7602_v55  ;;  %v151_v0 = vld [vmem:[#allocation6 + $0x318] sm:$0xff]  ;;  %v7660_v52 = vand.u32 4294901760, %v168_v30 }
 0x15d   :  { %2795 = vmatmul.mubr.f32.vlgmr.msra.gmra.mxu1 %v9284_v17  ;;  %5179 = vmatprep.subr.mxu0 %v7449_v11  ;;  %9297 = vst [vmem:[#allocation33_spill] sm:$0xff] %v7649_v60  ;;  %v150_v17 = vld [vmem:[#allocation6 + $0x310] sm:$0xff]  ;;  %v48_v11 = vld [vmem:[#allocation3 + $0x30] sm:$0xff] }
 0x15e   :  { %5206 = vmatprep.subr.mxu1 %v9296_v34  ;;  %5180 = vmatpush3.msra.mxu0 %v7458_v18  ;;  %v9299_v34 = vand.u32 4294901760, %v7559_v6  ;;  %v9301_v18 = vand.u32 4294901760, %v7506_v7 }
 0x15f   :  { %5207 = vmatpush3.msra.mxu1 %v9298_v53  ;;  %5181 = vmatprep.subr.mxu0 %v7469_v25  ;;  %v7669_v53 = vsub.f32 %v153_v23, %v7628_v29  ;;  %v7679_v25 = vsub.f32 %v7592_v28, %v9302_v59  ;;  %v7686_v23 = vand.u32 4294901760, %v151_v0  ;;  %v7697_v59 = vsub.f32 %v169_v32, %v7649_v60 }
 0x160   :  { %v7658_v1 = vsub.f32 %v7559_v6, %v9299_v34  ;;  %5208 = vmatprep.subr.mxu1 %v9301_v18  ;;  %v7673_v6 = vsub.f32 %v170_v16, %v7621_v63  ;;  %5182 = vmatpush3.msra.mxu0 %v7461_v9  ;;  %v9303_v18 = vand.u32 4294901760, %v7582_v51  ;;  %v7688_v34 = vand.u32 4294901760, %v49_v38 }
 0x161   :  { %5209 = vmatpush3.msra.mxu1 %v2924_v46  ;;  %5183 = vmatprep.subr.mxu0 %v7483_v35  ;;  %v9305_v16 = vand.u32 4294901760, %v7533_v5  ;;  %v7694_v9 = vand.u32 4294901760, %v150_v17  ;;  %v7699_v28 = vand.u32 4294901760, %v48_v11  ;;  %v7706_v35 = vand.u32 4294901760, %v167_v40 }
 0x162   :  { %v7684_v7 = vsub.f32 %v7582_v51, %v9303_v18  ;;  %9304 = vst [vmem:[#allocation38_spill] sm:$0xff] %v7688_v34  ;;  %5184 = vmatpush3.msra.mxu0 %v7515_v26  ;;  %v2959_v18 = vand.u32 4294901760, %v7658_v1  ;;  %v7704_v51 = vsub.f32 %v152_v58, %v7662_v62  ;;  %v9308_v32 = vand.u32 4294901760, %v7631_v39  ;;  %v165_v1 = vld [vmem:[#allocation6 + $0x388] sm:$0xff]  ;;  %3137 = vmatprep.mubr.f32.mxu1 %v7688_v34 }
 0x163   :  { %5210 = vmatprep.subr.mxu1 %v9305_v16  ;;  %9306 = vst [vmem:[#allocation35_spill] sm:$0xff] %v7699_v28  ;;  %5185 = vmatprep.subr.mxu0 %v7541_v33  ;;  %v7715_v46 = vand.u32 4294901760, %v166_v50  ;;  %v7719_v58 = vsub.f32 %v168_v30, %v7660_v52  ;;  %v9310_v5 = vand.u32 4294901760, %v7569_v27  ;;  %v149_v26 = vld [vmem:[#allocation6 + $0x308] sm:$0xff]  ;;  %v9311_v30 = vand.u32 4294901760, %v7637_v54 }
 0x164   :  { %5211 = vmatpush3.msra.mxu1 %v2931_v20  ;;  %9307 = vst [vmem:[#allocation36_spill] sm:$0xff] %v7704_v51  ;;  %v7713_v16 = vsub.f32 %v7631_v39, %v9308_v32  ;;  %5186 = vmatpush3.msra.mxu0 %v7543_v36  ;;  %v2966_v33 = vand.u32 4294901760, %v7684_v7  ;;  %v7727_v32 = vsub.f32 %v151_v0, %v7686_v23  ;;  %v164_v7 = vld [vmem:[#allocation6 + $0x380] sm:$0xff] }
 0x165   :  { %5212 = vmatprep.subr.mxu1 %v3050_v19  ;;  %9309 = vst [vmem:[#allocation24_spill] sm:$0xff] %v7715_v46  ;;  %v3078_v19 = vand.u32 4294901760, %v7679_v25  ;;  %v7730_v39 = vsub.f32 %v49_v38, %v7688_v34  ;;  %5187 = vmatprep.subr.mxu0 %v7576_v21  ;;  %v2972_v20 = vsub.f32 %v7637_v54, %v9311_v30  ;;  %v9312_v38 = vand.u32 4294901760, %v7646_v10  ;;  %v9348_v34 = vld [vmem:[#allocation22_spill] sm:$0xff] }
 0x166   :  { %5213 = vmatpush3.msra.mxu1 %v9310_v5  ;;  %v7737_v27 = vsub.f32 %v150_v17, %v7694_v9  ;;  %v148_v5 = vld [vmem:[#allocation6 + $0x300] sm:$0xff]  ;;  %v7741_v0 = vsub.f32 %v48_v11, %v7699_v28  ;;  %5188 = vmatpush3.msra.mxu0 %v7589_v13  ;;  %v7747_v21 = vand.u32 4294901760, %v165_v1  ;;  %v7751_v17 = vsub.f32 %v167_v40, %v7706_v35 }
 0x167   :  { %5214 = vmatprep.subr.mxu1 %v3057_v56  ;;  %v2979_v56 = vsub.f32 %v7646_v10, %v9312_v38  ;;  %5189 = vmatprep.subr.mxu0 %v7621_v63  ;;  %v3085_v11 = vand.u32 4294901760, %v7713_v16  ;;  %v9313_v25 = vand.u32 4294901760, %v7673_v6  ;;  %v7758_v13 = vand.u32 4294901760, %v149_v26 }
 0x168   :  { %5215 = vmatpush3.msra.mxu1 %v2945_v42  ;;  %5190 = vmatpush3.msra.mxu0 %v7602_v55  ;;  %v9314_v30 = vand.u32 4294901760, %v7607_v12  ;;  %v7764_v40 = vand.u32 4294901760, %v164_v7  ;;  %v7766_v36 = vand.u32 4294901760, %v148_v5  ;;  %v7770_v16 = vsub.f32 %v166_v50, %v7715_v46 }
 0x169   :  { %5216 = vmatprep.subr.mxu1 %v3064_v3  ;;  %v3091_v42 = vsub.f32 %v7673_v6, %v9313_v25  ;;  %5191 = vmatprep.subr.mxu0 %v7649_v60  ;;  %v9315_v25 = vand.u32 4294901760, %v7626_v47  ;;  %v2973_v38 = vand.u32 4294901760, %v2972_v20  ;;  %v9316_v55 = vand.u32 4294901760, %v7697_v59 }
 0x16a   :  { %5217 = vmatpush3.msra.mxu1 %v9314_v30  ;;  %v8865_v30 = vand.u32 4294901760, %v7704_v51  ;;  %5192 = vmatpush3.msra.mxu0 %v7628_v29  ;;  %v2980_v3 = vand.u32 4294901760, %v2979_v56  ;;  %v9317_v50 = vand.u32 4294901760, %v7669_v53  ;;  %v7786_v20 = vsub.f32 %v165_v1, %v7747_v21 }
 0x16b   :  { %5218 = vmatprep.subr.mxu1 %v9315_v25  ;;  %v3098_v12 = vsub.f32 %v7697_v59, %v9316_v55  ;;  %5193 = vmatprep.subr.mxu0 %v7660_v52  ;;  %v3092_v55 = vand.u32 4294901760, %v3091_v42  ;;  %v7790_v25 = vsub.f32 %v149_v26, %v7758_v13  ;;  %v9318_v63 = vand.u32 4294901760, %v7719_v58 }
 0x16c   :  { %5219 = vmatpush3.msra.mxu1 %v2959_v18  ;;  %v2986_v60 = vsub.f32 %v7669_v53, %v9317_v50  ;;  %5194 = vmatpush3.msra.mxu0 %v7662_v62  ;;  %v7798_v50 = vsub.f32 %v148_v5, %v7766_v36  ;;  %v9320_v1 = vand.u32 4294901760, %v7730_v39  ;;  %v7805_v26 = vsub.f32 %v164_v7, %v7764_v40 }
 0x16d   :  { %5220 = vmatprep.subr.mxu1 %v3078_v19  ;;  %v3105_v18 = vsub.f32 %v7719_v58, %v9318_v63  ;;  %5195 = vmatprep.subr.mxu0 %v7706_v35  ;;  %v3099_v63 = vand.u32 4294901760, %v3098_v12  ;;  %v9322_v5 = vand.u32 4294901760, %v7741_v0  ;;  %v9323_v7 = vand.u32 4294901760, %v7751_v17 }
 0x16e   :  { %5221 = vmatpush3.msra.mxu1 %v2966_v33  ;;  %9319 = vst [vmem:[#allocation25_spill] sm:$0xff] %v7798_v50  ;;  %v2899_v19 = vsub.f32 %v7730_v39, %v9320_v1  ;;  %9321 = vst [vmem:[#allocation40_spill] sm:$0xff] %v7805_v26  ;;  %v2993_v33 = vsub.f32 %v7704_v51, %v8865_v30  ;;  %5196 = vmatpush3.msra.mxu0 %v7686_v23  ;;  %v2987_v1 = vand.u32 4294901760, %v2986_v60 }
 0x16f   :  { %5222 = vmatprep.subr.mxu1 %v3085_v11  ;;  %v2905_v56 = vsub.f32 %v7741_v0, %v9322_v5  ;;  %v3112_v42 = vsub.f32 %v7751_v17, %v9323_v7  ;;  %5197 = vmatprep.subr.mxu0 %v7715_v46  ;;  %v3106_v12 = vand.u32 4294901760, %v3105_v18  ;;  %v9324_v30 = vand.u32 4294901760, %v7727_v32 }
 0x170   :  { %5223 = vmatpush3.msra.mxu1 %v2973_v38  ;;  %5198 = vmatpush3.msra.mxu0 %v7694_v9  ;;  %v2900_v60 = vand.u32 4294901760, %v2899_v19  ;;  %v9325_v38 = vand.u32 4294901760, %v7770_v16  ;;  %v8869_v11 = vand.u32 4294901760, %v7805_v26  ;;  %v9326_v46 = vand.u32 4294901760, %v7737_v27 }
 0x171   :  { %5224 = vmatprep.subr.mxu1 %v3092_v55  ;;  %v3000_v5 = vsub.f32 %v7727_v32, %v9324_v30  ;;  %5199 = vmatprep.subr.mxu0 %v7747_v21  ;;  %v2994_v55 = vand.u32 4294901760, %v2993_v33  ;;  %v2906_v18 = vand.u32 4294901760, %v2905_v56  ;;  %v8868_v47 = vand.u32 4294901760, %v7798_v50 }
 0x172   :  { %5225 = vmatpush3.msra.mxu1 %v2980_v3  ;;  %v3119_v7 = vsub.f32 %v7770_v16, %v9325_v38  ;;  %v3007_v30 = vsub.f32 %v7737_v27, %v9326_v46  ;;  %5200 = vmatpush3.msra.mxu0 %v7758_v13  ;;  %v3113_v3 = vand.u32 4294901760, %v3112_v42  ;;  %v9327_v19 = vand.u32 4294901760, %v7786_v20 }
 0x173   :  { %5226 = vmatprep.subr.mxu1 %v3099_v63  ;;  %5201 = vmatprep.subr.mxu0 %v7764_v40  ;;  %v3001_v63 = vand.u32 4294901760, %v3000_v5  ;;  %v9328_v56 = vand.u32 4294901760, %v7790_v25  ;;  %v3133_v42 = vsub.f32 %v7805_v26, %v8869_v11  ;;  %v9346_v11 = vld [vmem:[#allocation17_spill] sm:$0xff] }
 0x174   :  { %5227 = vmatpush3.msra.mxu1 %v2987_v1  ;;  %v3126_v38 = vsub.f32 %v7786_v20, %v9327_v19  ;;  %5202 = vmatpush3.msra.mxu0 %v7766_v36  ;;  %v3120_v46 = vand.u32 4294901760, %v3119_v7  ;;  %v3008_v1 = vand.u32 4294901760, %v3007_v30  ;;  %v9330_v30 = vld [vmem:[#allocation31_spill] sm:$0xff]  ;;  %v9332_v19 = vld [vmem:[#allocation18_spill] sm:$0xff] }
 0x175   :  { %5228 = vmatprep.subr.mxu1 %v3106_v12  ;;  %v3014_v33 = vsub.f32 %v7790_v25, %v9328_v56  ;;  %2901 = vmatprep.mubr.f32.mxu0 %v2900_v60  ;;  %v3021_v12 = vsub.f32 %v7798_v50, %v8868_v47  ;;  %v3134_v7 = vand.u32 4294901760, %v3133_v42  ;;  %v9335_v56 = vld [vmem:[#allocation26_spill] sm:$0xff]  ;;  %v9338_v42 = vld [vmem:[#allocation23_spill] sm:$0xff]  ;;  %v9345_v47 = vld [vmem:[#allocation16_spill] sm:$0xff] }
 0x176   :  { %5229 = vmatpush3.msra.mxu1 %v2994_v55  ;;  %2907 = vmatmul.mubr.f32.vlgmr.msra.gmra.mxu0 %v2906_v18  ;;  %v3127_v5 = vand.u32 4294901760, %v3126_v38  ;;  %v9329_v18 = vld [vmem:[#allocation37_spill] sm:$0xff]  ;;  %v9333_v38 = vld [vmem:[#allocation20_spill] sm:$0xff] }
 0x177   :  { %5230 = vmatprep.subr.mxu1 %v3113_v3  ;;  %5241 = vmatprep.subr.mxu0 %v7413_v14  ;;  %v3015_v60 = vand.u32 4294901760, %v3014_v33  ;;  %v3022_v55 = vand.u32 4294901760, %v3021_v12  ;;  %v9331_v3 = vld [vmem:[#allocation13_spill] sm:$0xff]  ;;  %v9336_v33 = vld [vmem:[#allocation39_spill] sm:$0xff] }
 0x178   :  { %5231 = vmatpush3.msra.mxu1 %v3001_v63  ;;  %5242 = vmatpush3.msra.mxu0 %v7419_v44  ;;  %v9334_v63 = vld [vmem:[#allocation15_spill] sm:$0xff] }
 0x179   :  { %5232 = vmatprep.subr.mxu1 %v3120_v46  ;;  %5243 = vmatprep.subr.mxu0 %v7427_v48  ;;  %v9337_v46 = vld [vmem:[#allocation27_spill] sm:$0xff] }
 0x17a   :  { %5233 = vmatpush3.msra.mxu1 %v3008_v1  ;;  %5244 = vmatpush3.msra.mxu0 %v7440_v31  ;;  %v9339_v1 = vld [vmem:[#allocation12_spill] sm:$0xff]  ;;  %v9340_v12 = vld [vmem:[#allocation19_spill] sm:$0xff] }
 0x17b   :  { %5234 = vmatprep.subr.mxu1 %v3127_v5  ;;  %5245 = vmatprep.subr.mxu0 %v7444_v2  ;;  %v9341_v5 = vld [vmem:[#allocation29_spill] sm:$0xff] }
 0x17c   :  { %5235 = vmatpush3.msra.mxu1 %v3015_v60  ;;  %5246 = vmatpush3.msra.mxu0 %v7456_v49  ;;  %v9342_v60 = vld [vmem:[#allocation34_spill] sm:$0xff] }
 0x17d   :  { %5236 = vmatprep.subr.mxu1 %v3134_v7  ;;  %5247 = vmatprep.subr.mxu0 %v7472_v4  ;;  %v9343_v7 = vld [vmem:[#allocation14_spill] sm:$0xff] }
 0x17e   :  { %5237 = vmatpush3.msra.mxu1 %v3022_v55  ;;  %5248 = vmatpush3.msra.mxu0 %v7467_v24  ;;  %v9344_v55 = vld [vmem:[#allocation30_spill] sm:$0xff] }
 0x17f   :  { %3139 = vmatmul.mubr.f32.vlgmr.msra.gmra.mxu1 %v7699_v28  ;;  %5249 = vmatprep.subr.mxu0 %v7495_v37  ;;  %v9347_v28 = vld [vmem:[#allocation21_spill] sm:$0xff] }
 0x180   :  { %5276 = vmatprep.subr.mxu1 %v7390_v61  ;;  %5250 = vmatpush3.msra.mxu0 %v7501_v45 }
 0x181   :  { %5277 = vmatpush3.msra.mxu1 %v7395_v43  ;;  %5251 = vmatprep.subr.mxu0 %v7520_v41 }
 0x182   :  { %5278 = vmatprep.subr.mxu1 %v7400_v57  ;;  %5252 = vmatpush3.msra.mxu0 %v7509_v22 }
 0x183   :  { %5279 = vmatpush3.msra.mxu1 %v7408_v8  ;;  %5253 = vmatprep.subr.mxu0 %v7536_v15 }
 0x184   :  { %5280 = vmatprep.subr.mxu1 %v9329_v18  ;;  %5254 = vmatpush3.msra.mxu0 %v9330_v30 }
 0x185   :  { %5281 = vmatpush3.msra.mxu1 %v9331_v3  ;;  %5255 = vmatprep.subr.mxu0 %v9332_v19 }
 0x186   :  { %5282 = vmatprep.subr.mxu1 %v9333_v38  ;;  %5256 = vmatpush3.msra.mxu0 %v9334_v63 }
 0x187   :  { %5283 = vmatpush3.msra.mxu1 %v9335_v56  ;;  %5257 = vmatprep.subr.mxu0 %v9336_v33 }
 0x188   :  { %5284 = vmatprep.subr.mxu1 %v9337_v46  ;;  %5258 = vmatpush3.msra.mxu0 %v7637_v54 }
 0x189   :  { %5285 = vmatpush3.msra.mxu1 %v9338_v42  ;;  %5259 = vmatprep.subr.mxu0 %v7673_v6 }
 0x18a   :  { %5286 = vmatprep.subr.mxu1 %v9339_v1  ;;  %5260 = vmatpush3.msra.mxu0 %v7646_v10 }
 0x18b   :  { %5287 = vmatpush3.msra.mxu1 %v9340_v12  ;;  %5261 = vmatprep.subr.mxu0 %v7697_v59 }
 0x18c   :  { %5288 = vmatprep.subr.mxu1 %v9341_v5  ;;  %5262 = vmatpush3.msra.mxu0 %v7669_v53 }
 0x18d   :  { %5289 = vmatpush3.msra.mxu1 %v9342_v60  ;;  %5263 = vmatprep.subr.mxu0 %v7719_v58 }
 0x18e   :  { %5290 = vmatprep.subr.mxu1 %v9343_v7  ;;  %5264 = vmatpush3.msra.mxu0 %v7704_v51  ;;  %v9349_v51 = vld [vmem:[#allocation33_spill] sm:$0xff] }
 0x18f   :  { %5291 = vmatpush3.msra.mxu1 %v9344_v55  ;;  %5265 = vmatprep.subr.mxu0 %v7751_v17 }
 0x190   :  { %5292 = vmatprep.subr.mxu1 %v9345_v47  ;;  %5266 = vmatpush3.msra.mxu0 %v7727_v32 }
 0x191   :  { %5293 = vmatpush3.msra.mxu1 %v9346_v11  ;;  %5267 = vmatprep.subr.mxu0 %v7770_v16 }
 0x192   :  { %5294 = vmatprep.subr.mxu1 %v9347_v28  ;;  %5268 = vmatpush3.msra.mxu0 %v7737_v27 }
 0x193   :  { %5295 = vmatpush3.msra.mxu1 %v9348_v34  ;;  %5269 = vmatprep.subr.mxu0 %v7786_v20 }
 0x194   :  { %5296 = vmatprep.subr.mxu1 %v9349_v51  ;;  %5270 = vmatpush3.msra.mxu0 %v7790_v25  ;;  %v9350_v51 = vand.u32 4294901760, %v7413_v14  ;;  %v9355_v14 = vand.u32 4294901760, %v7444_v2  ;;  %v9360_v2 = vand.u32 4294901760, %v7741_v0 }
 0x195   :  { %5297 = vmatpush3.msra.mxu1 %v7628_v29  ;;  %5271 = vmatprep.subr.mxu0 %v7805_v26  ;;  %v9351_v29 = vand.u32 4294901760, %v7419_v44  ;;  %v9352_v26 = vld [vmem:[#allocation24_spill] sm:$0xff]  ;;  %v9356_v44 = vand.u32 4294901760, %v7456_v49  ;;  %v9362_v49 = vand.u32 4294901760, %v7501_v45  ;;  %v9367_v45 = vand.u32 4294901760, %v9332_v19 }
 0x196   :  { %5298 = vmatprep.subr.mxu1 %v7660_v52  ;;  %5272 = vmatpush3.msra.mxu0 %v7798_v50  ;;  %v9353_v50 = vand.u32 4294901760, %v7427_v48  ;;  %v9357_v48 = vand.u32 4294901760, %v7472_v4  ;;  %v9363_v4 = vand.u32 4294901760, %v7520_v41 }
 0x197   :  { %3274 = vmatprep.mubr.f32.mxu0 %v7730_v39  ;;  %5299 = vmatpush3.msra.mxu1 %v7662_v62  ;;  %v9354_v62 = vand.u32 4294901760, %v7440_v31  ;;  %v9358_v31 = vand.u32 4294901760, %v7730_v39  ;;  %v211_v39 = vld [vmem:[#allocation6 + $0x4f8] sm:$0xff] }
 0x198   :  { %3277 = vmatmul.mubr.f32.vlgmr.msra.gmra.mxu0 %v7741_v0  ;;  %5300 = vmatprep.subr.mxu1 %v7706_v35  ;;  %v194_v0 = vld [vmem:[#allocation6 + $0x470] sm:$0xff] }
 0x199   :  { %5311 = vmatprep.subr.mxu0 %v9350_v51  ;;  %5301 = vmatpush3.msra.mxu1 %v7686_v23  ;;  %v9359_v51 = vand.u32 4294901760, %v7467_v24  ;;  %v9364_v24 = vand.u32 4294901760, %v7509_v22  ;;  %v9369_v22 = vand.u32 4294901760, %v9336_v33  ;;  %v192_v33 = vld [vmem:[#allocation6 + $0x460] sm:$0xff] }
 0x19a   :  { %5312 = vmatpush3.msra.mxu0 %v9351_v29  ;;  %5302 = vmatprep.subr.mxu1 %v9352_v26  ;;  %v9361_v29 = vand.u32 4294901760, %v7495_v37  ;;  %v9365_v37 = vand.u32 4294901760, %v7536_v15  ;;  %v210_v15 = vld [vmem:[#allocation6 + $0x4f0] sm:$0xff] }
 0x19b   :  { %5313 = vmatprep.subr.mxu0 %v9353_v50  ;;  %5303 = vmatpush3.msra.mxu1 %v7694_v9  ;;  %v9371_v50 = vand.u32 4294901760, %v7673_v6  ;;  %v7981_v19 = vand.u32 4294901760, %v210_v15 }
 0x19c   :  { %5314 = vmatpush3.msra.mxu0 %v9354_v62  ;;  %5304 = vmatprep.subr.mxu1 %v7747_v21  ;;  %v9370_v62 = vand.u32 4294901760, %v7637_v54  ;;  %v193_v54 = vld [vmem:[#allocation6 + $0x468] sm:$0xff] }
 0x19d   :  { %5315 = vmatprep.subr.mxu0 %v9355_v14  ;;  %5305 = vmatpush3.msra.mxu1 %v7758_v13  ;;  %v191_v14 = vld [vmem:[#allocation6 + $0x458] sm:$0xff] }
 0x19e   :  { %5316 = vmatpush3.msra.mxu0 %v9356_v44  ;;  %5306 = vmatprep.subr.mxu1 %v7764_v40  ;;  %v9378_v44 = vld [vmem:[#allocation36_spill] sm:$0xff] }
 0x19f   :  { %5317 = vmatprep.subr.mxu0 %v9357_v48  ;;  %5307 = vmatpush3.msra.mxu1 %v7766_v36  ;;  %v206_v48 = vld [vmem:[#allocation6 + $0x4d0] sm:$0xff] }
 0x1a0   :  { %3381 = vmatprep.mubr.f32.mxu1 %v9358_v31  ;;  %5318 = vmatpush3.msra.mxu0 %v9359_v51 }
 0x1a1   :  { %3385 = vmatmul.mubr.f32.vlgmr.msra.gmra.mxu1 %v9360_v2  ;;  %5319 = vmatprep.subr.mxu0 %v9361_v29  ;;  %v8024_v29 = vand.u32 4294901760, %v191_v14 }
 0x1a2   :  { %5346 = vmatprep.subr.mxu1 %v7390_v61  ;;  %5320 = vmatpush3.msra.mxu0 %v9362_v49  ;;  %v9366_v61 = vand.u32 4294901760, %v9330_v30  ;;  %v190_v49 = vld [vmem:[#allocation6 + $0x450] sm:$0xff] }
 0x1a3   :  { %5347 = vmatpush3.msra.mxu1 %v7395_v43  ;;  %5321 = vmatprep.subr.mxu0 %v9363_v4  ;;  %v195_v43 = vld [vmem:[#allocation6 + $0x478] sm:$0xff]  ;;  %9384 = vst [vmem:[#allocation20_spill] sm:$0xff] %v8024_v29 }
 0x1a4   :  { %5348 = vmatprep.subr.mxu1 %v7400_v57  ;;  %5322 = vmatpush3.msra.mxu0 %v9364_v24  ;;  %v7959_v57 = vand.u32 4294901760, %v211_v39  ;;  %v7967_v41 = vand.u32 4294901760, %v195_v43 }
 0x1a5   :  { %5349 = vmatpush3.msra.mxu1 %v7408_v8  ;;  %5323 = vmatprep.subr.mxu0 %v9365_v37  ;;  %v9368_v8 = vand.u32 4294901760, %v9334_v63  ;;  %v9373_v63 = vand.u32 4294901760, %v7697_v59  ;;  %v7999_v59 = vand.u32 4294901760, %v193_v54  ;;  %v9388_v37 = vand.u32 4294901760, %v7786_v20  ;;  %v9392_v20 = vld [vmem:[#allocation28_spill] sm:$0xff] }
 0x1a6   :  { %5350 = vmatprep.subr.mxu1 %v9329_v18  ;;  %5324 = vmatpush3.msra.mxu0 %v9366_v61  ;;  %v209_v18 = vld [vmem:[#allocation6 + $0x4e8] sm:$0xff]  ;;  %v7976_v30 = vsub.f32 %v211_v39, %v7959_v57  ;;  %v7987_v6 = vsub.f32 %v195_v43, %v7967_v41  ;;  %v9387_v39 = vand.u32 4294901760, %v7737_v27  ;;  %v9389_v61 = vld [vmem:[#allocation33_spill] sm:$0xff] }
 0x1a7   :  { %5351 = vmatpush3.msra.mxu1 %v9331_v3  ;;  %5325 = vmatprep.subr.mxu0 %v9367_v45  ;;  %v9372_v3 = vand.u32 4294901760, %v7646_v10  ;;  %v9374_v10 = vand.u32 4294901760, %v7669_v53  ;;  %9376 = vst [vmem:[#allocation37_spill] sm:$0xff] %v7999_v59  ;;  %v9379_v53 = vand.u32 4294901760, %v9378_v44  ;;  %v8033_v4 = vsub.f32 %v193_v54, %v7999_v59 }
 0x1a8   :  { %5352 = vmatprep.subr.mxu1 %v9333_v38  ;;  %5326 = vmatpush3.msra.mxu0 %v9368_v8  ;;  %v208_v38 = vld [vmem:[#allocation6 + $0x4e0] sm:$0xff]  ;;  %v8886_v2 = vand.u32 4294901760, %v7987_v6  ;;  %v8060_v45 = vand.u32 4294901760, %v190_v49  ;;  %v189_v8 = vld [vmem:[#allocation6 + $0x448] sm:$0xff] }
 0x1a9   :  { %5353 = vmatpush3.msra.mxu1 %v9335_v56  ;;  %5327 = vmatprep.subr.mxu0 %v9369_v22  ;;  %v7989_v56 = vand.u32 4294901760, %v194_v0  ;;  %v8880_v54 = vand.u32 4294901760, %v8033_v4  ;;  %v8092_v44 = vand.u32 4294901760, %v189_v8 }
 0x1aa   :  { %5354 = vmatprep.subr.mxu1 %v9337_v46  ;;  %5328 = vmatpush3.msra.mxu0 %v9370_v62  ;;  %v7994_v46 = vand.u32 4294901760, %v209_v18  ;;  %v8058_v43 = vsub.f32 %v7987_v6, %v8886_v2  ;;  %9390 = vst [vmem:[#allocation26_spill] sm:$0xff] %v8060_v45  ;;  %v8070_v62 = vsub.f32 %v191_v14, %v8024_v29  ;;  %v185_v2 = vld [vmem:[#allocation6 + $0x428] sm:$0xff] }
 0x1ab   :  { %5355 = vmatpush3.msra.mxu1 %v9338_v42  ;;  %5329 = vmatprep.subr.mxu0 %v9371_v50  ;;  %v207_v42 = vld [vmem:[#allocation6 + $0x4d8] sm:$0xff]  ;;  %v8016_v31 = vsub.f32 %v194_v0, %v7989_v56  ;;  %v9393_v50 = vld [vmem:[#allocation40_spill] sm:$0xff]  ;;  %9399 = vst [vmem:[#allocation27_spill] sm:$0xff] %v8092_v44 }
 0x1ac   :  { %5356 = vmatprep.subr.mxu1 %v9339_v1  ;;  %5330 = vmatpush3.msra.mxu0 %v9372_v3  ;;  %v9375_v1 = vand.u32 4294901760, %v7719_v58  ;;  %v8010_v58 = vsub.f32 %v210_v15, %v7981_v19  ;;  %v8018_v51 = vand.u32 4294901760, %v207_v42  ;;  %v9391_v15 = vand.u32 4294901760, %v7790_v25 }
 0x1ad   :  { %5357 = vmatpush3.msra.mxu1 %v9340_v12  ;;  %5331 = vmatprep.subr.mxu0 %v9373_v63  ;;  %v8001_v12 = vand.u32 4294901760, %v208_v38  ;;  %v8882_v27 = vand.u32 4294901760, %v8016_v31  ;;  %v188_v63 = vld [vmem:[#allocation6 + $0x440] sm:$0xff] }
 0x1ae   :  { %5358 = vmatprep.subr.mxu1 %v9341_v5  ;;  %5332 = vmatpush3.msra.mxu0 %v9374_v10  ;;  %v8888_v5 = vand.u32 4294901760, %v7976_v30  ;;  %9382 = vst [vmem:[#allocation18_spill] sm:$0xff] %v8018_v51  ;;  %v8064_v22 = vsub.f32 %v207_v42, %v8018_v51  ;;  %v9395_v10 = vld [vmem:[#allocation25_spill] sm:$0xff] }
 0x1af   :  { %5359 = vmatpush3.msra.mxu1 %v9342_v60  ;;  %5333 = vmatprep.subr.mxu0 %v9375_v1  ;;  %9377 = vst [vmem:[#allocation31_spill] sm:$0xff] %v8001_v12  ;;  %v8007_v60 = vand.u32 4294901760, %v192_v33  ;;  %v8043_v24 = vsub.f32 %v208_v38, %v8001_v12  ;;  %v204_v38 = vld [vmem:[#allocation6 + $0x4c0] sm:$0xff]  ;;  %v9396_v42 = vand.u32 4294901760, %v9395_v10  ;;  %v9397_v1 = vld [vmem:[#allocation38_spill] sm:$0xff] }
 0x1b0   :  { %5360 = vmatprep.subr.mxu1 %v9343_v7  ;;  %5334 = vmatpush3.msra.mxu0 %v9379_v53  ;;  %v9381_v7 = vand.u32 4294901760, %v7751_v17  ;;  %v8027_v17 = vsub.f32 %v209_v18, %v7994_v46  ;;  %v9394_v18 = vand.u32 4294901760, %v9393_v50  ;;  %v187_v50 = vld [vmem:[#allocation6 + $0x438] sm:$0xff] }
 0x1b1   :  { %5361 = vmatpush3.msra.mxu1 %v9344_v55  ;;  %9380 = vst [vmem:[#allocation13_spill] sm:$0xff] %v8007_v60  ;;  %v9383_v55 = vand.u32 4294901760, %v7727_v32  ;;  %v8038_v32 = vsub.f32 %v7976_v30, %v8888_v5  ;;  %v8881_v25 = vand.u32 4294901760, %v8043_v24  ;;  %3551 = vmatprep.mubr.f32.mxu0 %v9397_v1  ;;  %v183_v5 = vld [vmem:[#allocation6 + $0x418] sm:$0xff] }
 0x1b2   :  { %5335 = vmatprep.subr.mxu0 %v9381_v7  ;;  %5362 = vmatprep.subr.mxu1 %v9345_v47  ;;  %v9385_v47 = vand.u32 4294901760, %v7770_v16  ;;  %v8885_v16 = vand.u32 4294901760, %v8010_v58  ;;  %v8879_v0 = vand.u32 4294901760, %v8027_v17  ;;  %v203_v7 = vld [vmem:[#allocation6 + $0x4b8] sm:$0xff] }
 0x1b3   :  { %5336 = vmatpush3.msra.mxu0 %v9383_v55  ;;  %5363 = vmatpush3.msra.mxu1 %v9346_v11  ;;  %v8040_v11 = vand.u32 4294901760, %v206_v48  ;;  %v3891_v3 = vand.u32 4294901760, %v8038_v32  ;;  %v9400_v55 = vld [vmem:[#allocation32_spill] sm:$0xff]  ;;  %v8129_v10 = vsub.f32 %v8043_v24, %v8881_v25  ;;  %v186_v25 = vld [vmem:[#allocation6 + $0x430] sm:$0xff] }
 0x1b4   :  { %5337 = vmatprep.subr.mxu0 %v9385_v47  ;;  %5364 = vmatprep.subr.mxu1 %v9347_v28  ;;  %v8049_v28 = vsub.f32 %v192_v33, %v8007_v60 }
 0x1b5   :  { %9386 = vst [vmem:[#allocation15_spill] sm:$0xff] %v8040_v11  ;;  %5338 = vmatpush3.msra.mxu0 %v9387_v39  ;;  %5365 = vmatpush3.msra.mxu1 %v9348_v34  ;;  %v205_v34 = vld [vmem:[#allocation6 + $0x4c8] sm:$0xff]  ;;  %v8080_v33 = vsub.f32 %v206_v48, %v8040_v11  ;;  %v9401_v48 = vld [vmem:[#allocation35_spill] sm:$0xff]  ;;  %v8099_v39 = vsub.f32 %v190_v49, %v8060_v45  ;;  %v8116_v49 = vand.u32 4294901760, %v188_v63 }
 0x1b6   :  { %5339 = vmatprep.subr.mxu0 %v9388_v37  ;;  %5366 = vmatprep.subr.mxu1 %v9389_v61  ;;  %v8090_v14 = vand.u32 4294901760, %v205_v34  ;;  %v8883_v53 = vand.u32 4294901760, %v8049_v28  ;;  %v8104_v37 = vsub.f32 %v8016_v31, %v8882_v27  ;;  %v8884_v61 = vand.u32 4294901760, %v8064_v22 }
 0x1b7   :  { %5340 = vmatpush3.msra.mxu0 %v9391_v15  ;;  %5367 = vmatpush3.msra.mxu1 %v9392_v20  ;;  %v8112_v15 = vsub.f32 %v8027_v17, %v8879_v0  ;;  %v8114_v20 = vand.u32 4294901760, %v204_v38  ;;  %9403 = vst [vmem:[#allocation12_spill] sm:$0xff] %v8116_v49  ;;  %v8138_v0 = vsub.f32 %v189_v8, %v8092_v44 }
 0x1b8   :  { %5341 = vmatprep.subr.mxu0 %v9394_v18  ;;  %5368 = vmatprep.subr.mxu1 %v7660_v52  ;;  %v8088_v52 = vsub.f32 %v8010_v58, %v8885_v16  ;;  %9398 = vst [vmem:[#allocation39_spill] sm:$0xff] %v8090_v14  ;;  %v8887_v18 = vand.u32 4294901760, %v8070_v62  ;;  %v8146_v27 = vsub.f32 %v205_v34, %v8090_v14 }
 0x1b9   :  { %5342 = vmatpush3.msra.mxu0 %v9396_v42  ;;  %5369 = vmatpush3.msra.mxu1 %v9400_v55  ;;  %9402 = vst [vmem:[#allocation23_spill] sm:$0xff] %v8114_v20  ;;  %v8131_v42 = vand.u32 4294901760, %v203_v7  ;;  %v8889_v55 = vand.u32 4294901760, %v8080_v33  ;;  %9405 = vst [vmem:[#allocation29_spill] sm:$0xff] %v8138_v0  ;;  %v8154_v8 = vsub.f32 %v8064_v22, %v8884_v61  ;;  %v3905_v34 = vand.u32 4294901760, %v8112_v15  ;;  %v202_v61 = vld [vmem:[#allocation6 + $0x4b0] sm:$0xff] }
 0x1ba   :  { %3553 = vmatmul.mubr.f32.vlgmr.msra.gmra.mxu0 %v9401_v48  ;;  %5370 = vmatprep.subr.mxu1 %v7706_v35  ;;  %v8124_v35 = vsub.f32 %v8033_v4, %v8880_v54  ;;  %v8143_v54 = vsub.f32 %v8049_v28, %v8883_v53  ;;  %v8890_v53 = vand.u32 4294901760, %v8099_v39  ;;  %v8171_v16 = vsub.f32 %v204_v38, %v8114_v20  ;;  %v184_v38 = vld [vmem:[#allocation6 + $0x420] sm:$0xff] }
 0x1bb   :  { %5381 = vmatprep.subr.mxu0 %v7959_v57  ;;  %5371 = vmatpush3.msra.mxu1 %v7686_v23  ;;  %9404 = vst [vmem:[#allocation19_spill] sm:$0xff] %v8131_v42  ;;  %v3898_v23 = vand.u32 4294901760, %v8088_v52  ;;  %v8156_v52 = vand.u32 4294901760, %v187_v50  ;;  %v8181_v15 = vand.u32 4294901760, %v186_v25 }
 0x1bc   :  { %5382 = vmatpush3.msra.mxu0 %v7967_v41  ;;  %5372 = vmatprep.subr.mxu1 %v9352_v26  ;;  %v3786_v26 = vand.u32 4294901760, %v8104_v37  ;;  %v8168_v37 = vsub.f32 %v8070_v62, %v8887_v18  ;;  %9408 = vst [vmem:[#allocation30_spill] sm:$0xff] %v8171_v16  ;;  %v8184_v18 = vsub.f32 %v203_v7, %v8131_v42  ;;  %v200_v7 = vld [vmem:[#allocation6 + $0x4a0] sm:$0xff] }
 0x1bd   :  { %5383 = vmatprep.subr.mxu0 %v7981_v19  ;;  %5373 = vmatpush3.msra.mxu1 %v7694_v9  ;;  %9406 = vst [vmem:[#allocation34_spill] sm:$0xff] %v8156_v52  ;;  %v8163_v9 = vsub.f32 %v188_v63, %v8116_v49  ;;  %v8179_v63 = vsub.f32 %v8080_v33, %v8889_v55  ;;  %v9415_v55 = vand.u32 4294901760, %v8146_v27 }
 0x1be   :  { %5384 = vmatpush3.msra.mxu0 %v7989_v56  ;;  %5374 = vmatprep.subr.mxu1 %v7747_v21  ;;  %v3793_v21 = vand.u32 4294901760, %v8124_v35  ;;  %9409 = vst [vmem:[#allocation16_spill] sm:$0xff] %v8184_v18  ;;  %v201_v35 = vld [vmem:[#allocation6 + $0x4a8] sm:$0xff]  ;;  %v8196_v47 = vsub.f32 %v187_v50, %v8156_v52  ;;  %v9414_v50 = vand.u32 4294901760, %v8058_v43 }
 0x1bf   :  { %5385 = vmatprep.subr.mxu0 %v7994_v46  ;;  %9407 = vst [vmem:[#allocation14_spill] sm:$0xff] %v8163_v9  ;;  %5375 = vmatpush3.msra.mxu1 %v7758_v13  ;;  %v3912_v13 = vand.u32 4294901760, %v8129_v10  ;;  %v8203_v10 = vsub.f32 %v8099_v39, %v8890_v53  ;;  %v8228_v32 = vsub.f32 %v8146_v27, %v9415_v55  ;;  %v8235_v53 = vand.u32 4294901760, %v184_v38 }
 0x1c0   :  { %5386 = vmatpush3.msra.mxu0 %v7999_v59  ;;  %5376 = vmatprep.subr.mxu1 %v7764_v40  ;;  %9410 = vst [vmem:[#allocation17_spill] sm:$0xff] %v8196_v47  ;;  %v8198_v40 = vand.u32 4294901760, %v202_v61  ;;  %v50_v59 = vld [vmem:[#allocation3 + $0x40] sm:$0xff] }
 0x1c1   :  { %5387 = vmatprep.subr.mxu0 %v8001_v12  ;;  %5377 = vmatpush3.msra.mxu1 %v7766_v36  ;;  %v51_v12 = vld [vmem:[#allocation3 + $0x48] sm:$0xff]  ;;  %9417 = vst [vmem:[#allocation36_spill] sm:$0xff] %v8235_v53  ;;  %v8237_v36 = vand.u32 4294901760, %v183_v5  ;;  %v3814_v43 = vand.u32 4294901760, %v8203_v10 }
 0x1c2   :  { %3655 = vmatprep.mubr.f32.mxu1 %v9397_v1  ;;  %9411 = vst [vmem:[#allocation21_spill] sm:$0xff] %v8198_v40  ;;  %5388 = vmatpush3.msra.mxu0 %v8007_v60  ;;  %v8208_v1 = vand.u32 4294901760, %v185_v2  ;;  %v8217_v60 = vsub.f32 %v186_v25, %v8181_v15  ;;  %v8261_v55 = vand.u32 4294901760, %v51_v12 }
 0x1c3   :  { %3657 = vmatmul.mubr.f32.vlgmr.msra.gmra.mxu1 %v9401_v48  ;;  %5389 = vmatprep.subr.mxu0 %v8018_v51  ;;  %v8219_v48 = vand.u32 4294901760, %v201_v35  ;;  %v199_v51 = vld [vmem:[#allocation6 + $0x498] sm:$0xff] }
 0x1c4   :  { %9412 = vst [vmem:[#allocation22_spill] sm:$0xff] %v8208_v1  ;;  %5416 = vmatprep.subr.mxu1 %v3891_v3  ;;  %5390 = vmatpush3.msra.mxu0 %v8024_v29  ;;  %v9416_v3 = vand.u32 4294901760, %v8138_v0  ;;  %v8245_v29 = vsub.f32 %v202_v61, %v8198_v40  ;;  %9420 = vst [vmem:[#allocation33_spill] sm:$0xff] %v8261_v55  ;;  %v8264_v61 = vand.u32 4294901760, %v199_v51 }
 0x1c5   :  { %9413 = vst [vmem:[#allocation24_spill] sm:$0xff] %v8219_v48  ;;  %5417 = vmatpush3.msra.mxu1 %v9414_v50  ;;  %5391 = vmatprep.subr.mxu0 %v8040_v11  ;;  %v8241_v50 = vand.u32 4294901760, %v200_v7 }
 0x1c6   :  { %v8233_v25 = vsub.f32 %v8138_v0, %v9416_v3  ;;  %5418 = vmatprep.subr.mxu1 %v3898_v23  ;;  %5392 = vmatpush3.msra.mxu0 %v8060_v45  ;;  %v8249_v3 = vsub.f32 %v185_v2, %v8208_v1  ;;  %v9418_v0 = vand.u32 4294901760, %v8171_v16  ;;  %v9419_v23 = vand.u32 4294901760, %v8163_v9  ;;  %v198_v45 = vld [vmem:[#allocation6 + $0x490] sm:$0xff] }
 0x1c7   :  { %5419 = vmatpush3.msra.mxu1 %v3786_v26  ;;  %5393 = vmatprep.subr.mxu0 %v8090_v14  ;;  %v9421_v2 = vand.u32 4294901760, %v8184_v18  ;;  %v8280_v14 = vsub.f32 %v184_v38, %v8235_v53  ;;  %v8294_v38 = vsub.f32 %v200_v7, %v8241_v50 }
 0x1c8   :  { %v8254_v11 = vsub.f32 %v8171_v16, %v9418_v0  ;;  %v8259_v10 = vsub.f32 %v8163_v9, %v9419_v23  ;;  %5420 = vmatprep.subr.mxu1 %v3905_v34  ;;  %v8272_v0 = vsub.f32 %v201_v35, %v8219_v48  ;;  %v8274_v16 = vand.u32 4294901760, %v50_v59  ;;  %5394 = vmatpush3.msra.mxu0 %v8092_v44  ;;  %v181_v44 = vld [vmem:[#allocation6 + $0x408] sm:$0xff] }
 0x1c9   :  { %v8269_v26 = vsub.f32 %v8184_v18, %v9421_v2  ;;  %5421 = vmatpush3.msra.mxu1 %v3793_v21  ;;  %v3933_v23 = vand.u32 4294901760, %v8228_v32  ;;  %v3821_v34 = vand.u32 4294901760, %v8233_v25  ;;  %v8283_v9 = vsub.f32 %v183_v5, %v8237_v36  ;;  %v182_v2 = vld [vmem:[#allocation6 + $0x410] sm:$0xff]  ;;  %5395 = vmatprep.subr.mxu0 %v8114_v20  ;;  %v197_v25 = vld [vmem:[#allocation6 + $0x488] sm:$0xff] }
 0x1ca   :  { %9422 = vst [vmem:[#allocation28_spill] sm:$0xff] %v8274_v16  ;;  %5422 = vmatprep.subr.mxu1 %v3912_v13  ;;  %v9423_v35 = vand.u32 4294901760, %v8196_v47  ;;  %5396 = vmatpush3.msra.mxu0 %v8116_v49  ;;  %v9424_v5 = vand.u32 4294901760, %v8143_v54  ;;  %v3940_v13 = vand.u32 4294901760, %v8254_v11  ;;  %v3828_v20 = vand.u32 4294901760, %v8259_v10  ;;  %v180_v11 = vld [vmem:[#allocation6 + $0x400] sm:$0xff] }
 0x1cb   :  { %v8304_v21 = vsub.f32 %v51_v12, %v8261_v55  ;;  %5397 = vmatprep.subr.mxu0 %v8131_v42  ;;  %v9426_v32 = vand.u32 4294901760, %v8154_v8  ;;  %v3947_v7 = vand.u32 4294901760, %v8269_v26  ;;  %v8310_v49 = vand.u32 4294901760, %v182_v2  ;;  %3999 = vmatprep.mubr.f32.mxu1 %v8261_v55 }
 0x1cc   :  { %v8289_v18 = vsub.f32 %v8196_v47, %v9423_v35  ;;  %5423 = vmatpush3.msra.mxu1 %v9424_v5  ;;  %v8301_v35 = vand.u32 4294901760, %v198_v45  ;;  %v196_v5 = vld [vmem:[#allocation6 + $0x480] sm:$0xff]  ;;  %v8314_v10 = vsub.f32 %v50_v59, %v8274_v16  ;;  %5398 = vmatpush3.msra.mxu0 %v8156_v52  ;;  %v9427_v12 = vand.u32 4294901760, %v8168_v37  ;;  %v9464_v55 = vld [vmem:[#allocation24_spill] sm:$0xff] }
 0x1cd   :  { %5424 = vmatprep.subr.mxu1 %v9426_v32  ;;  %v8319_v42 = vand.u32 4294901760, %v197_v25  ;;  %v8321_v8 = vand.u32 4294901760, %v181_v44  ;;  %v8325_v32 = vsub.f32 %v199_v51, %v8264_v61  ;;  %5399 = vmatprep.subr.mxu0 %v8198_v40  ;;  %v9428_v54 = vand.u32 4294901760, %v8179_v63 }
 0x1ce   :  { %9425 = vst [vmem:[#allocation40_spill] sm:$0xff] %v8301_v35  ;;  %5425 = vmatpush3.msra.mxu1 %v9427_v12  ;;  %v3835_v59 = vand.u32 4294901760, %v8289_v18  ;;  %v9429_v52 = vand.u32 4294901760, %v8245_v29  ;;  %v9430_v12 = vand.u32 4294901760, %v8217_v60  ;;  %5400 = vmatpush3.msra.mxu0 %v8181_v15  ;;  %v8339_v51 = vand.u32 4294901760, %v196_v5 }
 0x1cf   :  { %5426 = vmatprep.subr.mxu1 %v9428_v54  ;;  %v8341_v40 = vand.u32 4294901760, %v180_v11  ;;  %v8345_v18 = vsub.f32 %v198_v45, %v8301_v35  ;;  %5401 = vmatprep.subr.mxu0 %v8219_v48  ;;  %v9431_v54 = vand.u32 4294901760, %v8272_v0  ;;  %v8358_v45 = vsub.f32 %v181_v44, %v8321_v8 }
 0x1d0   :  { %v3953_v37 = vsub.f32 %v8245_v29, %v9429_v52  ;;  %v3841_v47 = vsub.f32 %v8217_v60, %v9430_v12  ;;  %5427 = vmatpush3.msra.mxu1 %v3814_v43  ;;  %v8349_v52 = vsub.f32 %v182_v2, %v8310_v49  ;;  %5402 = vmatpush3.msra.mxu0 %v8208_v1  ;;  %v9432_v63 = vand.u32 4294901760, %v8249_v3 }
 0x1d1   :  { %5428 = vmatprep.subr.mxu1 %v3933_v23  ;;  %v3960_v12 = vsub.f32 %v8272_v0, %v9431_v54  ;;  %v8365_v48 = vsub.f32 %v197_v25, %v8319_v42  ;;  %5403 = vmatprep.subr.mxu0 %v8241_v50  ;;  %v9433_v43 = vand.u32 4294901760, %v8294_v38  ;;  %v9435_v25 = vand.u32 4294901760, %v8304_v21 }
 0x1d2   :  { %5429 = vmatpush3.msra.mxu1 %v3821_v34  ;;  %v3848_v23 = vsub.f32 %v8249_v3, %v9432_v63  ;;  %v3954_v54 = vand.u32 4294901760, %v3953_v37  ;;  %v3842_v26 = vand.u32 4294901760, %v3841_v47  ;;  %5404 = vmatpush3.msra.mxu0 %v8235_v53  ;;  %v8374_v63 = vsub.f32 %v180_v11, %v8341_v40 }
 0x1d3   :  { %5430 = vmatprep.subr.mxu1 %v3940_v13  ;;  %v3967_v34 = vsub.f32 %v8294_v38, %v9433_v43  ;;  %v3761_v2 = vsub.f32 %v8304_v21, %v9435_v25  ;;  %v8381_v47 = vsub.f32 %v196_v5, %v8339_v51  ;;  %5405 = vmatprep.subr.mxu0 %v8264_v61  ;;  %v3961_v37 = vand.u32 4294901760, %v3960_v12 }
 0x1d4   :  { %5431 = vmatpush3.msra.mxu1 %v3828_v20  ;;  %9434 = vst [vmem:[#allocation25_spill] sm:$0xff] %v8374_v63  ;;  %v9437_v43 = vand.u32 4294901760, %v8280_v14  ;;  %v9438_v11 = vand.u32 4294901760, %v8314_v10  ;;  %5406 = vmatpush3.msra.mxu0 %v8237_v36  ;;  %v3849_v25 = vand.u32 4294901760, %v3848_v23  ;;  %v9439_v5 = vand.u32 4294901760, %v8325_v32 }
 0x1d5   :  { %9436 = vst [vmem:[#allocation38_spill] sm:$0xff] %v8381_v47  ;;  %5432 = vmatprep.subr.mxu1 %v3947_v7  ;;  %5407 = vmatprep.subr.mxu0 %v8301_v35  ;;  %v3968_v12 = vand.u32 4294901760, %v3967_v34  ;;  %v9441_v23 = vand.u32 4294901760, %v8345_v18  ;;  %v8936_v7 = vand.u32 4294901760, %v8381_v47  ;;  %v9442_v35 = vand.u32 4294901760, %v8349_v52 }
 0x1d6   :  { %v3855_v20 = vsub.f32 %v8280_v14, %v9437_v43  ;;  %v3767_v44 = vsub.f32 %v8314_v10, %v9438_v11  ;;  %5433 = vmatpush3.msra.mxu1 %v3835_v59  ;;  %v3974_v13 = vsub.f32 %v8325_v32, %v9439_v5  ;;  %v9440_v43 = vand.u32 4294901760, %v8283_v9  ;;  %5408 = vmatpush3.msra.mxu0 %v8310_v49 }
 0x1d7   :  { %5434 = vmatprep.subr.mxu1 %v3954_v54  ;;  %v3762_v59 = vand.u32 4294901760, %v3761_v2  ;;  %v3981_v5 = vsub.f32 %v8345_v18, %v9441_v23  ;;  %5409 = vmatprep.subr.mxu0 %v8319_v42  ;;  %v8935_v53 = vand.u32 4294901760, %v8374_v63  ;;  %v9443_v2 = vand.u32 4294901760, %v8365_v48 }
 0x1d8   :  { %v3862_v11 = vsub.f32 %v8283_v9, %v9440_v43  ;;  %5435 = vmatpush3.msra.mxu1 %v3842_v26  ;;  %v3856_v54 = vand.u32 4294901760, %v3855_v20  ;;  %v3768_v34 = vand.u32 4294901760, %v3767_v44  ;;  %v3869_v43 = vsub.f32 %v8349_v52, %v9442_v35  ;;  %5410 = vmatpush3.msra.mxu0 %v8321_v8 }
 0x1d9   :  { %5436 = vmatprep.subr.mxu1 %v3961_v37  ;;  %v3975_v26 = vand.u32 4294901760, %v3974_v13  ;;  %v3988_v23 = vsub.f32 %v8365_v48, %v9443_v2  ;;  %5411 = vmatprep.subr.mxu0 %v8339_v51  ;;  %v9444_v44 = vand.u32 4294901760, %v8358_v45  ;;  %v3982_v35 = vand.u32 4294901760, %v3981_v5  ;;  %v9448_v2 = vld [vmem:[#allocation31_spill] sm:$0xff] }
 0x1da   :  { %5437 = vmatpush3.msra.mxu1 %v3849_v25  ;;  %v3863_v37 = vand.u32 4294901760, %v3862_v11  ;;  %5412 = vmatpush3.msra.mxu0 %v8341_v40  ;;  %v3995_v13 = vsub.f32 %v8381_v47, %v8936_v7  ;;  %v3870_v25 = vand.u32 4294901760, %v3869_v43  ;;  %v9446_v43 = vld [vmem:[#allocation37_spill] sm:$0xff]  ;;  %v9462_v7 = vld [vmem:[#allocation34_spill] sm:$0xff] }
 0x1db   :  { %5438 = vmatprep.subr.mxu1 %v3968_v12  ;;  %v3876_v20 = vsub.f32 %v8358_v45, %v9444_v44  ;;  %3763 = vmatprep.mubr.f32.mxu0 %v3762_v59  ;;  %v3883_v12 = vsub.f32 %v8374_v63, %v8935_v53  ;;  %v3989_v11 = vand.u32 4294901760, %v3988_v23  ;;  %v9449_v23 = vld [vmem:[#allocation14_spill] sm:$0xff]  ;;  %v9451_v44 = vld [vmem:[#allocation16_spill] sm:$0xff]  ;;  %v9461_v53 = vld [vmem:[#allocation19_spill] sm:$0xff] }
 0x1dc   :  { %5439 = vmatpush3.msra.mxu1 %v3856_v54  ;;  %3769 = vmatmul.mubr.f32.vlgmr.msra.gmra.mxu0 %v3768_v34  ;;  %v3996_v5 = vand.u32 4294901760, %v3995_v13  ;;  %v9445_v34 = vld [vmem:[#allocation29_spill] sm:$0xff]  ;;  %v9454_v13 = vld [vmem:[#allocation20_spill] sm:$0xff] }
 0x1dd   :  { %5440 = vmatprep.subr.mxu1 %v3975_v26  ;;  %5451 = vmatprep.subr.mxu0 %v7976_v30  ;;  %v3877_v59 = vand.u32 4294901760, %v3876_v20  ;;  %v3884_v54 = vand.u32 4294901760, %v3883_v12  ;;  %v9447_v26 = vld [vmem:[#allocation30_spill] sm:$0xff] }
 0x1de   :  { %5441 = vmatpush3.msra.mxu1 %v3863_v37  ;;  %5452 = vmatpush3.msra.mxu0 %v7987_v6  ;;  %v9450_v37 = vld [vmem:[#allocation13_spill] sm:$0xff]  ;;  %v9452_v20 = vld [vmem:[#allocation18_spill] sm:$0xff] }
 0x1df   :  { %5442 = vmatprep.subr.mxu1 %v3982_v35  ;;  %5453 = vmatprep.subr.mxu0 %v8010_v58  ;;  %v9453_v35 = vld [vmem:[#allocation17_spill] sm:$0xff]  ;;  %v9456_v12 = vld [vmem:[#allocation26_spill] sm:$0xff] }
 0x1e0   :  { %5443 = vmatpush3.msra.mxu1 %v3870_v25  ;;  %5454 = vmatpush3.msra.mxu0 %v8016_v31  ;;  %v9455_v25 = vld [vmem:[#allocation15_spill] sm:$0xff] }
 0x1e1   :  { %5444 = vmatprep.subr.mxu1 %v3989_v11  ;;  %5455 = vmatprep.subr.mxu0 %v8027_v17  ;;  %v9457_v11 = vld [vmem:[#allocation39_spill] sm:$0xff] }
 0x1e2   :  { %5445 = vmatpush3.msra.mxu1 %v3877_v59  ;;  %5456 = vmatpush3.msra.mxu0 %v8033_v4  ;;  %v9458_v59 = vld [vmem:[#allocation27_spill] sm:$0xff] }
 0x1e3   :  { %5446 = vmatprep.subr.mxu1 %v3996_v5  ;;  %5457 = vmatprep.subr.mxu0 %v8043_v24  ;;  %v9459_v5 = vld [vmem:[#allocation23_spill] sm:$0xff] }
 0x1e4   :  { %5447 = vmatpush3.msra.mxu1 %v3884_v54  ;;  %5458 = vmatpush3.msra.mxu0 %v8049_v28  ;;  %v9460_v54 = vld [vmem:[#allocation12_spill] sm:$0xff] }
 0x1e5   :  { %4001 = vmatmul.mubr.f32.vlgmr.msra.gmra.mxu1 %v8274_v16  ;;  %5459 = vmatprep.subr.mxu0 %v8064_v22  ;;  %v9463_v16 = vld [vmem:[#allocation21_spill] sm:$0xff] }
 0x1e6   :  { %5486 = vmatprep.subr.mxu1 %v7959_v57  ;;  %5460 = vmatpush3.msra.mxu0 %v8070_v62 }
 0x1e7   :  { %5487 = vmatpush3.msra.mxu1 %v7967_v41  ;;  %5461 = vmatprep.subr.mxu0 %v8080_v33 }
 0x1e8   :  { %5488 = vmatprep.subr.mxu1 %v7981_v19  ;;  %5462 = vmatpush3.msra.mxu0 %v8099_v39 }
 0x1e9   :  { %5489 = vmatpush3.msra.mxu1 %v7989_v56  ;;  %5463 = vmatprep.subr.mxu0 %v8146_v27 }
 0x1ea   :  { %5490 = vmatprep.subr.mxu1 %v7994_v46  ;;  %5464 = vmatpush3.msra.mxu0 %v9445_v34 }
 0x1eb   :  { %5491 = vmatpush3.msra.mxu1 %v9446_v43  ;;  %5465 = vmatprep.subr.mxu0 %v9447_v26 }
 0x1ec   :  { %5492 = vmatprep.subr.mxu1 %v9448_v2  ;;  %5466 = vmatpush3.msra.mxu0 %v9449_v23 }
 0x1ed   :  { %5493 = vmatpush3.msra.mxu1 %v9450_v37  ;;  %5467 = vmatprep.subr.mxu0 %v9451_v44 }
 0x1ee   :  { %5494 = vmatprep.subr.mxu1 %v9452_v20  ;;  %5468 = vmatpush3.msra.mxu0 %v9453_v35 }
 0x1ef   :  { %5495 = vmatpush3.msra.mxu1 %v9454_v13  ;;  %5469 = vmatprep.subr.mxu0 %v8245_v29 }
 0x1f0   :  { %5496 = vmatprep.subr.mxu1 %v9455_v25  ;;  %5470 = vmatpush3.msra.mxu0 %v8217_v60 }
 0x1f1   :  { %5497 = vmatpush3.msra.mxu1 %v9456_v12  ;;  %5471 = vmatprep.subr.mxu0 %v8272_v0 }
 0x1f2   :  { %5498 = vmatprep.subr.mxu1 %v9457_v11  ;;  %5472 = vmatpush3.msra.mxu0 %v8249_v3 }
 0x1f3   :  { %5499 = vmatpush3.msra.mxu1 %v9458_v59  ;;  %5473 = vmatprep.subr.mxu0 %v8294_v38 }
 0x1f4   :  { %5500 = vmatprep.subr.mxu1 %v9459_v5  ;;  %5474 = vmatpush3.msra.mxu0 %v8280_v14 }
 0x1f5   :  { %5501 = vmatpush3.msra.mxu1 %v9460_v54  ;;  %5475 = vmatprep.subr.mxu0 %v8325_v32 }
 0x1f6   :  { %5502 = vmatprep.subr.mxu1 %v9461_v53  ;;  %5476 = vmatpush3.msra.mxu0 %v8283_v9 }
 0x1f7   :  { %5503 = vmatpush3.msra.mxu1 %v9462_v7  ;;  %5477 = vmatprep.subr.mxu0 %v8345_v18 }
 0x1f8   :  { %5504 = vmatprep.subr.mxu1 %v9463_v16  ;;  %5478 = vmatpush3.msra.mxu0 %v8349_v52  ;;  %v9465_v16 = vld [vmem:[#allocation36_spill] sm:$0xff] }
 0x1f9   :  { %5505 = vmatpush3.msra.mxu1 %v8181_v15  ;;  %5479 = vmatprep.subr.mxu0 %v8365_v48 }
 0x1fa   :  { %5506 = vmatprep.subr.mxu1 %v9464_v55  ;;  %5480 = vmatpush3.msra.mxu0 %v8358_v45  ;;  %v9466_v55 = vand.u32 4294901760, %v7976_v30  ;;  %v9471_v30 = vand.u32 4294901760, %v8027_v17  ;;  %v9476_v17 = vand.u32 4294901760, %v8314_v10 }
 0x1fb   :  { %5507 = vmatpush3.msra.mxu1 %v8208_v1  ;;  %5481 = vmatprep.subr.mxu0 %v8381_v47  ;;  %v9467_v1 = vand.u32 4294901760, %v7987_v6  ;;  %v9468_v47 = vld [vmem:[#allocation40_spill] sm:$0xff]  ;;  %v9472_v6 = vand.u32 4294901760, %v8033_v4  ;;  %v9478_v4 = vand.u32 4294901760, %v8070_v62  ;;  %v9488_v62 = vand.u32 4294901760, %v8217_v60 }
 0x1fc   :  { %5508 = vmatprep.subr.mxu1 %v8241_v50  ;;  %5482 = vmatpush3.msra.mxu0 %v8374_v63  ;;  %v9469_v63 = vand.u32 4294901760, %v8010_v58  ;;  %v9473_v58 = vand.u32 4294901760, %v8043_v24  ;;  %v9479_v24 = vand.u32 4294901760, %v8080_v33  ;;  %v9489_v33 = vand.u32 4294901760, %v8272_v0 }
 0x1fd   :  { %4136 = vmatprep.mubr.f32.mxu0 %v8304_v21  ;;  %5509 = vmatpush3.msra.mxu1 %v9465_v16  ;;  %v9470_v16 = vand.u32 4294901760, %v8016_v31  ;;  %v9474_v31 = vand.u32 4294901760, %v8304_v21  ;;  %v9492_v60 = vand.u32 4294901760, %v8280_v14  ;;  %v9495_v0 = vand.u32 4294901760, %v8345_v18  ;;  %v9496_v21 = vld [vmem:[#allocation21_spill] sm:$0xff] }
 0x1fe   :  { %4139 = vmatmul.mubr.f32.vlgmr.msra.gmra.mxu0 %v8314_v10  ;;  %5510 = vmatprep.subr.mxu1 %v8264_v61  ;;  %v9497_v14 = vand.u32 4294901760, %v8349_v52  ;;  %v9499_v10 = vld [vmem:[#allocation24_spill] sm:$0xff] }
 0x1ff   :  { %5521 = vmatprep.subr.mxu0 %v9466_v55  ;;  %5511 = vmatpush3.msra.mxu1 %v8237_v36  ;;  %v9493_v55 = vand.u32 4294901760, %v8325_v32  ;;  %v9502_v32 = vld [vmem:[#allocation38_spill] sm:$0xff] }
 0x200   :  { %5522 = vmatpush3.msra.mxu0 %v9467_v1  ;;  %5512 = vmatprep.subr.mxu1 %v9468_v47  ;;  %v9477_v1 = vand.u32 4294901760, %v8064_v22  ;;  %v9481_v22 = vand.u32 4294901760, %v8146_v27  ;;  %v9487_v27 = vand.u32 4294901760, %v8245_v29  ;;  %v9491_v29 = vand.u32 4294901760, %v8294_v38 }
 0x201   :  { %5523 = vmatprep.subr.mxu0 %v9469_v63  ;;  %5513 = vmatpush3.msra.mxu1 %v8310_v49  ;;  %v9498_v38 = vand.u32 4294901760, %v8365_v48  ;;  %v9503_v18 = vand.u32 4294901760, %v9502_v32  ;;  %v9504_v63 = vld [vmem:[#allocation25_spill] sm:$0xff]  ;;  %v9508_v48 = vld [vmem:[#allocation28_spill] sm:$0xff] }
 0x202   :  { %5524 = vmatpush3.msra.mxu0 %v9470_v16  ;;  %5514 = vmatprep.subr.mxu1 %v8319_v42  ;;  %v9475_v16 = vand.u32 4294901760, %v8049_v28  ;;  %v9480_v28 = vand.u32 4294901760, %v8099_v39  ;;  %v9490_v39 = vand.u32 4294901760, %v8249_v3  ;;  %v9494_v3 = vand.u32 4294901760, %v8283_v9  ;;  %v9501_v9 = vld [vmem:[#allocation22_spill] sm:$0xff] }
 0x203   :  { %5525 = vmatprep.subr.mxu0 %v9471_v30  ;;  %5515 = vmatpush3.msra.mxu1 %v8321_v8  ;;  %v9505_v52 = vand.u32 4294901760, %v9504_v63 }
 0x204   :  { %5526 = vmatpush3.msra.mxu0 %v9472_v6  ;;  %5516 = vmatprep.subr.mxu1 %v8339_v51 }
 0x205   :  { %5527 = vmatprep.subr.mxu0 %v9473_v58  ;;  %5517 = vmatpush3.msra.mxu1 %v8341_v40 }
 0x206   :  { %4243 = vmatprep.mubr.f32.mxu1 %v9474_v31  ;;  %5528 = vmatpush3.msra.mxu0 %v9475_v16 }
 0x207   :  { %4247 = vmatmul.mubr.f32.vlgmr.msra.gmra.mxu1 %v9476_v17  ;;  %5529 = vmatprep.subr.mxu0 %v9477_v1 }
 0x208   :  { %5556 = vmatprep.subr.mxu1 %v7959_v57  ;;  %5530 = vmatpush3.msra.mxu0 %v9478_v4  ;;  %v9482_v57 = vand.u32 4294901760, %v9445_v34 }
 0x209   :  { %5557 = vmatpush3.msra.mxu1 %v7967_v41  ;;  %5531 = vmatprep.subr.mxu0 %v9479_v24  ;;  %v9483_v41 = vand.u32 4294901760, %v9447_v26 }
 0x20a   :  { %5558 = vmatprep.subr.mxu1 %v7981_v19  ;;  %5532 = vmatpush3.msra.mxu0 %v9480_v28  ;;  %v9484_v19 = vand.u32 4294901760, %v9449_v23 }
 0x20b   :  { %5559 = vmatpush3.msra.mxu1 %v7989_v56  ;;  %5533 = vmatprep.subr.mxu0 %v9481_v22  ;;  %v9485_v56 = vand.u32 4294901760, %v9451_v44 }
 0x20c   :  { %5560 = vmatprep.subr.mxu1 %v7994_v46  ;;  %5534 = vmatpush3.msra.mxu0 %v9482_v57  ;;  %v9486_v46 = vand.u32 4294901760, %v9453_v35 }
 0x20d   :  { %5561 = vmatpush3.msra.mxu1 %v9446_v43  ;;  %5535 = vmatprep.subr.mxu0 %v9483_v41 }
 0x20e   :  { %5562 = vmatprep.subr.mxu1 %v9448_v2  ;;  %5536 = vmatpush3.msra.mxu0 %v9484_v19 }
 0x20f   :  { %5563 = vmatpush3.msra.mxu1 %v9450_v37  ;;  %5537 = vmatprep.subr.mxu0 %v9485_v56 }
 0x210   :  { %5564 = vmatprep.subr.mxu1 %v9452_v20  ;;  %5538 = vmatpush3.msra.mxu0 %v9486_v46 }
 0x211   :  { %5565 = vmatpush3.msra.mxu1 %v9454_v13  ;;  %5539 = vmatprep.subr.mxu0 %v9487_v27 }
 0x212   :  { %5566 = vmatprep.subr.mxu1 %v9455_v25  ;;  %5540 = vmatpush3.msra.mxu0 %v9488_v62 }
 0x213   :  { %5567 = vmatpush3.msra.mxu1 %v9456_v12  ;;  %5541 = vmatprep.subr.mxu0 %v9489_v33 }
 0x214   :  { %5568 = vmatprep.subr.mxu1 %v9457_v11  ;;  %5542 = vmatpush3.msra.mxu0 %v9490_v39  ;;  %v213_v11 = vstv %s8606_s2  ;;  %s5666_s2 = smov [#allocation8]  }
 0x215   :  { %5569 = vmatpush3.msra.mxu1 %v9458_v59  ;;  %5543 = vmatprep.subr.mxu0 %v9491_v29  ;;  %s4531_s24 = sshll.u32 %s5666_s2, 4  ;;  %s4532_s24 = int_to_ptr.vmem [resolvable:$true] %s4531_s24 }
 0x216   :  { %5570 = vmatprep.subr.mxu1 %v9459_v5  ;;  %5544 = vmatpush3.msra.mxu0 %v9492_v60  ;;  %s5636_s25 = scalar_lea.vmem %s4532_s24, 128  ;;  %p5641_p11 = scmp.lt.s32.totalorder %s4532_s24, %s4532_s24 }
 0x217   :  { %5571 = vmatpush3.msra.mxu1 %v9460_v54  ;;  %5545 = vmatprep.subr.mxu0 %v9493_v55  ;;  %p5637_p10 = scmp.ne.s32.totalorder %s4532_s24, %s5636_s25  ;;  %p5642_p12 = scmp.lt.s32.totalorder %s5636_s25, %s5636_s25 }
 0x218   :  { %5572 = vmatprep.subr.mxu1 %v9461_v53  ;;  %5546 = vmatpush3.msra.mxu0 %v9494_v3  ;;  %v9500_v53 = vand.u32 4294901760, %v8358_v45  ;;  %v4608_v45 = vpop.f32.mrf.mxu1 }
 0x219   :  { %5573 = vmatpush3.msra.mxu1 %v9462_v7  ;;  %5547 = vmatprep.subr.mxu0 %v9495_v0  ;;  %v9506_v7 = vld [vmem:[#allocation33_spill] sm:$0xff]  ;;  %p5643_p13 = por %p5642_p12, %p5641_p11 }
 0x21a   :  { %5574 = vmatprep.subr.mxu1 %v9496_v21  ;;  %5548 = vmatpush3.msra.mxu0 %v9497_v14  ;;  %v4609_v43 = vpop.f32.mrf.mxu1 }
 0x21b   :  { %5575 = vmatpush3.msra.mxu1 %v8181_v15  ;;  %5549 = vmatprep.subr.mxu0 %v9498_v38  ;;  %v9507_v15 = vld [vmem:[#allocation36_spill] sm:$0xff]  ;;  %v4610_v6 = vadd.f32 %v4609_v43, %v4608_v45  ;;  %p5644_p0 = pnand %p5643_p13, %p5637_p10 }
 0x21c   :  { %5576 = vmatprep.subr.mxu1 %v9499_v10  ;;  %5550 = vmatpush3.msra.mxu0 %v9500_v53  ;;  %v4678_v26 = vpop.f32.mrf.mxu1 }
 0x21d   :  { %5577 = vmatpush3.msra.mxu1 %v9501_v9  ;;  %5551 = vmatprep.subr.mxu0 %v9503_v18 }
 0x21e   :  { %5578 = vmatprep.subr.mxu1 %v8241_v50  ;;  %5552 = vmatpush3.msra.mxu0 %v9505_v52  ;;  %v4573_v50 = vpop.f32.mrf.mxu0  ;;  %v4679_v2 = vpop.f32.mrf.mxu1 }
 0x21f   :  { %4413 = vmatprep.mubr.f32.mxu0 %v9506_v7  ;;  %5579 = vmatpush3.msra.mxu1 %v9507_v15  ;;  %v4680_v4 = vadd.f32 %v4679_v2, %v4678_v26 }
 0x220   :  { %4415 = vmatmul.mubr.f32.vlgmr.msra.gmra.mxu0 %v9508_v48  ;;  %5580 = vmatprep.subr.mxu1 %v8264_v61  ;;  %v4574_v61 = vpop.f32.mrf.mxu0  ;;  %v4748_v23 = vpop.f32.mrf.mxu1 }
 0x221   :  { %4517 = vmatprep.mubr.f32.mxu1 %v9506_v7  ;;  %5581 = vmatpush3.msra.mxu1 %v8237_v36  ;;  %v4575_v12 = vadd.f32 %v4574_v61, %v4573_v50 }
 0x222   :  { %5582 = vmatprep.subr.mxu1 %v9468_v47  ;;  %v4643_v34 = vpop.f32.mrf.mxu0  ;;  %v4749_v37 = vpop.f32.mrf.mxu1 }
 0x223   :  { %5583 = vmatpush3.msra.mxu1 %v8310_v49  ;;  %v323_v30 = vadd.f32 %v4575_v12, %v213_v11  ;;  %v4750_v19 = vadd.f32 %v4749_v37, %v4748_v23 }
 0x224   :  { %5584 = vmatprep.subr.mxu1 %v8319_v42  ;;  %v4644_v36 = vpop.f32.mrf.mxu0  ;;  %v4818_v44 = vpop.f32.mrf.mxu1 }
 0x225   :  { %5585 = vmatpush3.msra.mxu1 %v8321_v8  ;;  %v4645_v31 = vadd.f32 %v4644_v36, %v4643_v34  ;;  %v555_v1 = vadd.f32 %v4610_v6, %v323_v30 }
 0x226   :  { %5586 = vmatprep.subr.mxu1 %v8339_v51  ;;  %v4713_v47 = vpop.f32.mrf.mxu0  ;;  %v4819_v20 = vpop.f32.mrf.mxu1 }
 0x227   :  { %5587 = vmatpush3.msra.mxu1 %v8341_v40  ;;  %v693_v28 = vadd.f32 %v4645_v31, %v555_v1  ;;  %v4820_v29 = vadd.f32 %v4819_v20, %v4818_v44 }
 0x228   :  { %4519 = vmatmul.mubr.f32.vlgmr.msra.gmra.mxu1 %v9508_v48  ;;  %v4714_v49 = vpop.f32.mrf.mxu0  ;;  %v4888_v35 = vpop.f32.mrf.mxu1 }
 0x229   :  { %v4715_v22 = vadd.f32 %v4714_v49, %v4713_v47  ;;  %v801_v41 = vadd.f32 %v4680_v4, %v693_v28 }
 0x22a   :  { %v4783_v42 = vpop.f32.mrf.mxu0  ;;  %v4889_v25 = vpop.f32.mrf.mxu1 }
 0x22b   :  { %v969_v27 = vadd.f32 %v4715_v22, %v801_v41  ;;  %v4890_v38 = vadd.f32 %v4889_v25, %v4888_v35 }
 0x22c   :  { %v4784_v8 = vpop.f32.mrf.mxu0  ;;  %v4958_v5 = vpop.f32.mrf.mxu1 }
 0x22d   :  { %v4785_v62 = vadd.f32 %v4784_v8, %v4783_v42  ;;  %v1073_v39 = vadd.f32 %v4750_v19, %v969_v27 }
 0x22e   :  { %v4853_v51 = vpop.f32.mrf.mxu0  ;;  %v4959_v58 = vpop.f32.mrf.mxu1 }
 0x22f   :  { %v1185_v55 = vadd.f32 %v4785_v62, %v1073_v39  ;;  %v4960_v63 = vadd.f32 %v4959_v58, %v4958_v5 }
 0x230   :  { %v4854_v40 = vpop.f32.mrf.mxu0  ;;  %v5028_v17 = vpop.f32.mrf.mxu1 }
 0x231   :  { %v4855_v3 = vadd.f32 %v4854_v40, %v4853_v51  ;;  %v1417_v14 = vadd.f32 %v4820_v29, %v1185_v55 }
 0x232   :  { %v4923_v13 = vpop.f32.mrf.mxu0  ;;  %v5029_v57 = vpop.f32.mrf.mxu1 }
 0x233   :  { %v1555_v53 = vadd.f32 %v4855_v3, %v1417_v14  ;;  %v5030_v45 = vadd.f32 %v5029_v57, %v5028_v17 }
 0x234   :  { %v4924_v59 = vpop.f32.mrf.mxu0  ;;  %v5098_v46 = vpop.f32.mrf.mxu1 }
 0x235   :  { %v4925_v9 = vadd.f32 %v4924_v59, %v4923_v13  ;;  %v1663_v18 = vadd.f32 %v4890_v38, %v1555_v53 }
 0x236   :  { %v4993_v54 = vpop.f32.mrf.mxu0  ;;  %v5099_v60 = vpop.f32.mrf.mxu1 }
 0x237   :  { %v1831_v15 = vadd.f32 %v4925_v9, %v1663_v18  ;;  %v5100_v49 = vadd.f32 %v5099_v60, %v5098_v46 }
 0x238   :  { %v4994_v16 = vpop.f32.mrf.mxu0  ;;  %v5168_v21 = vpop.f32.mrf.mxu1 }
 0x239   :  { %v4995_v48 = vadd.f32 %v4994_v16, %v4993_v54  ;;  %v1935_v61 = vadd.f32 %v4960_v63, %v1831_v15 }
 0x23a   :  { %v5063_v24 = vpop.f32.mrf.mxu0  ;;  %v5169_v32 = vpop.f32.mrf.mxu1 }
 0x23b   :  { %v2047_v43 = vadd.f32 %v4995_v48, %v1935_v61  ;;  %v5170_v51 = vadd.f32 %v5169_v32, %v5168_v21 }
 0x23c   :  { %v5064_v56 = vpop.f32.mrf.mxu0 }
 0x23d   :  { %v5065_v36 = vadd.f32 %v5064_v56, %v5063_v24  ;;  %v2279_v2 = vadd.f32 %v5030_v45, %v2047_v43 }
 0x23e   :  { %v5133_v33 = vpop.f32.mrf.mxu0 }
 0x23f   :  { %v5238_v7 = vpop.f32.mrf.mxu1  ;;  %v2417_v42 = vadd.f32 %v5065_v36, %v2279_v2 }
 0x240   :  { %v5134_v0 = vpop.f32.mrf.mxu0 }
 0x241   :  { %v5239_v34 = vpop.f32.mrf.mxu1  ;;  %v5135_v37 = vadd.f32 %v5134_v0, %v5133_v33  ;;  %v2525_v44 = vadd.f32 %v5100_v49, %v2417_v42 }
 0x242   :  { %v5203_v10 = vpop.f32.mrf.mxu0  ;;  %v5240_v11 = vadd.f32 %v5239_v34, %v5238_v7 }
 0x243   :  { %v2693_v35 = vadd.f32 %v5135_v37, %v2525_v44 }
 0x244   :  { %v5204_v52 = vpop.f32.mrf.mxu0 }
 0x245   :  { %v5205_v13 = vadd.f32 %v5204_v52, %v5203_v10  ;;  %v2797_v12 = vadd.f32 %v5170_v51, %v2693_v35 }
 0x247   :  { %v2909_v5 = vadd.f32 %v5205_v13, %v2797_v12 }
 0x249   :  { %v3141_v58 = vadd.f32 %v5240_v11, %v2909_v5 }
 0x258   :  { %v5273_v50 = vpop.f32.mrf.mxu0 }
 0x25a   :  { %v5274_v26 = vpop.f32.mrf.mxu0 }
 0x25b   :  { %v5275_v54 = vadd.f32 %v5274_v26, %v5273_v50 }
 0x25d   :  { %v3279_v17 = vadd.f32 %v5275_v54, %v3141_v58 }
 0x261   :  { %v5308_v47 = vpop.f32.mrf.mxu1 }
 0x263   :  { %v5309_v8 = vpop.f32.mrf.mxu1 }
 0x264   :  { %v5310_v31 = vadd.f32 %v5309_v8, %v5308_v47 }
 0x266   :  { %v3387_v24 = vadd.f32 %v5310_v31, %v3279_v17 }
 0x27a   :  { %v5343_v23 = vpop.f32.mrf.mxu0 }
 0x27c   :  { %v5344_v20 = vpop.f32.mrf.mxu0 }
 0x27d   :  { %v5345_v1 = vadd.f32 %v5344_v20, %v5343_v23 }
 0x27f   :  { %v3555_v41 = vadd.f32 %v5345_v1, %v3387_v24 }
 0x283   :  { %v5378_v40 = vpop.f32.mrf.mxu1 }
 0x285   :  { %v5379_v59 = vpop.f32.mrf.mxu1 }
 0x286   :  { %v5380_v28 = vadd.f32 %v5379_v59, %v5378_v40 }
 0x288   :  { %v3659_v46 = vadd.f32 %v5380_v28, %v3555_v41 }
 0x29c   :  { %v5413_v25 = vpop.f32.mrf.mxu0 }
 0x29e   :  { %v5414_v30 = vpop.f32.mrf.mxu0 }
 0x29f   :  { %v5415_v19 = vadd.f32 %v5414_v30, %v5413_v25 }
 0x2a1   :  { %v3771_v33 = vadd.f32 %v5415_v19, %v3659_v46 }
 0x2a5   :  { %v5448_v6 = vpop.f32.mrf.mxu1 }
 0x2a7   :  { %v5449_v4 = vpop.f32.mrf.mxu1 }
 0x2a8   :  { %v5450_v27 = vadd.f32 %v5449_v4, %v5448_v6 }
 0x2aa   :  { %v4003_v60 = vadd.f32 %v5450_v27, %v3771_v33 }
 0x2be   :  { %v5483_v16 = vpop.f32.mrf.mxu0 }
 0x2c0   :  { %v5484_v22 = vpop.f32.mrf.mxu0 }
 0x2c1   :  { %v5485_v39 = vadd.f32 %v5484_v22, %v5483_v16 }
 0x2c3   :  { %v4141_v3 = vadd.f32 %v5485_v39, %v4003_v60 }
 0x2c7   :  { %v5518_v57 = vpop.f32.mrf.mxu1 }
 0x2c9   :  { %v5519_v62 = vpop.f32.mrf.mxu1 }
 0x2ca   :  { %v5520_v55 = vadd.f32 %v5519_v62, %v5518_v57 }
 0x2cc   :  { %v4249_v14 = vadd.f32 %v5520_v55, %v4141_v3 }
 0x2e0   :  { %v5553_v56 = vpop.f32.mrf.mxu0 }
 0x2e2   :  { %v5554_v29 = vpop.f32.mrf.mxu0 }
 0x2e3   :  { %v5555_v0 = vadd.f32 %v5554_v29, %v5553_v56 }
 0x2e5   :  { %v4417_v10 = vadd.f32 %v5555_v0, %v4249_v14 }
 0x2e8   :  { %v5588_v21 = vpop.f32.mrf.mxu1 }
 0x2ea   :  { %v5589_v38 = vpop.f32.mrf.mxu1 }
 0x2eb   :  { %v5590_v53 = vadd.f32 %v5589_v38, %v5588_v21 }
 0x2ed   :  { %v4521_v9 = vadd.f32 %v5590_v53, %v4417_v10 }
 0x2ef   :  { %4524 = vst [vmem:[#allocation8] sm:$0xff] %v4521_v9 }
 0x2f0   :  { %5647 = shalt.err (!%p5644_p0)
}
 0x2f1   :  { %4534 = dma.vmem_to_hbm [thread:$0]  %s4532_s24, 128, %s8607_s3, [#allocation5]  }
 0x2f2   :  { %5660 = dma.done.wait [#allocation5], 128  }
 0x2f3   :  { %5661 = vsyncadd [#allocation5], 4294967168 }
 0x2f4   :  { %4538 = vsyncpa [#allocation4], 1 }
 0x2f5   :  { %4539 = vsyncpa [#allocation7], 1 }
 0x2f6   :  { %4540 = vsyncpa [#allocation5], 1 }

</bundles_post_ra>
